<compile_context>
chip_gen: v5e
topology: v5e:2x2
jax: 0.10.0
libtpu: 0.0.40
codegen_flags: <defaults>
</compile_context>

<pallas_src>
import functools

import jax
import jax.numpy as jnp
from jax.experimental import pallas as pl
from jax.experimental.pallas import tpu as pltpu


def make_neumf_kernel(num_hidden_layers):
    """Fused NeuMF kernel for a given number of MLP layers."""

    def kernel(*refs):
        (user_ref, item_ref, wfu_ref, wfi_ref,
         bu_ref, bi_ref, b1_ref) = refs[:7]
        idx = 7
        hidden = []
        for _ in range(num_hidden_layers - 1):
            hidden.append((refs[idx], refs[idx + 1]))
            idx += 2
        wpmf_ref, wpmlp_ref, bp_ref, out_ref = refs[idx:idx + 4]

        u = user_ref[...]    # bf16, fed straight to the MXU
        it = item_ref[...]   # bf16
        mlp0 = b1_ref.shape[-1]   # static; slice boundary (128 -> lane-aligned)

        # --- one fused K=768 matmul per input: [MLP1 | GMF] columns, f32 acc ---
        fu = jnp.dot(u, wfu_ref[...], preferred_element_type=jnp.float32)
        fi = jnp.dot(it, wfi_ref[...], preferred_element_type=jnp.float32)

        # GMF branch: (user @ Wu + bu) * (item @ Wi + bi), f32 elementwise.
        mf_vector = (fu[:, mlp0:] + bu_ref[...]) * (fi[:, mlp0:] + bi_ref[...])

        # MLP branch on concat([user, item]) via the weight split.
        h = jnp.maximum(fu[:, :mlp0] + fi[:, :mlp0] + b1_ref[...], 0.0)
        for wk_ref, bk_ref in hidden:
            h = jnp.dot(h.astype(jnp.bfloat16), wk_ref[...],
                        preferred_element_type=jnp.float32) + bk_ref[...]
            h = jnp.maximum(h, 0.0)

        # Predict layer (N=1): VPU multiply + XLU row-reduce, no MXU.
        logit = (jnp.sum(mf_vector * wpmf_ref[...], axis=-1, keepdims=True)
                 + jnp.sum(h * wpmlp_ref[...], axis=-1, keepdims=True)
                 + bp_ref[...])                       # (block_b, 1) f32
        # Lane-dense store: transpose the column to (1, block_b) (XLU slot).
        out_ref[...] = jnp.transpose(jax.nn.sigmoid(logit)).astype(out_ref.dtype)

    return kernel


def _vmem_capacity_bytes():
    try:
        return int(pltpu.get_tpu_info().vmem_capacity_bytes)
    except Exception:
        return 64 << 20   # conservative (v7x-sized budget)


def _is_v5e():
    try:
        kind = jax.devices()[0].device_kind.lower()
        return ("v5e" in kind) or ("v5 lite" in kind) or ("v5litepod" in kind)
    except Exception:
        return False


def _choose_block_b(batch):
    """Generation-aware batch tile: multiple of 128 (lane-dense output blocks,
    bf16 (16,128) sublane packing), large enough to amortize per-step overhead,
    capped so double-buffered bf16 tiles + f32 intermediates fit VMEM
    (2048 rows on 64 MiB v7x, 4096 on 128 MiB v5e/v6e), and small enough to
    keep >=2 grid steps when the batch allows (megacore)."""
    cap = 2048 if _vmem_capacity_bytes() <= (64 << 20) else 4096
    tile = min(cap, max(128, (batch // 2 // 128) * 128))
    return max(128, tile)


def neumf_forward(user_emb, item_emb, params, layers, block_b=None):
    """Batch-tiled pallas_call; weights VMEM-resident via constant index_maps."""
    batch, in_dim = user_emb.shape
    n_hidden = len(layers)
    mlp0 = layers[0]
    mf_dim = params[2].shape[-1]          # bu: (1, mf_dim)

    if block_b is None:
        block_b = _choose_block_b(batch)
    grid = (pl.cdiv(batch, block_b),)     # ragged last block handled by Pallas

    # Embedding tiles over the batch axis (double-/triple-buffered by Pallas).
    emb_map = lambda i: (i, 0)
    pm = pl.Buffered(3) if _is_v5e() else None   # deeper pipeline on BW-poor v5e
    if pm is not None:
        try:
            emb_spec = pl.BlockSpec((block_b, in_dim), emb_map, pipeline_mode=pm)
        except TypeError:
            emb_spec = pl.BlockSpec((block_b, in_dim), emb_map)
    else:
        emb_spec = pl.BlockSpec((block_b, in_dim), emb_map)

    # Lane-dense output: (1, batch) f32, (1, block_b) blocks along lanes.
    out_spec = pl.BlockSpec((1, block_b), lambda i: (0, i))

    # Weights/biases: full-array blocks, constant index_map -> fetched once and
    # VMEM-resident across the whole grid.  (Buffered(1) single-buffering
    # skipped: savings <1 MiB for these shapes.)
    w_specs = [pl.BlockSpec(p.shape, lambda i: (0, 0)) for p in params]

    # --- cost estimate (advisory, helps XLA overlap surrounding ops) ---
    weight_bytes = sum(int(p.size) * p.dtype.itemsize for p in params)
    flops = 2 * 2 * batch * in_dim * (mlp0 + mf_dim)     # two fused K=768 matmuls
    prev = mlp0
    for out_size in layers[1:]:
        flops += 2 * batch * prev * out_size
        prev = out_size
    flops += 2 * batch * (mf_dim + layers[-1])           # predict-layer reduce
    bytes_accessed = ((user_emb.size + item_emb.size) * user_emb.dtype.itemsize
                      + weight_bytes + batch * 4)
    cost = pl.CostEstimate(flops=int(flops), transcendentals=int(batch),
                           bytes_accessed=int(bytes_accessed))

    # --- VMEM limit from actual buffer sizes, capped at 7/8 of chip capacity ---
    cap_bytes = _vmem_capacity_bytes()
    emb_depth = 3 if pm is not None else 2
    in_tile_bytes = 2 * emb_depth * block_b * in_dim * user_emb.dtype.itemsize
    out_tile_bytes = 2 * block_b * 4
    inter_bytes = 4 * block_b * (mlp0 + mf_dim) * 4      # f32 intermediates headroom
    vmem_limit = int(1.25 * (weight_bytes + in_tile_bytes + out_tile_bytes
                             + inter_bytes)) + (8 << 20)
    vmem_limit = max(16 << 20, min(vmem_limit, (cap_bytes * 7) // 8))

    kernel = make_neumf_kernel(n_hidden)
    out = pl.pallas_call(
        kernel,
        out_shape=jax.ShapeDtypeStruct((1, batch), jnp.float32),
        grid=grid,
        in_specs=[emb_spec, emb_spec] + w_specs,
        out_specs=out_spec,
        compiler_params=pltpu.CompilerParams(
            dimension_semantics=("parallel",),   # batch axis across both v7x TCs
            vmem_limit_bytes=int(vmem_limit)),
        cost_estimate=cost,
    )(user_emb, item_emb, *params)
    return out.reshape(batch, 1)


def init_neumf_params(key, input_dim, mf_dim, layers):
    """Deterministic init.  Matmul weights bf16, biases / predict rows f32.
    Weight shapes are the transpose of PyTorch nn.Linear.weight (x @ W + b).
    The GMF weights are packed next to the first MLP layer's user/item halves:
    wfu = [W1u | Wu] (768, layers[0]+mf_dim), wfi = [W1i | Wi]."""

    def linear(key, fan_in, fan_out, w_dtype=jnp.bfloat16):
        kw, kb = jax.random.split(key)
        bound = 1.0 / jnp.sqrt(fan_in)
        w = jax.random.uniform(kw, (fan_in, fan_out), jnp.float32, -bound, bound)
        b = jax.random.uniform(kb, (1, fan_out), jnp.float32, -bound, bound)
        return w.astype(w_dtype), b

    keys = jax.random.split(key, 3 + len(layers))
    wu, bu = linear(keys[0], input_dim, mf_dim)            # mf_user_layer
    wi, bi = linear(keys[1], input_dim, mf_dim)            # mf_item_layer

    # First MLP layer acts on concat([user, item]) -> in = 2*input_dim (1536).
    w1, b1 = linear(keys[2], 2 * input_dim, layers[0])
    w1u, w1i = w1[:input_dim], w1[input_dim:]

    # Fuse GMF into the first-layer matmul per input: [MLP1 | GMF] columns.
    wfu = jnp.concatenate([w1u, wu], axis=1)
    wfi = jnp.concatenate([w1i, wi], axis=1)

    hidden = []
    prev = layers[0]
    for k, out_size in enumerate(layers[1:]):
        wk, bk = linear(keys[3 + k], prev, out_size)
        hidden.extend([wk, bk])
        prev = out_size

    # predict_layer on concat([mf_vector, mlp_vector]); stored as lane-dense
    # (1, dim) f32 rows for the in-kernel VPU reduce.
    wp, bp = linear(keys[3 + len(layers) - 1], mf_dim + layers[-1], 1,
                    w_dtype=jnp.float32)
    wp_mf = wp[:mf_dim].reshape(1, mf_dim)
    wp_mlp = wp[mf_dim:].reshape(1, layers[-1])

    return [wfu, wfi, bu, bi, b1] + hidden + [wp_mf, wp_mlp, bp]


def neumf_reference(user_emb, item_emb, params, layers):
    """Pure-JAX reference, written the 'PyTorch way' (separate GMF / MLP1
    matmuls, explicit concat semantics), same dtype discipline as the kernel."""
    wfu, wfi, bu, bi, b1 = params[:5]
    rest = params[5:]
    n_hidden = 2 * (len(layers) - 1)
    hidden = rest[:n_hidden]
    wp_mf, wp_mlp, bp = rest[n_hidden:]
    f32 = jnp.float32
    mlp0 = b1.shape[-1]

    w1u, wu = wfu[:, :mlp0], wfu[:, mlp0:]
    w1i, wi = wfi[:, :mlp0], wfi[:, mlp0:]

    mf = ((jnp.dot(user_emb, wu, preferred_element_type=f32) + bu)
          * (jnp.dot(item_emb, wi, preferred_element_type=f32) + bi))
    h = jnp.maximum(jnp.dot(user_emb, w1u, preferred_element_type=f32)
                    + jnp.dot(item_emb, w1i, preferred_element_type=f32) + b1, 0.0)
    for k in range(len(layers) - 1):
        h = jnp.maximum(jnp.dot(h.astype(jnp.bfloat16), hidden[2 * k],
                                preferred_element_type=f32) + hidden[2 * k + 1], 0.0)
    logit = (jnp.sum(mf * wp_mf, axis=-1, keepdims=True)
             + jnp.sum(h * wp_mlp, axis=-1, keepdims=True) + bp)
    return jax.nn.sigmoid(logit)


if __name__ == "__main__":
    # input_dim=768 is implied by the hard-coded 1536 in the PyTorch MLP.
    INPUT_DIM = 768
    MF_DIM = 32
    LAYERS = [128, 64, 32]
    BATCH = 300       # not a multiple of the 128-row tile -> exercises the
                      # un-padded ragged last block (3 grid steps)

    key = jax.random.PRNGKey(0)
    k_params, k_user, k_item = jax.random.split(key, 3)

    params = init_neumf_params(k_params, INPUT_DIM, MF_DIM, LAYERS)
    user_emb = jax.random.normal(k_user, (BATCH, INPUT_DIM), jnp.float32).astype(jnp.bfloat16)
    item_emb = jax.random.normal(k_item, (BATCH, INPUT_DIM), jnp.float32).astype(jnp.bfloat16)

    fwd = jax.jit(functools.partial(neumf_forward, layers=LAYERS))
    out = jax.block_until_ready(fwd(user_emb, item_emb, params))

    ref = neumf_reference(user_emb, item_emb, params, LAYERS)
    assert out.shape == (BATCH, 1)
    assert jnp.allclose(out, ref, atol=2e-3, rtol=2e-3), (out, ref)

    print("KERNEL_OK")
</pallas_src>

<mosaic_0001>
module attributes {stable_mosaic.version = 11 : i64} {
  func.func @kernel(%arg0: i32, %arg1: memref<128x768xbf16, #tpu.memory_space<vmem>>, %arg2: memref<128x768xbf16, #tpu.memory_space<vmem>>, %arg3: memref<768x160xbf16, #tpu.memory_space<vmem>>, %arg4: memref<768x160xbf16, #tpu.memory_space<vmem>>, %arg5: memref<1x32xf32, #tpu.memory_space<vmem>>, %arg6: memref<1x32xf32, #tpu.memory_space<vmem>>, %arg7: memref<1x128xf32, #tpu.memory_space<vmem>>, %arg8: memref<128x64xbf16, #tpu.memory_space<vmem>>, %arg9: memref<1x64xf32, #tpu.memory_space<vmem>>, %arg10: memref<64x32xbf16, #tpu.memory_space<vmem>>, %arg11: memref<1x32xf32, #tpu.memory_space<vmem>>, %arg12: memref<1x32xf32, #tpu.memory_space<vmem>>, %arg13: memref<1x32xf32, #tpu.memory_space<vmem>>, %arg14: memref<1x1xf32, #tpu.memory_space<vmem>>, %arg15: memref<1x128xf32, #tpu.memory_space<vmem>>) attributes {dimension_semantics = [#tpu.dimension_semantics<parallel>], iteration_bounds = array<i64: 3>, scalar_prefetch = 0 : i64, scratch_operands = 0 : i64, tpu.core_type = #tpu.core_type<tc>, window_params = [{transform_indices = @transform_0, window_bounds = array<i64: 128, 768>}, {transform_indices = @transform_1, window_bounds = array<i64: 128, 768>}, {pipeline_mode = #tpu.pipeline_mode<synchronous>, transform_indices = @transform_2, window_bounds = array<i64: 768, 160>}, {pipeline_mode = #tpu.pipeline_mode<synchronous>, transform_indices = @transform_3, window_bounds = array<i64: 768, 160>}, {pipeline_mode = #tpu.pipeline_mode<synchronous>, transform_indices = @transform_4, window_bounds = array<i64: 1, 32>}, {pipeline_mode = #tpu.pipeline_mode<synchronous>, transform_indices = @transform_5, window_bounds = array<i64: 1, 32>}, {pipeline_mode = #tpu.pipeline_mode<synchronous>, transform_indices = @transform_6, window_bounds = array<i64: 1, 128>}, {pipeline_mode = #tpu.pipeline_mode<synchronous>, transform_indices = @transform_7, window_bounds = array<i64: 128, 64>}, {pipeline_mode = #tpu.pipeline_mode<synchronous>, transform_indices = @transform_8, window_bounds = array<i64: 1, 64>}, {pipeline_mode = #tpu.pipeline_mode<synchronous>, transform_indices = @transform_9, window_bounds = array<i64: 64, 32>}, {pipeline_mode = #tpu.pipeline_mode<synchronous>, transform_indices = @transform_10, window_bounds = array<i64: 1, 32>}, {pipeline_mode = #tpu.pipeline_mode<synchronous>, transform_indices = @transform_11, window_bounds = array<i64: 1, 32>}, {pipeline_mode = #tpu.pipeline_mode<synchronous>, transform_indices = @transform_12, window_bounds = array<i64: 1, 32>}, {pipeline_mode = #tpu.pipeline_mode<synchronous>, transform_indices = @transform_13, window_bounds = array<i64: 1, 1>}, {transform_indices = @transform_14, window_bounds = array<i64: 1, 128>}]} {
    %c0 = arith.constant 0 : index
    %c0_0 = arith.constant 0 : index
    %0 = vector.load %arg1[%c0, %c0_0] : memref<128x768xbf16, #tpu.memory_space<vmem>>, vector<128x768xbf16>
    %c0_1 = arith.constant 0 : index
    %c0_2 = arith.constant 0 : index
    %1 = vector.load %arg2[%c0_1, %c0_2] : memref<128x768xbf16, #tpu.memory_space<vmem>>, vector<128x768xbf16>
    %c0_3 = arith.constant 0 : index
    %c0_4 = arith.constant 0 : index
    %2 = vector.load %arg3[%c0_3, %c0_4] : memref<768x160xbf16, #tpu.memory_space<vmem>>, vector<768x160xbf16>
    %cst = arith.constant dense<0.000000e+00> : vector<128x160xf32>
    %3 = tpu.matmul %0, %2, %cst {dimension_numbers = #tpu.dot_dimension_numbers<[1], [0], [0], [1], [0, 0, 1, 1], [], []>} : vector<128x768xbf16>, vector<768x160xbf16>, vector<128x160xf32> -> vector<128x160xf32>
    %c0_5 = arith.constant 0 : index
    %c0_6 = arith.constant 0 : index
    %4 = vector.load %arg4[%c0_5, %c0_6] : memref<768x160xbf16, #tpu.memory_space<vmem>>, vector<768x160xbf16>
    %cst_7 = arith.constant dense<0.000000e+00> : vector<128x160xf32>
    %5 = tpu.matmul %1, %4, %cst_7 {dimension_numbers = #tpu.dot_dimension_numbers<[1], [0], [0], [1], [0, 0, 1, 1], [], []>} : vector<128x768xbf16>, vector<768x160xbf16>, vector<128x160xf32> -> vector<128x160xf32>
    %6 = vector.extract_strided_slice %3 {offsets = [0, 128], sizes = [128, 32], strides = [1, 1]} : vector<128x160xf32> to vector<128x32xf32>
    %c0_8 = arith.constant 0 : index
    %c0_9 = arith.constant 0 : index
    %7 = vector.load %arg5[%c0_8, %c0_9] : memref<1x32xf32, #tpu.memory_space<vmem>>, vector<1x32xf32>
    %8 = vector.broadcast %7 : vector<1x32xf32> to vector<128x32xf32>
    %9 = arith.addf %6, %8 : vector<128x32xf32>
    %10 = vector.extract_strided_slice %5 {offsets = [0, 128], sizes = [128, 32], strides = [1, 1]} : vector<128x160xf32> to vector<128x32xf32>
    %c0_10 = arith.constant 0 : index
    %c0_11 = arith.constant 0 : index
    %11 = vector.load %arg6[%c0_10, %c0_11] : memref<1x32xf32, #tpu.memory_space<vmem>>, vector<1x32xf32>
    %12 = vector.broadcast %11 : vector<1x32xf32> to vector<128x32xf32>
    %13 = arith.addf %10, %12 : vector<128x32xf32>
    %14 = arith.mulf %9, %13 : vector<128x32xf32>
    %15 = vector.extract_strided_slice %3 {offsets = [0, 0], sizes = [128, 128], strides = [1, 1]} : vector<128x160xf32> to vector<128x128xf32>
    %16 = vector.extract_strided_slice %5 {offsets = [0, 0], sizes = [128, 128], strides = [1, 1]} : vector<128x160xf32> to vector<128x128xf32>
    %17 = arith.addf %15, %16 : vector<128x128xf32>
    %c0_12 = arith.constant 0 : index
    %c0_13 = arith.constant 0 : index
    %18 = vector.load %arg7[%c0_12, %c0_13] : memref<1x128xf32, #tpu.memory_space<vmem>>, vector<1x128xf32>
    %19 = vector.broadcast %18 : vector<1x128xf32> to vector<128x128xf32>
    %20 = arith.addf %17, %19 : vector<128x128xf32>
    %cst_14 = arith.constant 0.000000e+00 : f32
    %21 = vector.broadcast %cst_14 : f32 to vector<128x128xf32>
    %22 = arith.maximumf %20, %21 : vector<128x128xf32>
    %23 = arith.truncf %22 : vector<128x128xf32> to vector<128x128xbf16>
    %c0_15 = arith.constant 0 : index
    %c0_16 = arith.constant 0 : index
    %24 = vector.load %arg8[%c0_15, %c0_16] : memref<128x64xbf16, #tpu.memory_space<vmem>>, vector<128x64xbf16>
    %cst_17 = arith.constant dense<0.000000e+00> : vector<128x64xf32>
    %25 = tpu.matmul %23, %24, %cst_17 {dimension_numbers = #tpu.dot_dimension_numbers<[1], [0], [0], [1], [0, 0, 1, 1], [], []>} : vector<128x128xbf16>, vector<128x64xbf16>, vector<128x64xf32> -> vector<128x64xf32>
    %c0_18 = arith.constant 0 : index
    %c0_19 = arith.constant 0 : index
    %26 = vector.load %arg9[%c0_18, %c0_19] : memref<1x64xf32, #tpu.memory_space<vmem>>, vector<1x64xf32>
    %27 = vector.broadcast %26 : vector<1x64xf32> to vector<128x64xf32>
    %28 = arith.addf %25, %27 : vector<128x64xf32>
    %cst_20 = arith.constant 0.000000e+00 : f32
    %29 = vector.broadcast %cst_20 : f32 to vector<128x64xf32>
    %30 = arith.maximumf %28, %29 : vector<128x64xf32>
    %31 = arith.truncf %30 : vector<128x64xf32> to vector<128x64xbf16>
    %c0_21 = arith.constant 0 : index
    %c0_22 = arith.constant 0 : index
    %32 = vector.load %arg10[%c0_21, %c0_22] : memref<64x32xbf16, #tpu.memory_space<vmem>>, vector<64x32xbf16>
    %cst_23 = arith.constant dense<0.000000e+00> : vector<128x32xf32>
    %33 = tpu.matmul %31, %32, %cst_23 {dimension_numbers = #tpu.dot_dimension_numbers<[1], [0], [0], [1], [0, 0, 1, 1], [], []>} : vector<128x64xbf16>, vector<64x32xbf16>, vector<128x32xf32> -> vector<128x32xf32>
    %c0_24 = arith.constant 0 : index
    %c0_25 = arith.constant 0 : index
    %34 = vector.load %arg11[%c0_24, %c0_25] : memref<1x32xf32, #tpu.memory_space<vmem>>, vector<1x32xf32>
    %35 = vector.broadcast %34 : vector<1x32xf32> to vector<128x32xf32>
    %36 = arith.addf %33, %35 : vector<128x32xf32>
    %cst_26 = arith.constant 0.000000e+00 : f32
    %37 = vector.broadcast %cst_26 : f32 to vector<128x32xf32>
    %38 = arith.maximumf %36, %37 : vector<128x32xf32>
    %c0_27 = arith.constant 0 : index
    %c0_28 = arith.constant 0 : index
    %39 = vector.load %arg12[%c0_27, %c0_28] : memref<1x32xf32, #tpu.memory_space<vmem>>, vector<1x32xf32>
    %40 = vector.broadcast %39 : vector<1x32xf32> to vector<128x32xf32>
    %41 = arith.mulf %14, %40 : vector<128x32xf32>
    %cst_29 = arith.constant dense<0.000000e+00> : vector<128xf32>
    %42 = vector.multi_reduction <add>, %41, %cst_29 [1] : vector<128x32xf32> to vector<128xf32>
    %43 = vector.shape_cast %42 : vector<128xf32> to vector<128x1xf32>
    %c0_30 = arith.constant 0 : index
    %c0_31 = arith.constant 0 : index
    %44 = vector.load %arg13[%c0_30, %c0_31] : memref<1x32xf32, #tpu.memory_space<vmem>>, vector<1x32xf32>
    %45 = vector.broadcast %44 : vector<1x32xf32> to vector<128x32xf32>
    %46 = arith.mulf %38, %45 : vector<128x32xf32>
    %cst_32 = arith.constant dense<0.000000e+00> : vector<128xf32>
    %47 = vector.multi_reduction <add>, %46, %cst_32 [1] : vector<128x32xf32> to vector<128xf32>
    %48 = vector.shape_cast %47 : vector<128xf32> to vector<128x1xf32>
    %49 = arith.addf %43, %48 : vector<128x1xf32>
    %c0_33 = arith.constant 0 : index
    %c0_34 = arith.constant 0 : index
    %50 = vector.load %arg14[%c0_33, %c0_34] : memref<1x1xf32, #tpu.memory_space<vmem>>, vector<1x1xf32>
    %51 = vector.broadcast %50 : vector<1x1xf32> to vector<128x1xf32>
    %52 = arith.addf %49, %51 : vector<128x1xf32>
    %53 = arith.negf %52 : vector<128x1xf32>
    %54 = math.exp %53 : vector<128x1xf32>
    %cst_35 = arith.constant 1.000000e+00 : f32
    %55 = vector.broadcast %cst_35 : f32 to vector<128x1xf32>
    %56 = arith.addf %55, %54 : vector<128x1xf32>
    %57 = arith.divf %55, %56 : vector<128x1xf32>
    %58 = tpu.transpose %57, [1, 0] : vector<128x1xf32> -> vector<1x128xf32>
    %c0_36 = arith.constant 0 : index
    %c0_37 = arith.constant 0 : index
    %59 = vector.load %arg15[%c0_36, %c0_37] : memref<1x128xf32, #tpu.memory_space<vmem>>, vector<1x128xf32>
    tpu.vector_store %arg15[%c0_36, %c0_37], %58 {strides = array<i32>} : memref<1x128xf32, #tpu.memory_space<vmem>>, vector<1x128xf32>,
    return
  }
  func.func @transform_0(%arg0: i32) -> (i32, i32) {
    %c0_i32 = arith.constant 0 : i32
    %c0_i32_0 = arith.constant 0 : i32
    return %arg0, %c0_i32 : i32, i32
  }
  func.func @transform_1(%arg0: i32) -> (i32, i32) {
    %c0_i32 = arith.constant 0 : i32
    %c0_i32_0 = arith.constant 0 : i32
    return %arg0, %c0_i32 : i32, i32
  }
  func.func @transform_2(%arg0: i32) -> (i32, i32) {
    %c0_i32 = arith.constant 0 : i32
    %c0_i32_0 = arith.constant 0 : i32
    %c0_i32_1 = arith.constant 0 : i32
    return %c0_i32, %c0_i32_0 : i32, i32
  }
  func.func @transform_3(%arg0: i32) -> (i32, i32) {
    %c0_i32 = arith.constant 0 : i32
    %c0_i32_0 = arith.constant 0 : i32
    %c0_i32_1 = arith.constant 0 : i32
    return %c0_i32, %c0_i32_0 : i32, i32
  }
  func.func @transform_4(%arg0: i32) -> (i32, i32) {
    %c0_i32 = arith.constant 0 : i32
    %c0_i32_0 = arith.constant 0 : i32
    %c0_i32_1 = arith.constant 0 : i32
    return %c0_i32, %c0_i32_0 : i32, i32
  }
  func.func @transform_5(%arg0: i32) -> (i32, i32) {
    %c0_i32 = arith.constant 0 : i32
    %c0_i32_0 = arith.constant 0 : i32
    %c0_i32_1 = arith.constant 0 : i32
    return %c0_i32, %c0_i32_0 : i32, i32
  }
  func.func @transform_6(%arg0: i32) -> (i32, i32) {
    %c0_i32 = arith.constant 0 : i32
    %c0_i32_0 = arith.constant 0 : i32
    %c0_i32_1 = arith.constant 0 : i32
    return %c0_i32, %c0_i32_0 : i32, i32
  }
  func.func @transform_7(%arg0: i32) -> (i32, i32) {
    %c0_i32 = arith.constant 0 : i32
    %c0_i32_0 = arith.constant 0 : i32
    %c0_i32_1 = arith.constant 0 : i32
    return %c0_i32, %c0_i32_0 : i32, i32
  }
  func.func @transform_8(%arg0: i32) -> (i32, i32) {
    %c0_i32 = arith.constant 0 : i32
    %c0_i32_0 = arith.constant 0 : i32
    %c0_i32_1 = arith.constant 0 : i32
    return %c0_i32, %c0_i32_0 : i32, i32
  }
  func.func @transform_9(%arg0: i32) -> (i32, i32) {
    %c0_i32 = arith.constant 0 : i32
    %c0_i32_0 = arith.constant 0 : i32
    %c0_i32_1 = arith.constant 0 : i32
    return %c0_i32, %c0_i32_0 : i32, i32
  }
  func.func @transform_10(%arg0: i32) -> (i32, i32) {
    %c0_i32 = arith.constant 0 : i32
    %c0_i32_0 = arith.constant 0 : i32
    %c0_i32_1 = arith.constant 0 : i32
    return %c0_i32, %c0_i32_0 : i32, i32
  }
  func.func @transform_11(%arg0: i32) -> (i32, i32) {
    %c0_i32 = arith.constant 0 : i32
    %c0_i32_0 = arith.constant 0 : i32
    %c0_i32_1 = arith.constant 0 : i32
    return %c0_i32, %c0_i32_0 : i32, i32
  }
  func.func @transform_12(%arg0: i32) -> (i32, i32) {
    %c0_i32 = arith.constant 0 : i32
    %c0_i32_0 = arith.constant 0 : i32
    %c0_i32_1 = arith.constant 0 : i32
    return %c0_i32, %c0_i32_0 : i32, i32
  }
  func.func @transform_13(%arg0: i32) -> (i32, i32) {
    %c0_i32 = arith.constant 0 : i32
    %c0_i32_0 = arith.constant 0 : i32
    %c0_i32_1 = arith.constant 0 : i32
    return %c0_i32, %c0_i32_0 : i32, i32
  }
  func.func @transform_14(%arg0: i32) -> (i32, i32) {
    %c0_i32 = arith.constant 0 : i32
    %c0_i32_0 = arith.constant 0 : i32
    return %c0_i32, %arg0 : i32, i32
  }
}

</mosaic_0001>

<bundles_post_ra>
// kernel: neumf_forward.1
= control target key start
LH: loop header
LB: loop body
LE: loop exit
PB: predicated region body
PF: predicated region fallthrough
CT: control target
= control target key end

     0   :  { %s8769_s0 = inlined_call_operand.vmem [shape: bf16[300,768], index: 0, kind: input, shape index: {}]   ;;  %s8770_s1 = inlined_call_operand.vmem [shape: bf16[300,768], index: 1, kind: input, shape index: {}]   ;;  %s8771_s2 = inlined_call_operand.vmem [shape: bf16[768,160], index: 2, kind: input, shape index: {}]   ;;  %s8772_s3 = inlined_call_operand.vmem [shape: bf16[768,160], index: 3, kind: input, shape index: {}]   ;;  %s8773_s4 = inlined_call_operand.vmem [shape: f32[1,32], index: 4, kind: input, shape index: {}]   ;;  %s8774_s5 = inlined_call_operand.vmem [shape: f32[1,32], index: 5, kind: input, shape index: {}]   ;;  %s8775_s6 = inlined_call_operand.vmem [shape: f32[1,128], index: 6, kind: input, shape index: {}]   ;;  %s8776_s7 = inlined_call_operand.vmem [shape: bf16[128,64], index: 7, kind: input, shape index: {}]   ;;  %s8777_s8 = inlined_call_operand.vmem [shape: f32[1,64], index: 8, kind: input, shape index: {}]   ;;  %s8778_s9 = inlined_call_operand.vmem [shape: bf16[64,32], index: 9, kind: input, shape index: {}]   ;;  %s8779_s10 = inlined_call_operand.vmem [shape: f32[1,32], index: 10, kind: input, shape index: {}]   ;;  %s8780_s11 = inlined_call_operand.vmem [shape: f32[1,32], index: 11, kind: input, shape index: {}]   ;;  %s8781_s12 = inlined_call_operand.vmem [shape: f32[1,32], index: 12, kind: input, shape index: {}]   ;;  %s8782_s13 = inlined_call_operand.<no memory space> [shape: f32[1,1], index: 13, kind: input, shape index: {}]   ;;  %s8783_s14 = inlined_call_operand.hbm [shape: f32[1,300], index: 14, kind: output, shape index: {}]  }
   0x1   :  { %v19_v0 = vstv %s8782_s13 }
   0x2   :  { %20 = vst [vmem:[#allocation2] sm:$0x1] %v19_v0 }
   0x3   :  { %21 = vsyncpa [#allocation4], 0 }
   0x4   :  { %23 = vsyncpa [#allocation4 + $0x1], 0  ;;  %s6229_s15 = smov 0   ;;  %s6231_s16 = smov 0  }
   0x5   :  { %s6233_s17 = smov 0   ;;  %s6235_s18 = smov 0  }
   0x6 LB: > { %8827 = sst [smem:[#allocation6_spill]] %s6137_s15  ;;  %s6250_s13 = sadd.s32 4294967295, %s6149_s18   ;;  %s6149_s18 = sphi %s6235_s18, %s8965_s18   ;;  %s6145_s17 = sphi %s6233_s17, %s8967_s17   ;;  %s6141_s16 = sphi %s6231_s16, %s8969_s16   ;;  %s6137_s15 = sphi %s6229_s15, %s8968_s15  }
   0x7   : > { %8828 = sst [smem:[#allocation7_spill]] %s6145_s17  ;;  %s4425_s19 = sadd.s32 4294967294, %s6149_s18  }
   0x8   : > { %s6254_s20 = sadd.s32 1, %s6149_s18   ;;  %s340_s21 = sadd.s32 1, %s6145_s17 }
   0x9   : > { %8829 = sst [smem:[#allocation8_spill]] %s6254_s20  ;;  %s337_s22 = ssub.s32 %s6149_s18, %s6254_s20 }
   0xa   : > { %p350_p0 = scmp.ne.s32.totalorder %s6145_s17, %s6141_s16  ;;  %p338_p1 = scmp.eq.s32.totalorder %s337_s22, 0 }
   0xb   : > { %p351_p2 = scmp.eq.s32.totalorder %s6250_s13, 2  ;;  %p356_p3 = scmp.ne.s32.totalorder %s6141_s16, %s6137_s15 }
   0xc   : > { %p357_p4 = scmp.eq.s32.totalorder %s4425_s19, 2  ;;  %p4428_p7 = scmp.ge.s32.totalorder %s6149_s18, 1 }
   0xd   : > { %s6265_s23 = scalar_select %p338_p1, %s6145_s17, %s340_s21  }
   0xe   : > { %p6267_p5 = por %p351_p2, %p350_p0  ;;  %p6271_p6 = por %p357_p4, %p356_p3 }
   0xf   : > { %8830 = sst [smem:[#allocation9_spill]] %s6265_s23  ;;  %p451_p8 = scmp.lt.s32.totalorder %s6149_s18, 4 }
  0x10   : > { %s8832_s25 = scalar_select %p6271_p6, 1, 0 }
  0x11   : > { %p452_p9 = pnand %p4428_p7, %p451_p8 }
  0x12   : > { %8833 = sst [smem:[#allocation10_spill]] %s8832_s25 }
  0x13   : > { %455 = sbr.rel (%p452_p9) target bundleno = 1345 (0x541), region = 76 }
  0x18   : > { %v4683_v1 = vld [vmem:[%s8771_s2 + $0x70] sm:$0xf]  ;;  %v5770_v2 = vld [vmem:[%s8771_s2 + $0x74] sm:$0xf0]  ;;  %v4675_v6 = vld [vmem:[%s8771_s2 + $0x60] sm:$0xf] }
  0x19   : > { %v4747_v3 = vld [vmem:[%s8771_s2 + $0xf0] sm:$0xf]  ;;  %v4684_v4 = vor.u32 %v5770_v2, %v4683_v1  ;;  %v5786_v5 = vld [vmem:[%s8771_s2 + $0xf4] sm:$0xf0]  ;;  %v5768_v7 = vld [vmem:[%s8771_s2 + $0x64] sm:$0xf0] }
  0x1a   : > { %v4748_v8 = vor.u32 %v5786_v5, %v4747_v3  ;;  %v4739_v9 = vld [vmem:[%s8771_s2 + $0xe0] sm:$0xf]  ;;  %v5784_v10 = vld [vmem:[%s8771_s2 + $0xe4] sm:$0xf0]  ;;  %v4676_v11 = vor.u32 %v5768_v7, %v4675_v6  ;;  %v4667_v13 = vld [vmem:[%s8771_s2 + $0x50] sm:$0xf] }
  0x1b   : > { %1460 = vmatpush.bf16.msra.mxu0 %v4684_v4  ;;  %5959 = vmatpush.bf16.msra.mxu2 %v4684_v4  ;;  %v4740_v12 = vor.u32 %v5784_v10, %v4739_v9  ;;  %v5766_v14 = vld [vmem:[%s8771_s2 + $0x54] sm:$0xf0]  ;;  %v4731_v15 = vld [vmem:[%s8771_s2 + $0xd0] sm:$0xf]  ;;  %v4659_v19 = vld [vmem:[%s8771_s2 + $0x40] sm:$0xf] }
  0x1c   : > { %1509 = vmatpush.bf16.msra.mxu1 %v4748_v8  ;;  %5967 = vmatpush.bf16.msra.mxu3 %v4748_v8  ;;  %v5782_v16 = vld [vmem:[%s8771_s2 + $0xd4] sm:$0xf0]  ;;  %v4668_v17 = vor.u32 %v5766_v14, %v4667_v13  ;;  %v5764_v20 = vld [vmem:[%s8771_s2 + $0x44] sm:$0xf0]  ;;  %v4723_v21 = vld [vmem:[%s8771_s2 + $0xc0] sm:$0xf] }
  0x1d   : > { %v4732_v18 = vor.u32 %v5782_v16, %v4731_v15  ;;  %v5780_v22 = vld [vmem:[%s8771_s2 + $0xc4] sm:$0xf0]  ;;  %s4429_s22 = sshll.u32 %s6250_s13, 4  ;;  %v4660_v23 = vor.u32 %v5764_v20, %v4659_v19  ;;  %v4651_v24 = vld [vmem:[%s8771_s2 + $0x30] sm:$0xf]  ;;  %vm3745_vm0 = vcmask 523264  }
  0x1e   : > { %v5762_v25 = vld [vmem:[%s8771_s2 + $0x34] sm:$0xf0]  ;;  %p519_p10 = scmp.lt.s32.totalorder %s4429_s22, 37  ;;  %v4724_v26 = vor.u32 %v5780_v22, %v4723_v21  ;;  %v4715_v27 = vld [vmem:[%s8771_s2 + $0xb0] sm:$0xf]  ;;  %vm3855_vm1 = vcmask 261120  }
  0x1f   : > { %1461 = vmatpush.bf16.msra.mxu0 %v4676_v11  ;;  %5960 = vmatpush.bf16.msra.mxu2 %v4676_v11  ;;  %v5778_v28 = vld [vmem:[%s8771_s2 + $0xb4] sm:$0xf0]  ;;  %v4652_v29 = vor.u32 %v5762_v25, %v4651_v24  ;;  %v4643_v31 = vld [vmem:[%s8771_s2 + $0x20] sm:$0xf]  ;;  %v5760_v32 = vld [vmem:[%s8771_s2 + $0x24] sm:$0xf0] }
  0x20   : > { %1510 = vmatpush.bf16.msra.mxu1 %v4740_v12  ;;  %5968 = vmatpush.bf16.msra.mxu3 %v4740_v12  ;;  %s8971_s22 = smov (!%p519_p10, %s4429_s22), 37  ;;  %v4716_v30 = vor.u32 %v5778_v28, %v4715_v27  ;;  %v4707_v33 = vld [vmem:[%s8771_s2 + $0xa0] sm:$0xf]  ;;  %v5776_v34 = vld [vmem:[%s8771_s2 + $0xa4] sm:$0xf0]  ;;  %v4644_v35 = vor.u32 %v5760_v32, %v4643_v31  ;;  %s511_s20 = sand.u32 1, %s6141_s16  }
  0x21   : > { %s8789_s23 = smul.u32 24, %s8971_s22  ;;  %v4708_v36 = vor.u32 %v5776_v34, %v4707_v33  ;;  %v4635_v37 = vld [vmem:[%s8771_s2 + $0x10] sm:$0xf]  ;;  %v5758_v38 = vld [vmem:[%s8771_s2 + $0x14] sm:$0xf0]  ;;  %s6107_s17 = scalar_lea.hbm %s8783_s14, 3 }
  0x22   : > { %v4699_v39 = vld [vmem:[%s8771_s2 + $0x90] sm:$0xf]  ;;  %v5774_v40 = vld [vmem:[%s8771_s2 + $0x94] sm:$0xf0]  ;;  %v4636_v41 = vor.u32 %v5758_v38, %v4635_v37  ;;  %v4627_v42 = vld [vmem:[%s8771_s2] sm:$0xf] }
  0x23   : > { %1462 = vmatpush.bf16.msra.mxu0 %v4668_v17  ;;  %5961 = vmatpush.bf16.msra.mxu2 %v4668_v17  ;;  %s6370_s15 = scalar_lea.vmem %s8769_s0, %s8789_s23  ;;  %v4700_v43 = vor.u32 %v5774_v40, %v4699_v39  ;;  %v5756_v44 = vld [vmem:[%s8771_s2 + $0x4] sm:$0xf0]  ;;  %v4691_v45 = vld [vmem:[%s8771_s2 + $0x80] sm:$0xf]  ;;  %v4939_v48 = vld [vmem:[%s8771_s2 + $0x270] sm:$0xf] }
  0x24   : > { %1511 = vmatpush.bf16.msra.mxu1 %v4732_v18  ;;  %5969 = vmatpush.bf16.msra.mxu3 %v4732_v18  ;;  %v5772_v46 = vld [vmem:[%s8771_s2 + $0x84] sm:$0xf0]  ;;  %v4435_v47 = vld [vmem:[%s6370_s15] sm:$0xf]  ;;  %v5834_v49 = vld [vmem:[%s8771_s2 + $0x274] sm:$0xf0]  ;;  %v4628_v53 = vor.u32 %v5756_v44, %v4627_v42 }
  0x25   : > { %v5662_v50 = vld [vmem:[%s6370_s15 + $0x14] sm:$0xf0]  ;;  %v4811_v51 = vld [vmem:[%s8771_s2 + $0x170] sm:$0xf]  ;;  %v4531_v54 = vld [vmem:[%s6370_s15 + $0xc0] sm:$0xf]  ;;  %v4692_v57 = vor.u32 %v5772_v46, %v4691_v45  ;;  %v4940_v61 = vor.u32 %v5834_v49, %v4939_v48 }
  0x26   : > { %v5802_v52 = vld [vmem:[%s8771_s2 + $0x174] sm:$0xf0]  ;;  %v5659_v56 = vld [vmem:[%s6370_s15 + $0x4] sm:$0xf]  ;;  %v4437_v58 = vld [vmem:[%s6370_s15 + $0x18] sm:$0xf0]  ;;  %v6404_v63 = vor.u32 %v5662_v50, %v4435_v47 }
  0x27   : > { %1463 = vmatpush.bf16.msra.mxu0 %v4660_v23  ;;  %5962 = vmatpush.bf16.msra.mxu2 %v4660_v23  ;;  %v5686_v55 = vld [vmem:[%s6370_s15 + $0xd4] sm:$0xf0]  ;;  %v5683_v59 = vld [vmem:[%s6370_s15 + $0xc4] sm:$0xf]  ;;  %v4533_v60 = vld [vmem:[%s6370_s15 + $0xd8] sm:$0xf0]  ;;  %v4812_v62 = vor.u32 %v5802_v52, %v4811_v51  ;;  %v6414_v3 = vor.u32 %v5659_v56, %v4437_v58 }
  0x28   : > { %1512 = vmatpush.bf16.msra.mxu1 %v4724_v26  ;;  %5970 = vmatpush.bf16.msra.mxu3 %v4724_v26  ;;  %v6406_v0 = vor.u32 %v5686_v55, %v4531_v54  ;;  %v4931_v1 = vld [vmem:[%s8771_s2 + $0x260] sm:$0xf]  ;;  %v5832_v2 = vld [vmem:[%s8771_s2 + $0x264] sm:$0xf0]  ;;  %v6416_v4 = vor.u32 %v5683_v59, %v4533_v60  ;;  %v4923_v6 = vld [vmem:[%s8771_s2 + $0x250] sm:$0xf] }
  0x29   : > { %v4932_v5 = vor.u32 %v5832_v2, %v4931_v1  ;;  %v5830_v7 = vld [vmem:[%s8771_s2 + $0x254] sm:$0xf0]  ;;  %v4875_v8 = vld [vmem:[%s8771_s2 + $0x1f0] sm:$0xf]  ;;  %v4803_v14 = vld [vmem:[%s8771_s2 + $0x160] sm:$0xf] }
  0x2a   : > { %v5818_v9 = vld [vmem:[%s8771_s2 + $0x1f4] sm:$0xf0]  ;;  %v5003_v10 = vld [vmem:[%s8771_s2 + $0x2f0] sm:$0xf]  ;;  %v5800_v15 = vld [vmem:[%s8771_s2 + $0x164] sm:$0xf0]  ;;  %v4924_v17 = vor.u32 %v5830_v7, %v4923_v6 }
  0x2b   : > { %1464 = vmatpush.bf16.msra.mxu0 %v4652_v29  ;;  %5963 = vmatpush.bf16.msra.mxu2 %v4652_v29  ;;  %v4876_v11 = vor.u32 %v5818_v9, %v4875_v8  ;;  %v5850_v12 = vld [vmem:[%s8771_s2 + $0x2f4] sm:$0xf0]  ;;  %v4867_v16 = vld [vmem:[%s8771_s2 + $0x1e0] sm:$0xf]  ;;  %v4804_v18 = vor.u32 %v5800_v15, %v4803_v14  ;;  %v5816_v19 = vld [vmem:[%s8771_s2 + $0x1e4] sm:$0xf0] }
  0x2c   : > { %1513 = vmatpush.bf16.msra.mxu1 %v4716_v30  ;;  %5971 = vmatpush.bf16.msra.mxu3 %v4716_v30  ;;  %v5004_v13 = vor.u32 %v5850_v12, %v5003_v10  ;;  %v4995_v20 = vld [vmem:[%s8771_s2 + $0x2e0] sm:$0xf]  ;;  %v5848_v21 = vld [vmem:[%s8771_s2 + $0x2e4] sm:$0xf0]  ;;  %v4868_v24 = vor.u32 %v5816_v19, %v4867_v16  ;;  %v4795_v26 = vld [vmem:[%s8771_s2 + $0x150] sm:$0xf] }
  0x2d   : > { %v4915_v22 = vld [vmem:[%s8771_s2 + $0x240] sm:$0xf]  ;;  %v5828_v23 = vld [vmem:[%s8771_s2 + $0x244] sm:$0xf0]  ;;  %v4996_v25 = vor.u32 %v5848_v21, %v4995_v20  ;;  %v5798_v27 = vld [vmem:[%s8771_s2 + $0x154] sm:$0xf0] }
  0x2e   : > { %v4859_v28 = vld [vmem:[%s8771_s2 + $0x1d0] sm:$0xf]  ;;  %v5814_v29 = vld [vmem:[%s8771_s2 + $0x1d4] sm:$0xf0]  ;;  %v4796_v30 = vor.u32 %v5798_v27, %v4795_v26  ;;  %v4787_v33 = vld [vmem:[%s8771_s2 + $0x140] sm:$0xf] }
  0x2f   : > { %1465 = vmatpush.bf16.msra.mxu0 %v4644_v35  ;;  %5964 = vmatpush.bf16.msra.mxu2 %v4644_v35  ;;  %v4987_v31 = vld [vmem:[%s8771_s2 + $0x2d0] sm:$0xf]  ;;  %v5846_v32 = vld [vmem:[%s8771_s2 + $0x2d4] sm:$0xf0]  ;;  %v5668_v35 = vld [vmem:[%s6370_s15 + $0x44] sm:$0xf0]  ;;  %v4860_v38 = vor.u32 %v5814_v29, %v4859_v28 }
  0x30   : > { %1514 = vmatpush.bf16.msra.mxu1 %v4708_v36  ;;  %5972 = vmatpush.bf16.msra.mxu3 %v4708_v36  ;;  %v4459_v34 = vld [vmem:[%s6370_s15 + $0x30] sm:$0xf]  ;;  %v4916_v36 = vor.u32 %v5828_v23, %v4915_v22  ;;  %v5796_v39 = vld [vmem:[%s8771_s2 + $0x144] sm:$0xf0]  ;;  %v5826_v40 = vld [vmem:[%s8771_s2 + $0x234] sm:$0xf0] }
  0x31   : > { %v4907_v37 = vld [vmem:[%s8771_s2 + $0x230] sm:$0xf]  ;;  %v4851_v42 = vld [vmem:[%s8771_s2 + $0x1c0] sm:$0xf]  ;;  %v5692_v45 = vld [vmem:[%s6370_s15 + $0x104] sm:$0xf0]  ;;  %v4788_v47 = vor.u32 %v5796_v39, %v4787_v33  ;;  %v6514_v55 = vor.u32 %v5668_v35, %v4459_v34 }
  0x32   : > { %v4555_v44 = vld [vmem:[%s6370_s15 + $0xf0] sm:$0xf]  ;;  %v5665_v46 = vld [vmem:[%s6370_s15 + $0x34] sm:$0xf]  ;;  %v4461_v48 = vld [vmem:[%s6370_s15 + $0x48] sm:$0xf0]  ;;  %v4908_v51 = vor.u32 %v5826_v40, %v4907_v37 }
  0x33   : > { %1466 = vmatpush.bf16.msra.mxu0 %v4636_v41  ;;  %5965 = vmatpush.bf16.msra.mxu2 %v4636_v41  ;;  %v4988_v41 = vor.u32 %v5846_v32, %v4987_v31  ;;  %v5689_v49 = vld [vmem:[%s6370_s15 + $0xf4] sm:$0xf]  ;;  %v4557_v50 = vld [vmem:[%s6370_s15 + $0x108] sm:$0xf0]  ;;  %v5844_v54 = vld [vmem:[%s8771_s2 + $0x2c4] sm:$0xf0]  ;;  %v6516_v56 = vor.u32 %v5692_v45, %v4555_v44  ;;  %v6524_v59 = vor.u32 %v5665_v46, %v4461_v48 }
  0x34   : > { %1515 = vmatpush.bf16.msra.mxu1 %v4700_v43  ;;  %5973 = vmatpush.bf16.msra.mxu3 %v4700_v43  ;;  %v5812_v43 = vld [vmem:[%s8771_s2 + $0x1c4] sm:$0xf0]  ;;  %v6526_v60 = vor.u32 %v5689_v49, %v4557_v50  ;;  %v4779_v1 = vld [vmem:[%s8771_s2 + $0x130] sm:$0xf]  ;;  %v5794_v2 = vld [vmem:[%s8771_s2 + $0x134] sm:$0xf0] }
  0x35   : > { %v4852_v52 = vor.u32 %v5812_v43, %v4851_v42  ;;  %v5824_v58 = vld [vmem:[%s8771_s2 + $0x224] sm:$0xf0]  ;;  %v4891_v6 = vld [vmem:[%s8771_s2 + $0x210] sm:$0xf]  ;;  %v5822_v7 = vld [vmem:[%s8771_s2 + $0x214] sm:$0xf0]  ;;  %v4780_v8 = vor.u32 %v5794_v2, %v4779_v1 }
  0x36   : > { %v5810_v9 = vld [vmem:[%s8771_s2 + $0x1b4] sm:$0xf0]  ;;  %v4892_v14 = vor.u32 %v5822_v7, %v4891_v6  ;;  %v5792_v16 = vld [vmem:[%s8771_s2 + $0x124] sm:$0xf0]  ;;  %v4963_v21 = vld [vmem:[%s8771_s2 + $0x2a0] sm:$0xf] }
  0x37   : > { %1467 = vmatpush.bf16.msra.mxu0 %v4628_v53  ;;  %5966 = vmatpush.bf16.msra.mxu2 %v4628_v53  ;;  %v4979_v53 = vld [vmem:[%s8771_s2 + $0x2c0] sm:$0xf]  ;;  %v5842_v12 = vld [vmem:[%s8771_s2 + $0x2b4] sm:$0xf0]  ;;  %v5840_v22 = vld [vmem:[%s8771_s2 + $0x2a4] sm:$0xf0] }
  0x38   : > { %1516 = vmatpush.bf16.msra.mxu1 %v4692_v57  ;;  %5974 = vmatpush.bf16.msra.mxu3 %v4692_v57  ;;  %v4899_v57 = vld [vmem:[%s8771_s2 + $0x220] sm:$0xf]  ;;  %v5790_v26 = vld [vmem:[%s8771_s2 + $0x114] sm:$0xf0]  ;;  %v4964_v27 = vor.u32 %v5840_v22, %v4963_v21  ;;  %v4827_v28 = vld [vmem:[%s8771_s2 + $0x190] sm:$0xf] }
  0x39   : > { %v4883_v23 = vld [vmem:[%s8771_s2 + $0x200] sm:$0xf]  ;;  %v5806_v29 = vld [vmem:[%s8771_s2 + $0x194] sm:$0xf0]  ;;  %v4955_v34 = vld [vmem:[%s8771_s2 + $0x290] sm:$0xf] }
  0x3a   : > { %1468 = vmatmul.bf16.vlgmr.msra.gmra.mxu0 %v6404_v63  ;;  %1488 = vmatmul.bf16.vlgmr.msra.gmra.mxu2 %v6406_v0  ;;  %v5674_v31 = vld [vmem:[%s6370_s15 + $0x74] sm:$0xf0]  ;;  %v4828_v37 = vor.u32 %v5806_v29, %v4827_v28  ;;  %v5788_v39 = vld [vmem:[%s8771_s2 + $0x104] sm:$0xf0]  ;;  %v4485_v42 = vld [vmem:[%s6370_s15 + $0x78] sm:$0xf0] }
  0x3b   : > { %1656 = vmatpush.bf16.msrb.mxu0 %v4940_v61  ;;  %1558 = vmatpush.bf16.msrb.mxu2 %v4812_v62  ;;  %v4980_v61 = vor.u32 %v5844_v54, %v4979_v53  ;;  %v4900_v62 = vor.u32 %v5824_v58, %v4899_v57  ;;  %v5838_v35 = vld [vmem:[%s8771_s2 + $0x294] sm:$0xf0]  ;;  %v5695_v43 = vld [vmem:[%s6370_s15 + $0x124] sm:$0xf]  ;;  %v4581_v44 = vld [vmem:[%s6370_s15 + $0x138] sm:$0xf0] }
  0x3c   : > { %1517 = vmatmul.bf16.vlgmr.msra.gmra.mxu1 %v6414_v3  ;;  %1537 = vmatmul.bf16.vlgmr.msra.gmra.mxu3 %v6416_v4  ;;  %v5698_v40 = vld [vmem:[%s6370_s15 + $0x134] sm:$0xf0]  ;;  %v4956_v45 = vor.u32 %v5838_v35, %v4955_v34  ;;  %v4819_v46 = vld [vmem:[%s8771_s2 + $0x180] sm:$0xf]  ;;  %v5804_v48 = vld [vmem:[%s8771_s2 + $0x184] sm:$0xf0]  ;;  %v6630_v54 = vor.u32 %v5695_v43, %v4581_v44 }
  0x3d   : > { %1607 = vmatpush.bf16.msrb.mxu3 %v4876_v11  ;;  %1705 = vmatpush.bf16.msrb.mxu1 %v5004_v13  ;;  %v4971_v11 = vld [vmem:[%s8771_s2 + $0x2b0] sm:$0xf]  ;;  %v4771_v13 = vld [vmem:[%s8771_s2 + $0x120] sm:$0xf]  ;;  %v5836_v50 = vld [vmem:[%s8771_s2 + $0x284] sm:$0xf0]  ;;  %v4820_v57 = vor.u32 %v5804_v48, %v4819_v46 }
  0x3e   : > { %v4972_v15 = vor.u32 %v5842_v12, %v4971_v11  ;;  %v4772_v19 = vor.u32 %v5792_v16, %v4771_v13  ;;  %v4947_v49 = vld [vmem:[%s8771_s2 + $0x280] sm:$0xf]  ;;  %v4507_v2 = vld [vmem:[%s6370_s15 + $0x90] sm:$0xf]  ;;  %v5704_v7 = vld [vmem:[%s6370_s15 + $0x164] sm:$0xf0] }
  0x3f   : > { %1657 = vmatpush.bf16.msrb.mxu0 %v4932_v5  ;;  %1559 = vmatpush.bf16.msrb.mxu2 %v4804_v18  ;;  %v4843_v5 = vld [vmem:[%s8771_s2 + $0x1b0] sm:$0xf]  ;;  %v5808_v18 = vld [vmem:[%s8771_s2 + $0x1a4] sm:$0xf0]  ;;  %v4948_v58 = vor.u32 %v5836_v50, %v4947_v49  ;;  %v4605_v11 = vld [vmem:[%s6370_s15 + $0x168] sm:$0xf0] }
  0x40   : > { %v4844_v10 = vor.u32 %v5810_v9, %v4843_v5  ;;  %v5680_v5 = vld [vmem:[%s6370_s15 + $0xa4] sm:$0xf0]  ;;  %v4603_v6 = vld [vmem:[%s6370_s15 + $0x150] sm:$0xf]  ;;  %v4509_v9 = vld [vmem:[%s6370_s15 + $0xa8] sm:$0xf0] }
  0x41   : > { %1608 = vmatpush.bf16.msrb.mxu3 %v4868_v24  ;;  %1706 = vmatpush.bf16.msrb.mxu1 %v4996_v25  ;;  %v5820_v24 = vld [vmem:[%s8771_s2 + $0x204] sm:$0xf0]  ;;  %v4763_v25 = vld [vmem:[%s8771_s2 + $0x110] sm:$0xf]  ;;  %v6650_v12 = vor.u32 %v5680_v5, %v4507_v2  ;;  %v6652_v13 = vor.u32 %v5704_v7, %v4603_v6  ;;  %v5799_v16 = vld [vmem:[%s8771_s2 + $0x164] sm:$0xf] }
  0x42   : > { %v4884_v32 = vor.u32 %v5820_v24, %v4883_v23  ;;  %v4764_v33 = vor.u32 %v5790_v26, %v4763_v25  ;;  %v4443_v22 = vld [vmem:[%s6370_s15 + $0x8] sm:$0xf]  ;;  %v5663_v23 = vld [vmem:[%s6370_s15 + $0x1c] sm:$0xf0]  ;;  %v5660_v24 = vld [vmem:[%s6370_s15 + $0xc] sm:$0xf] }
  0x43   : > { %1658 = vmatpush.bf16.msrb.mxu0 %v4924_v17  ;;  %1560 = vmatpush.bf16.msrb.mxu2 %v4796_v30  ;;  %v4835_v17 = vld [vmem:[%s8771_s2 + $0x1a0] sm:$0xf]  ;;  %v4451_v25 = vld [vmem:[%s6370_s15 + $0x10] sm:$0xf]  ;;  %v5664_v26 = vld [vmem:[%s6370_s15 + $0x24] sm:$0xf0] }
  0x44   : > { %v4836_v20 = vor.u32 %v5808_v18, %v4835_v17  ;;  %v4483_v30 = vld [vmem:[%s6370_s15 + $0x60] sm:$0xf]  ;;  %v4805_v17 = vld [vmem:[%s8771_s2 + $0x168] sm:$0xf0]  ;;  %v5769_v18 = vld [vmem:[%s8771_s2 + $0x74] sm:$0xf] }
  0x45   : > { %1609 = vmatpush.bf16.msrb.mxu3 %v4860_v38  ;;  %1707 = vmatpush.bf16.msrb.mxu1 %v4988_v41  ;;  %v4755_v38 = vld [vmem:[%s8771_s2 + $0x100] sm:$0xf]  ;;  %v5671_v41 = vld [vmem:[%s6370_s15 + $0x64] sm:$0xf]  ;;  %v5661_v28 = vld [vmem:[%s6370_s15 + $0x14] sm:$0xf] }
  0x46   : > { %v6628_v53 = vor.u32 %v5671_v41, %v4485_v42  ;;  %v4453_v29 = vld [vmem:[%s6370_s15 + $0x28] sm:$0xf0]  ;;  %v5797_v34 = vld [vmem:[%s8771_s2 + $0x154] sm:$0xf]  ;;  %v4797_v35 = vld [vmem:[%s8771_s2 + $0x158] sm:$0xf0] }
  0x47   : > { %1659 = vmatpush.bf16.msrb.mxu0 %v4916_v36  ;;  %1561 = vmatpush.bf16.msrb.mxu2 %v4788_v47  ;;  %v4579_v36 = vld [vmem:[%s6370_s15 + $0x120] sm:$0xf]  ;;  %v4756_v47 = vor.u32 %v5788_v39, %v4755_v38  ;;  %v4749_v38 = vld [vmem:[%s8771_s2 + $0xf8] sm:$0xf0]  ;;  %v5767_v39 = vld [vmem:[%s8771_s2 + $0x64] sm:$0xf] }
  0x48   : > { %v4467_v43 = vld [vmem:[%s6370_s15 + $0x38] sm:$0xf]  ;;  %v5669_v44 = vld [vmem:[%s6370_s15 + $0x4c] sm:$0xf0]  ;;  %v4475_v46 = vld [vmem:[%s6370_s15 + $0x40] sm:$0xf] }
  0x49   : > { %1610 = vmatpush.bf16.msrb.mxu3 %v4852_v52  ;;  %1708 = vmatpush.bf16.msrb.mxu1 %v4980_v61  ;;  %v6626_v52 = vor.u32 %v5698_v40, %v4579_v36  ;;  %v5801_v61 = vld [vmem:[%s8771_s2 + $0x174] sm:$0xf]  ;;  %v4677_v40 = vld [vmem:[%s8771_s2 + $0x68] sm:$0xf0]  ;;  %v5667_v49 = vld [vmem:[%s6370_s15 + $0x44] sm:$0xf] }
  0x4a   : > { %1473 = vmatmul.bf16.gmra.mxu0 %v6514_v55  ;;  %1493 = vmatmul.bf16.gmra.mxu2 %v6516_v56  ;;  %v5785_v36 = vld [vmem:[%s8771_s2 + $0xf4] sm:$0xf]  ;;  %v4680_v42 = vor.u32 %v5767_v39, %v4677_v40  ;;  %v4477_v50 = vld [vmem:[%s6370_s15 + $0x58] sm:$0xf0]  ;;  %v4789_v2 = vld [vmem:[%s8771_s2 + $0x148] sm:$0xf0] }
  0x4b   : > { %1660 = vmatpush.bf16.msrb.mxu0 %v4908_v51  ;;  %1562 = vmatpush.bf16.msrb.mxu2 %v4780_v8  ;;  %v6624_v51 = vor.u32 %v5674_v31, %v4483_v30  ;;  %v5677_v8 = vld [vmem:[%s6370_s15 + $0x94] sm:$0xf]  ;;  %v6682_v30 = vor.u32 %v5663_v23, %v4443_v22  ;;  %v6684_v31 = vor.u32 %v5664_v26, %v4451_v25  ;;  %v5783_v5 = vld [vmem:[%s8771_s2 + $0xe4] sm:$0xf]  ;;  %v4741_v7 = vld [vmem:[%s8771_s2 + $0xe8] sm:$0xf0] }
  0x4c   : > { %1522 = vmatmul.bf16.gmra.mxu1 %v6524_v59  ;;  %1542 = vmatmul.bf16.gmra.mxu3 %v6526_v60  ;;  %v4752_v41 = vor.u32 %v5785_v36, %v4749_v38  ;;  %v4469_v48 = vld [vmem:[%s6370_s15 + $0x50] sm:$0xf0]  ;;  %v4669_v26 = vld [vmem:[%s8771_s2 + $0x58] sm:$0xf0]  ;;  %v4515_v38 = vld [vmem:[%s6370_s15 + $0x98] sm:$0xf] }
  0x4d   : > { %1611 = vmatpush.bf16.msrb.mxu3 %v4844_v10  ;;  %1709 = vmatpush.bf16.msrb.mxu1 %v4972_v15  ;;  %v5701_v10 = vld [vmem:[%s6370_s15 + $0x154] sm:$0xf]  ;;  %8834 = vst [vmem:[#allocation11_spill] sm:$0xff] %v6684_v31  ;;  %v4733_v36 = vld [vmem:[%s8771_s2 + $0xd8] sm:$0xf0] }
  0x4e   : > { %v6656_v15 = vor.u32 %v5701_v10, %v4605_v11  ;;  %v5675_v10 = vld [vmem:[%s6370_s15 + $0x7c] sm:$0xf0]  ;;  %v5672_v11 = vld [vmem:[%s6370_s15 + $0x6c] sm:$0xf]  ;;  %v5765_v25 = vld [vmem:[%s8771_s2 + $0x54] sm:$0xf] }
  0x4f   : > { %1661 = vmatpush.bf16.msrb.mxu0 %v4900_v62  ;;  %1563 = vmatpush.bf16.msrb.mxu2 %v4772_v19  ;;  %v4813_v62 = vld [vmem:[%s8771_s2 + $0x178] sm:$0xf0]  ;;  %v4808_v19 = vor.u32 %v5799_v16, %v4805_v17  ;;  %v4499_v16 = vld [vmem:[%s6370_s15 + $0x70] sm:$0xf]  ;;  %v5676_v17 = vld [vmem:[%s6370_s15 + $0x84] sm:$0xf0] }
  0x50   : > { %v4816_v1 = vor.u32 %v5801_v61, %v4813_v62  ;;  %v6726_v62 = vor.u32 %v5667_v49, %v4477_v50  ;;  %v6754_v22 = vor.u32 %v5676_v17, %v4499_v16  ;;  %v5681_v39 = vld [vmem:[%s6370_s15 + $0xac] sm:$0xf0]  ;;  %v5678_v40 = vld [vmem:[%s6370_s15 + $0x9c] sm:$0xf]  ;;  %v5763_v50 = vld [vmem:[%s8771_s2 + $0x44] sm:$0xf] }
  0x51   : > { %1612 = vmatpush.bf16.msrb.mxu3 %v4836_v20  ;;  %1710 = vmatpush.bf16.msrb.mxu1 %v4964_v27  ;;  %v4685_v20 = vld [vmem:[%s8771_s2 + $0x78] sm:$0xf0]  ;;  %v4445_v27 = vld [vmem:[%s6370_s15 + $0x20] sm:$0xf0]  ;;  %v5687_v16 = vld [vmem:[%s6370_s15 + $0xdc] sm:$0xf0] }
  0x52   : > { %v4688_v21 = vor.u32 %v5769_v18, %v4685_v20  ;;  %8837 = vst [vmem:[#allocation14_spill] sm:$0xff] %v6726_v62  ;;  %v4493_v18 = vld [vmem:[%s6370_s15 + $0x80] sm:$0xf0]  ;;  %v4501_v20 = vld [vmem:[%s6370_s15 + $0x88] sm:$0xf0] }
  0x53   : > { %1662 = vmatpush.bf16.msrb.mxu0 %v4892_v14  ;;  %1564 = vmatpush.bf16.msrb.mxu2 %v4764_v33  ;;  %v6654_v14 = vor.u32 %v5677_v8, %v4509_v9  ;;  %v6688_v33 = vor.u32 %v5661_v28, %v4453_v29  ;;  %v4744_v8 = vor.u32 %v5783_v5, %v4741_v7  ;;  %v4491_v9 = vld [vmem:[%s6370_s15 + $0x68] sm:$0xf]  ;;  %v5793_v28 = vld [vmem:[%s8771_s2 + $0x134] sm:$0xf]  ;;  %v4781_v29 = vld [vmem:[%s8771_s2 + $0x138] sm:$0xf0] }
  0x54   : > { %8838 = vst [vmem:[#allocation15_spill] sm:$0xff] %v6754_v22  ;;  %v6756_v23 = vor.u32 %v5672_v11, %v4493_v18  ;;  %v5791_v5 = vld [vmem:[%s8771_s2 + $0x124] sm:$0xf]  ;;  %v4539_v11 = vld [vmem:[%s6370_s15 + $0xc8] sm:$0xf] }
  0x55   : > { %1613 = vmatpush.bf16.msrb.mxu3 %v4828_v37  ;;  %1711 = vmatpush.bf16.msrb.mxu1 %v4956_v45  ;;  %8835 = vst [vmem:[#allocation12_spill] sm:$0xff] %v6688_v33  ;;  %v4800_v37 = vor.u32 %v5797_v34, %v4797_v35  ;;  %v5666_v45 = vld [vmem:[%s6370_s15 + $0x3c] sm:$0xf]  ;;  %v4784_v34 = vor.u32 %v5793_v28, %v4781_v29  ;;  %v5781_v35 = vld [vmem:[%s8771_s2 + $0xd4] sm:$0xf] }
  0x56   : > { %v6724_v61 = vor.u32 %v5666_v45, %v4469_v48  ;;  %v4525_v45 = vld [vmem:[%s6370_s15 + $0xb8] sm:$0xf0]  ;;  %v5684_v17 = vld [vmem:[%s6370_s15 + $0xcc] sm:$0xf]  ;;  %v4547_v18 = vld [vmem:[%s6370_s15 + $0xd0] sm:$0xf] }
  0x57   : > { %1663 = vmatpush.bf16.msrb.mxu0 %v4884_v32  ;;  %1565 = vmatpush.bf16.msrb.mxu2 %v4756_v47  ;;  %v6686_v32 = vor.u32 %v5660_v24, %v4445_v27  ;;  %v5670_v47 = vld [vmem:[%s6370_s15 + $0x54] sm:$0xf0]  ;;  %v4672_v27 = vor.u32 %v5765_v25, %v4669_v26  ;;  %v5685_v25 = vld [vmem:[%s6370_s15 + $0xd4] sm:$0xf]  ;;  %v4549_v26 = vld [vmem:[%s6370_s15 + $0xe8] sm:$0xf0] }
  0x59   : > { %1614 = vmatpush.bf16.msrb.mxu3 %v4820_v57  ;;  %1712 = vmatpush.bf16.msrb.mxu1 %v4948_v58  ;;  %v6720_v57 = vor.u32 %v5669_v44, %v4467_v43  ;;  %v6722_v58 = vor.u32 %v5670_v47, %v4475_v46  ;;  %v4517_v43 = vld [vmem:[%s6370_s15 + $0xb0] sm:$0xf0]  ;;  %v5679_v44 = vld [vmem:[%s6370_s15 + $0xa4] sm:$0xf]  ;;  %v6790_v46 = vor.u32 %v5681_v39, %v4515_v38  ;;  %v4653_v39 = vld [vmem:[%s8771_s2 + $0x38] sm:$0xf0] }
  0x5a   : > { %1478 = vmatmul.bf16.gmra.mxu0 %v6624_v51  ;;  %1498 = vmatmul.bf16.gmra.mxu2 %v6626_v52  ;;  %v6794_v48 = vor.u32 %v5678_v40, %v4517_v43  ;;  %v6796_v49 = vor.u32 %v5679_v44, %v4525_v45  ;;  %v5761_v38 = vld [vmem:[%s8771_s2 + $0x34] sm:$0xf]  ;;  %v4717_v45 = vld [vmem:[%s8771_s2 + $0xb8] sm:$0xf0] }
  0x5b   : > { %1852 = vmatpush.bf16.msra.mxu0 %v4816_v1  ;;  %1754 = vmatpush.bf16.msra.mxu2 %v4688_v21  ;;  %8836 = vst [vmem:[#allocation13_spill] sm:$0xff] %v6722_v58  ;;  %v5795_v1 = vld [vmem:[%s8771_s2 + $0x144] sm:$0xf]  ;;  %v6752_v21 = vor.u32 %v5675_v10, %v4491_v9  ;;  %v4725_v9 = vld [vmem:[%s8771_s2 + $0xc8] sm:$0xf0]  ;;  %v4656_v40 = vor.u32 %v5761_v38, %v4653_v39 }
  0x5c   : > { %1527 = vmatmul.bf16.gmra.mxu1 %v6628_v53  ;;  %1547 = vmatmul.bf16.gmra.mxu3 %v6630_v54  ;;  %v4792_v6 = vor.u32 %v5795_v1, %v4789_v2  ;;  %8841 = vst [vmem:[#allocation18_spill] sm:$0xff] %v6796_v49  ;;  %v4661_v1 = vld [vmem:[%s8771_s2 + $0x48] sm:$0xf0]  ;;  %v5777_v44 = vld [vmem:[%s8771_s2 + $0xb4] sm:$0xf] }
  0x5d   : > { %1803 = vmatpush.bf16.msra.mxu3 %v4752_v41  ;;  %v4523_v41 = vld [vmem:[%s6370_s15 + $0xa0] sm:$0xf]  ;;  %v4664_v2 = vor.u32 %v5763_v50, %v4661_v1  ;;  %v5817_v50 = vld [vmem:[%s8771_s2 + $0x1f4] sm:$0xf]  ;;  %v5694_v38 = vld [vmem:[%s6370_s15 + $0x114] sm:$0xf0] }
  0x5e   : > { %v4565_v39 = vld [vmem:[%s6370_s15 + $0x110] sm:$0xf0] }
  0x5f   : > { %1853 = vmatpush.bf16.msra.mxu0 %v4808_v19  ;;  %1755 = vmatpush.bf16.msra.mxu2 %v4680_v42  ;;  %v5673_v19 = vld [vmem:[%s6370_s15 + $0x74] sm:$0xf]  ;;  %v5682_v42 = vld [vmem:[%s6370_s15 + $0xb4] sm:$0xf0] }
  0x60   : > { %v6758_v24 = vor.u32 %v5673_v19, %v4501_v20  ;;  %v6792_v47 = vor.u32 %v5682_v42, %v4523_v41  ;;  %v5688_v19 = vld [vmem:[%s6370_s15 + $0xe4] sm:$0xf0]  ;;  %v4541_v20 = vld [vmem:[%s6370_s15 + $0xe0] sm:$0xf0]  ;;  %v5789_v41 = vld [vmem:[%s8771_s2 + $0x114] sm:$0xf] }
  0x61   : > { %1804 = vmatpush.bf16.msra.mxu3 %v4744_v8  ;;  %v5779_v8 = vld [vmem:[%s8771_s2 + $0xc4] sm:$0xf]  ;;  %v6830_v28 = vor.u32 %v5688_v19, %v4547_v18  ;;  %v4765_v42 = vld [vmem:[%s8771_s2 + $0x118] sm:$0xf0]  ;;  %v5813_v19 = vld [vmem:[%s8771_s2 + $0x1d4] sm:$0xf] }
  0x62   : > { %8839 = vst [vmem:[#allocation16_spill] sm:$0xff] %v6758_v24  ;;  %v4728_v10 = vor.u32 %v5779_v8, %v4725_v9  ;;  %v4768_v43 = vor.u32 %v5789_v41, %v4765_v42  ;;  %v4573_v41 = vld [vmem:[%s6370_s15 + $0x118] sm:$0xf0] }
  0x63   : > { %1854 = vmatpush.bf16.msra.mxu0 %v4800_v37  ;;  %1756 = vmatpush.bf16.msra.mxu2 %v4672_v27  ;;  %v4736_v37 = vor.u32 %v5781_v35, %v4733_v36  ;;  %8840 = vst [vmem:[#allocation17_spill] sm:$0xff] %v6792_v47  ;;  %v6828_v27 = vor.u32 %v5687_v16, %v4539_v11 }
  0x64   : > { %8842 = vst [vmem:[#allocation19_spill] sm:$0xff] %v6830_v28  ;;  %v6834_v35 = vor.u32 %v5685_v25, %v4549_v26  ;;  %v4563_v25 = vld [vmem:[%s6370_s15 + $0xf8] sm:$0xf]  ;;  %v5693_v26 = vld [vmem:[%s6370_s15 + $0x10c] sm:$0xf0] }
  0x65   : > { %1805 = vmatpush.bf16.msra.mxu3 %v4736_v37 }
  0x66   : > { %8843 = vst [vmem:[#allocation20_spill] sm:$0xff] %v6834_v35 }
  0x67   : > { %1855 = vmatpush.bf16.msra.mxu0 %v4792_v6  ;;  %v4773_v6 = vld [vmem:[%s8771_s2 + $0x128] sm:$0xf0]  ;;  %1757 = vmatpush.bf16.msra.mxu2 %v4664_v2  ;;  %v4720_v2 = vor.u32 %v5777_v44, %v4717_v45  ;;  %v5811_v44 = vld [vmem:[%s8771_s2 + $0x1c4] sm:$0xf] }
  0x68   : > { %v4776_v7 = vor.u32 %v5791_v5, %v4773_v6  ;;  %v4877_v5 = vld [vmem:[%s8771_s2 + $0x1f8] sm:$0xf0]  ;;  %v5815_v6 = vld [vmem:[%s8771_s2 + $0x1e4] sm:$0xf]  ;;  %v4853_v45 = vld [vmem:[%s8771_s2 + $0x1c8] sm:$0xf0] }
  0x69   : > { %1806 = vmatpush.bf16.msra.mxu3 %v4728_v10  ;;  %v4880_v9 = vor.u32 %v5817_v50, %v4877_v5 }
  0x6a   : > { %1483 = vmatmul.bf16.gmra.mxu0 %v6650_v12  ;;  %1503 = vmatmul.bf16.gmra.mxu2 %v6652_v13 }
  0x6b   : > { %1856 = vmatpush.bf16.msra.mxu0 %v4784_v34  ;;  %v6832_v34 = vor.u32 %v5684_v17, %v4541_v20  ;;  %1758 = vmatpush.bf16.msra.mxu2 %v4656_v40  ;;  %v4861_v20 = vld [vmem:[%s8771_s2 + $0x1d8] sm:$0xf0]  ;;  %v5691_v40 = vld [vmem:[%s6370_s15 + $0x104] sm:$0xf] }
  0x6c   : > { %1532 = vmatmul.bf16.gmra.mxu1 %v6654_v14  ;;  %1552 = vmatmul.bf16.gmra.mxu3 %v6656_v15  ;;  %v4864_v42 = vor.u32 %v5813_v19, %v4861_v20  ;;  %v4645_v19 = vld [vmem:[%s8771_s2 + $0x28] sm:$0xf0] }
  0x6d   : > { %1807 = vmatpush.bf16.msra.mxu3 %v4720_v2  ;;  %1901 = vmatpush.bf16.msra.mxu1 %v4880_v9 }
  0x6f   : > { %1857 = vmatpush.bf16.msra.mxu0 %v4776_v7  ;;  %v4869_v7 = vld [vmem:[%s8771_s2 + $0x1e8] sm:$0xf0] }
  0x70   : > { %v4872_v17 = vor.u32 %v5815_v6, %v4869_v7 }
  0x72   : > { %1902 = vmatpush.bf16.msra.mxu1 %v4872_v17  ;;  %v5759_v17 = vld [vmem:[%s8771_s2 + $0x24] sm:$0xf] }
  0x73   : > { %1858 = vmatpush.bf16.msra.mxu0 %v4768_v43  ;;  %v4648_v20 = vor.u32 %v5759_v17, %v4645_v19 }
  0x75   : > { %1759 = vmatpush.bf16.msra.mxu2 %v4648_v20  ;;  %v4587_v20 = vld [vmem:[%s6370_s15 + $0x128] sm:$0xf] }
  0x76   : > { %1903 = vmatpush.bf16.msra.mxu1 %v4864_v42  ;;  %v4845_v42 = vld [vmem:[%s8771_s2 + $0x1b8] sm:$0xf0] }
  0x7a   : > { %1566 = vmatmul.bf16.vlgmr.msrb.gmra.mxu2 %v6682_v30  ;;  %1664 = vmatmul.bf16.vlgmr.msrb.gmra.mxu0 %v6684_v31 }
  0x7c   : > { %1615 = vmatmul.bf16.vlgmr.msrb.gmra.mxu3 %v6686_v32  ;;  %1713 = vmatmul.bf16.vlgmr.msrb.gmra.mxu1 %v6688_v33 }
  0x8a   : > { %1571 = vmatmul.bf16.gmra.mxu2 %v6720_v57  ;;  %1669 = vmatmul.bf16.gmra.mxu0 %v6722_v58 }
  0x8c   : > { %1620 = vmatmul.bf16.gmra.mxu3 %v6724_v61  ;;  %1718 = vmatmul.bf16.gmra.mxu1 %v6726_v62 }
  0x9a   : > { %1576 = vmatmul.bf16.gmra.mxu2 %v6752_v21  ;;  %1674 = vmatmul.bf16.gmra.mxu0 %v6754_v22 }
  0x9c   : > { %1625 = vmatmul.bf16.gmra.mxu3 %v6756_v23  ;;  %1723 = vmatmul.bf16.gmra.mxu1 %v6758_v24 }
  0xaa   : > { %1581 = vmatmul.bf16.gmra.mxu2 %v6790_v46  ;;  %1679 = vmatmul.bf16.gmra.mxu0 %v6792_v47 }
  0xac   : > { %1630 = vmatmul.bf16.gmra.mxu3 %v6794_v48  ;;  %1728 = vmatmul.bf16.gmra.mxu1 %v6796_v49 }
  0xb7   : > { %v1469_v29 = vpop.f32.mrf.mxu0 }
  0xb9   : > { %v1518_v36 = vpop.f32.mrf.mxu1 }
  0xba   : > { %v6836_v37 = vadd.f32 %v1518_v36, %v1469_v29  ;;  %1586 = vmatmul.bf16.gmra.mxu2 %v6828_v27  ;;  %1684 = vmatmul.bf16.gmra.mxu0 %v6830_v28  ;;  %v5690_v29 = vld [vmem:[%s6370_s15 + $0xfc] sm:$0xf]  ;;  %v4571_v36 = vld [vmem:[%s6370_s15 + $0x100] sm:$0xf] }
  0xbb   : > { %v6898_v2 = vor.u32 %v5694_v38, %v4571_v36  ;;  %v6902_v7 = vor.u32 %v5690_v29, %v4565_v39  ;;  %v5775_v36 = vld [vmem:[%s8771_s2 + $0xa4] sm:$0xf]  ;;  %v4709_v38 = vld [vmem:[%s8771_s2 + $0xa8] sm:$0xf0]  ;;  %v5809_v39 = vld [vmem:[%s8771_s2 + $0x1b4] sm:$0xf] }
  0xbc   : > { %1635 = vmatmul.bf16.gmra.mxu3 %v6832_v34  ;;  %1733 = vmatmul.bf16.gmra.mxu1 %v6834_v35 }
  0xbd   : > { %v1489_v1 = vpop.f32.mrf.mxu2  ;;  %8844 = vst [vmem:[#allocation21_spill] sm:$0xff] %v6898_v2 }
  0xbf   : > { %v1538_v8 = vpop.f32.mrf.mxu3  ;;  %v1471_v11 = vpop.f32.mrf.mxu0 }
  0xc0   : > { %v6872_v10 = vadd.f32 %v1538_v8, %v1489_v1  ;;  %v6896_v1 = vor.u32 %v5693_v26, %v4563_v25  ;;  %v6904_v8 = vor.u32 %v5691_v40, %v4573_v41  ;;  %v5787_v25 = vld [vmem:[%s8771_s2 + $0x104] sm:$0xf]  ;;  %v4757_v26 = vld [vmem:[%s8771_s2 + $0x108] sm:$0xf0]  ;;  %v4712_v41 = vor.u32 %v5775_v36, %v4709_v38  ;;  %v5773_v36 = vld [vmem:[%s8771_s2 + $0x94] sm:$0xf] }
  0xc1   : > { %v1520_v16 = vpop.f32.mrf.mxu1  ;;  %v4760_v29 = vor.u32 %v5787_v25, %v4757_v26  ;;  %v5699_v25 = vld [vmem:[%s6370_s15 + $0x13c] sm:$0xf0]  ;;  %v5757_v26 = vld [vmem:[%s8771_s2 + $0x14] sm:$0xf] }
  0xc2   : > { %v6874_v18 = vadd.f32 %v1520_v16, %v1471_v11  ;;  %8845 = vst [vmem:[#allocation22_spill] sm:$0xff] %v6904_v8  ;;  %v4856_v11 = vor.u32 %v5811_v44, %v4853_v45  ;;  %v4837_v44 = vld [vmem:[%s8771_s2 + $0x1a8] sm:$0xf0]  ;;  %1808 = vmatpush.bf16.msra.mxu3 %v4712_v41  ;;  %v4829_v41 = vld [vmem:[%s8771_s2 + $0x198] sm:$0xf0]  ;;  %v6981_v35 = vor.u32 %v5699_v25, %v4587_v20 }
  0xc3   : > { %1859 = vmatpush.bf16.msra.mxu0 %v4760_v29  ;;  %v4637_v29 = vld [vmem:[%s8771_s2 + $0x18] sm:$0xf0] }
  0xc4   : > { %1904 = vmatpush.bf16.msra.mxu1 %v4856_v11  ;;  %v4640_v38 = vor.u32 %v5757_v26, %v4637_v29 }
  0xc5   : > { %v1491_v43 = vpop.f32.mrf.mxu2 }
  0xc6   : > { %1760 = vmatpush.bf16.msra.mxu2 %v4640_v38 }
  0xc7   : > { %v1540_v50 = vpop.f32.mrf.mxu3  ;;  %v1474_v6 = vpop.f32.mrf.mxu0 }
  0xc8   : > { %v6900_v5 = vadd.f32 %v1540_v50, %v1491_v43  ;;  %v5807_v43 = vld [vmem:[%s8771_s2 + $0x1a4] sm:$0xf]  ;;  %v4848_v50 = vor.u32 %v5809_v39, %v4845_v42  ;;  %v4701_v39 = vld [vmem:[%s8771_s2 + $0x98] sm:$0xf0]  ;;  %v5696_v42 = vld [vmem:[%s6370_s15 + $0x12c] sm:$0xf] }
  0xc9   : > { %v1523_v9 = vpop.f32.mrf.mxu1  ;;  %v4840_v17 = vor.u32 %v5807_v43, %v4837_v44  ;;  %v4595_v43 = vld [vmem:[%s6370_s15 + $0x130] sm:$0xf]  ;;  %v5700_v44 = vld [vmem:[%s6370_s15 + $0x144] sm:$0xf0] }
  0xca   : > { %v6906_v16 = vadd.f32 %v1523_v9, %v1474_v6  ;;  %1591 = vmatmul.bf16.gmra.mxu2 %v6896_v1  ;;  %1689 = vmatmul.bf16.gmra.mxu0 %v6898_v2  ;;  %v4629_v2 = vld [vmem:[%s8771_s2 + $0x8] sm:$0xf0] }
  0xcb   : > { %1905 = vmatpush.bf16.msra.mxu1 %v4848_v50  ;;  %v4589_v50 = vld [vmem:[%s6370_s15 + $0x140] sm:$0xf0] }
  0xcc   : > { %1640 = vmatmul.bf16.gmra.mxu3 %v6902_v7  ;;  %1738 = vmatmul.bf16.gmra.mxu1 %v6904_v8  ;;  %v5755_v8 = vld [vmem:[%s8771_s2 + $0x4] sm:$0xf]  ;;  %v6996_v20 = vor.u32 %v5696_v42, %v4589_v50  ;;  %v5259_v42 = vld [vmem:[%s8772_s3 + $0x70] sm:$0xf] }
  0xcd   : > { %v1494_v40 = vpop.f32.mrf.mxu2  ;;  %v4632_v38 = vor.u32 %v5755_v8, %v4629_v2 }
  0xcf   : > { %v1543_v45 = vpop.f32.mrf.mxu3  ;;  %v1476_v9 = vpop.f32.mrf.mxu0  ;;  %1906 = vmatpush.bf16.msra.mxu1 %v4840_v17  ;;  %v6983_v17 = vor.u32 %v5700_v44, %v4595_v43  ;;  %1761 = vmatpush.bf16.msra.mxu2 %v4632_v38  ;;  %v4611_v38 = vld [vmem:[%s6370_s15 + $0x158] sm:$0xf] }
  0xd0   : > { %v6942_v6 = vadd.f32 %v1543_v45, %v1494_v40  ;;  %v5805_v40 = vld [vmem:[%s8771_s2 + $0x194] sm:$0xf]  ;;  %v4704_v45 = vor.u32 %v5773_v36, %v4701_v39  ;;  %v5771_v36 = vld [vmem:[%s8771_s2 + $0x84] sm:$0xf] }
  0xd1   : > { %v1525_v11 = vpop.f32.mrf.mxu1  ;;  %v4832_v26 = vor.u32 %v5805_v40, %v4829_v41  ;;  %8846 = vst [vmem:[#allocation23_spill] sm:$0xff] %v6983_v17  ;;  %v4693_v40 = vld [vmem:[%s8771_s2 + $0x88] sm:$0xf0]  ;;  %v5803_v41 = vld [vmem:[%s8771_s2 + $0x184] sm:$0xf] }
  0xd2   : > { %v6944_v19 = vadd.f32 %v1525_v11, %v1476_v9  ;;  %v5697_v9 = vld [vmem:[%s6370_s15 + $0x134] sm:$0xf]  ;;  %v4597_v11 = vld [vmem:[%s6370_s15 + $0x148] sm:$0xf0]  ;;  %1809 = vmatpush.bf16.msra.mxu3 %v4704_v45  ;;  %v4696_v2 = vor.u32 %v5771_v36, %v4693_v40  ;;  %v5705_v40 = vld [vmem:[%s6370_s15 + $0x16c] sm:$0xf0] }
  0xd3   : > { %v4821_v45 = vld [vmem:[%s8771_s2 + $0x188] sm:$0xf0]  ;;  %v6998_v25 = vor.u32 %v5697_v9, %v4597_v11  ;;  %1907 = vmatpush.bf16.msra.mxu1 %v4832_v26 }
  0xd4   : > { %v4824_v43 = vor.u32 %v5803_v41, %v4821_v45  ;;  %v5702_v41 = vld [vmem:[%s6370_s15 + $0x15c] sm:$0xf]  ;;  %v4619_v45 = vld [vmem:[%s6370_s15 + $0x160] sm:$0xf] }
  0xd5   : > { %v1496_v29 = vpop.f32.mrf.mxu2  ;;  %8847 = vst [vmem:[#allocation24_spill] sm:$0xff] %v6998_v25 }
  0xd6   : > { %1810 = vmatpush.bf16.msra.mxu3 %v4696_v2  ;;  %v5706_v2 = vld [vmem:[%s6370_s15 + $0x174] sm:$0xf0] }
  0xd7   : > { %v1545_v39 = vpop.f32.mrf.mxu3  ;;  %v1479_v49 = vpop.f32.mrf.mxu0  ;;  %1908 = vmatpush.bf16.msra.mxu1 %v4824_v43 }
  0xd8   : > { %v6994_v28 = vadd.f32 %v1545_v39, %v1496_v29 }
  0xd9   : > { %v1528_v8 = vpop.f32.mrf.mxu1 }
  0xda   : > { %v7000_v44 = vadd.f32 %v1528_v8, %v1479_v49  ;;  %1596 = vmatmul.bf16.gmra.mxu2 %v6981_v35  ;;  %1694 = vmatmul.bf16.gmra.mxu0 %v6983_v17  ;;  %v5866_v49 = vld [vmem:[%s8772_s3 + $0x74] sm:$0xf0]  ;;  %v4613_v8 = vld [vmem:[%s6370_s15 + $0x170] sm:$0xf0]  ;;  %v4621_v17 = vld [vmem:[%s6370_s15 + $0x178] sm:$0xf0] }
  0xdb   : > { %v5260_v50 = vor.u32 %v5866_v49, %v5259_v42  ;;  %v7024_v42 = vor.u32 %v5705_v40, %v4611_v38  ;;  %v7026_v49 = vor.u32 %v5706_v2, %v4619_v45 }
  0xdc   : > { %1645 = vmatmul.bf16.gmra.mxu3 %v6996_v20  ;;  %1743 = vmatmul.bf16.gmra.mxu1 %v6998_v25  ;;  %v5703_v25 = vld [vmem:[%s6370_s15 + $0x164] sm:$0xf]  ;;  %s8857_s15 = smul.u32 24, %s8971_s22  ;;  %s4346_s22 = scalar_lea.sflag [#allocation4], %s511_s20 }
  0xdd   : > { %v1499_v9 = vpop.f32.mrf.mxu2  ;;  %2864 = vmatpush.bf16.msrb.mxu0 %v5260_v50  ;;  %8848 = vst [vmem:[#allocation25_spill] sm:$0xff] %v7026_v49 }
  0xde   : > { %s7324_s27 = scalar_lea.vmem %s8770_s1, %s8857_s15  ;;  %s4354_s15 = scalar_lea.hbm %s8783_s14, %s6250_s13 }
  0xdf   : > { %v1548_v11 = vpop.f32.mrf.mxu3  ;;  %v1481_v29 = vpop.f32.mrf.mxu0  ;;  %s4358_s25 = sshll.u32 %s4354_s15, 4  ;;  %s4359_s25 = int_to_ptr.hbm [resolvable:$true] %s4358_s25 }
  0xe0   : > { %v7012_v26 = vadd.f32 %v1548_v11, %v1499_v9  ;;  %v7030_v11 = vor.u32 %v5702_v41, %v4613_v8  ;;  %s6101_s28 = sshra.s32 %s4359_s25, 4  ;;  %s6102_s28 = int_to_ptr.hbm [resolvable:$true] %s6101_s28 }
  0xe1   : > { %v1530_v36 = vpop.f32.mrf.mxu1  ;;  %s6103_s29 = scalar_lea.hbm %s6102_s28, 1  ;;  %p6108_p0 = scmp.lt.s32.totalorder %s6102_s28, %s8783_s14 }
  0xe2   : > { %v7014_v39 = vadd.f32 %v1530_v36, %v1481_v29  ;;  %v7032_v29 = vor.u32 %v5703_v25, %v4621_v17  ;;  %v5864_v17 = vld [vmem:[%s8772_s3 + $0x64] sm:$0xf0]  ;;  %p6104_p11 = scmp.ne.s32.totalorder %s6102_s28, %s6103_s29  ;;  %p6109_p1 = scmp.lt.s32.totalorder %s6107_s17, %s6103_s29 }
  0xe4   : > { %8849 = vst [vmem:[#allocation26_spill] sm:$0xff] %v7032_v29  ;;  %p6105_p12 = pnand %p6104_p11, %p6267_p5  ;;  %p6110_p2 = por %p6109_p1, %p6108_p0 }
  0xe5   : > { %v1501_v43 = vpop.f32.mrf.mxu2 }
  0xe6   : > { %p6106_p13 = pneg %p6105_p12 }
  0xe7   : > { %v1550_v47 = vpop.f32.mrf.mxu3  ;;  %v1484_v9 = vpop.f32.mrf.mxu0 }
  0xe8   : > { %v7028_v50 = vadd.f32 %v1550_v47, %v1501_v43  ;;  %v5251_v47 = vld [vmem:[%s8772_s3 + $0x60] sm:$0xf]  ;;  %p6111_p3 = pnand %p6110_p2, %p6106_p13 }
  0xe9   : > { %v1533_v36 = vpop.f32.mrf.mxu1  ;;  %v5252_v25 = vor.u32 %v5864_v17, %v5251_v47  ;;  %v5833_v47 = vld [vmem:[%s8771_s2 + $0x274] sm:$0xf]  ;;  %v4941_v17 = vld [vmem:[%s8771_s2 + $0x278] sm:$0xf0] }
  0xea   : > { %v7034_v24 = vadd.f32 %v1533_v36, %v1484_v9  ;;  %1601 = vmatmul.bf16.gmra.mxu2 %v7024_v42  ;;  %1699 = vmatmul.bf16.gmra.mxu0 %v7026_v49 }
  0xeb   : > { %2865 = vmatpush.bf16.msrb.mxu0 %v5252_v25  ;;  %v4944_v25 = vor.u32 %v5833_v47, %v4941_v17 }
  0xec   : > { %1650 = vmatmul.bf16.gmra.mxu3 %v7030_v11  ;;  %1748 = vmatmul.bf16.gmra.mxu1 %v7032_v29 }
  0xed   : > { %v1504_v38 = vpop.f32.mrf.mxu2  ;;  %1950 = vmatpush.bf16.msrb.mxu2 %v4944_v25 }
  0xef   : > { %v1553_v40 = vpop.f32.mrf.mxu3  ;;  %v1486_v45 = vpop.f32.mrf.mxu0 }
  0xf0   : > { %v7046_v41 = vadd.f32 %v1553_v40, %v1504_v38  ;;  %v5243_v38 = vld [vmem:[%s8772_s3 + $0x50] sm:$0xf] }
  0xf1   : > { %v1535_v2 = vpop.f32.mrf.mxu1 }
  0xf2   : > { %v7048_v8 = vadd.f32 %v1535_v2, %v1486_v45 }
  0xf5   : > { %v1506_v43 = vpop.f32.mrf.mxu2 }
  0xf7   : > { %v1555_v9 = vpop.f32.mrf.mxu3  ;;  %v1665_v29 = vpop.f32.mrf.mxu0 }
  0xf8   : > { %v7050_v36 = vadd.f32 %v1555_v9, %v1506_v43 }
  0xf9   : > { %v1714_v49 = vpop.f32.mrf.mxu1 }
  0xfa   : > { %8850 = vst [vmem:[#allocation27_spill] sm:$0xff] %v7050_v36  ;;  %1762 = vmatmul.bf16.vlgmr.msra.gmra.mxu2 %v6404_v63  ;;  %1860 = vmatmul.bf16.vlgmr.msra.gmra.mxu0 %v6682_v30  ;;  %v5862_v63 = vld [vmem:[%s8772_s3 + $0x54] sm:$0xf0]  ;;  %v5849_v30 = vld [vmem:[%s8771_s2 + $0x2f4] sm:$0xf] }
  0xfb   : > { %v5244_v40 = vor.u32 %v5862_v63, %v5243_v38 }
  0xfc   : > { %1811 = vmatmul.bf16.vlgmr.msra.gmra.mxu3 %v6414_v3  ;;  %1909 = vmatmul.bf16.vlgmr.msra.gmra.mxu1 %v6686_v32  ;;  %v5005_v3 = vld [vmem:[%s8771_s2 + $0x2f8] sm:$0xf0] }
  0xfd   : > { %v1567_v45 = vpop.f32.mrf.mxu2  ;;  %v5008_v32 = vor.u32 %v5849_v30, %v5005_v3  ;;  %2866 = vmatpush.bf16.msrb.mxu0 %v5244_v40 }
  0xfe   : > { %v1568_v2 = vadd.f32 %v1567_v45, %v6836_v37  ;;  %v5831_v37 = vld [vmem:[%s8771_s2 + $0x264] sm:$0xf] }
  0xff   : > { %v1616_v43 = vpop.f32.mrf.mxu3  ;;  %v1667_v9 = vpop.f32.mrf.mxu0  ;;  %1999 = vmatpush.bf16.msrb.mxu3 %v5008_v32 }
 0x100   : > { %v1617_v47 = vadd.f32 %v1616_v43, %v1568_v2 }
 0x101   : > { %v1716_v17 = vpop.f32.mrf.mxu1 }
 0x102   : > { %v1666_v22 = vadd.f32 %v1665_v29, %v1617_v47 }
 0x104   : > { %v7075_v62 = vadd.f32 %v1714_v49, %v1666_v22  ;;  %v4933_v22 = vld [vmem:[%s8771_s2 + $0x268] sm:$0xf0] }
 0x105   : > { %v1569_v58 = vpop.f32.mrf.mxu2 }
 0x106   : > { %v1570_v38 = vadd.f32 %v1569_v58, %v6874_v18  ;;  %v4936_v58 = vor.u32 %v5831_v37, %v4933_v22 }
 0x107   : > { %v1618_v63 = vpop.f32.mrf.mxu3  ;;  %v1670_v33 = vpop.f32.mrf.mxu0 }
 0x108   : > { %v1619_v31 = vadd.f32 %v1618_v63, %v1570_v38  ;;  %1951 = vmatpush.bf16.msrb.mxu2 %v4936_v58 }
 0x109   : > { %v1719_v36 = vpop.f32.mrf.mxu1 }
 0x10a   : > { %v1668_v25 = vadd.f32 %v1667_v9, %v1619_v31  ;;  %1767 = vmatmul.bf16.gmra.mxu2 %v6514_v55  ;;  %1865 = vmatmul.bf16.gmra.mxu0 %v6720_v57  ;;  %v5235_v31 = vld [vmem:[%s8772_s3 + $0x40] sm:$0xf]  ;;  %v5860_v55 = vld [vmem:[%s8772_s3 + $0x44] sm:$0xf0]  ;;  %v5847_v57 = vld [vmem:[%s8771_s2 + $0x2e4] sm:$0xf] }
 0x10b   : > { %v5236_v18 = vor.u32 %v5860_v55, %v5235_v31 }
 0x10c   : > { %1816 = vmatmul.bf16.gmra.mxu3 %v6524_v59  ;;  %1914 = vmatmul.bf16.gmra.mxu1 %v6724_v61  ;;  %v4997_v59 = vld [vmem:[%s8771_s2 + $0x2e8] sm:$0xf0]  ;;  %v7100_v49 = vadd.f32 %v1716_v17, %v1668_v25 }
 0x10d   : > { %v1572_v61 = vpop.f32.mrf.mxu2  ;;  %v5000_v29 = vor.u32 %v5847_v57, %v4997_v59  ;;  %2867 = vmatpush.bf16.msrb.mxu0 %v5236_v18 }
 0x10e   : > { %v1573_v30 = vadd.f32 %v1572_v61, %v6906_v16  ;;  %v5829_v16 = vld [vmem:[%s8771_s2 + $0x254] sm:$0xf] }
 0x10f   : > { %v1621_v40 = vpop.f32.mrf.mxu3  ;;  %v1672_v3 = vpop.f32.mrf.mxu0  ;;  %2000 = vmatpush.bf16.msrb.mxu3 %v5000_v29 }
 0x110   : > { %v1622_v45 = vadd.f32 %v1621_v40, %v1573_v30 }
 0x111   : > { %v1721_v32 = vpop.f32.mrf.mxu1 }
 0x112   : > { %v1671_v2 = vadd.f32 %v1670_v33, %v1622_v45  ;;  %v4925_v33 = vld [vmem:[%s8771_s2 + $0x258] sm:$0xf0] }
 0x114   : > { %v7103_v43 = vadd.f32 %v1719_v36, %v1671_v2  ;;  %v5227_v36 = vld [vmem:[%s8772_s3 + $0x30] sm:$0xf] }
 0x115   : > { %v1574_v9 = vpop.f32.mrf.mxu2 }
 0x116   : > { %v1575_v47 = vadd.f32 %v1574_v9, %v6944_v19  ;;  %v4928_v19 = vor.u32 %v5829_v16, %v4925_v33 }
 0x117   : > { %v1623_v38 = vpop.f32.mrf.mxu3  ;;  %v1675_v17 = vpop.f32.mrf.mxu0 }
 0x118   : > { %v1624_v63 = vadd.f32 %v1623_v38, %v1575_v47  ;;  %1952 = vmatpush.bf16.msrb.mxu2 %v4928_v19  ;;  %v4917_v38 = vld [vmem:[%s8771_s2 + $0x248] sm:$0xf0] }
 0x119   : > { %v1724_v25 = vpop.f32.mrf.mxu1 }
 0x11a   : > { %v1673_v37 = vadd.f32 %v1672_v3, %v1624_v63  ;;  %1772 = vmatmul.bf16.gmra.mxu2 %v6624_v51  ;;  %1870 = vmatmul.bf16.gmra.mxu0 %v6752_v21  ;;  %v5858_v51 = vld [vmem:[%s8772_s3 + $0x34] sm:$0xf0]  ;;  %v5845_v21 = vld [vmem:[%s8771_s2 + $0x2d4] sm:$0xf] }
 0x11b   : > { %v5228_v22 = vor.u32 %v5858_v51, %v5227_v36 }
 0x11c   : > { %1821 = vmatmul.bf16.gmra.mxu3 %v6628_v53  ;;  %1919 = vmatmul.bf16.gmra.mxu1 %v6756_v23  ;;  %v4989_v53 = vld [vmem:[%s8771_s2 + $0x2d8] sm:$0xf0]  ;;  %v7128_v58 = vadd.f32 %v1721_v32, %v1673_v37 }
 0x11d   : > { %v1577_v23 = vpop.f32.mrf.mxu2  ;;  %v4992_v31 = vor.u32 %v5845_v21, %v4989_v53  ;;  %2868 = vmatpush.bf16.msrb.mxu0 %v5228_v22 }
 0x11e   : > { %v1578_v55 = vadd.f32 %v1577_v23, %v7000_v44  ;;  %v5827_v44 = vld [vmem:[%s8771_s2 + $0x244] sm:$0xf] }
 0x11f   : > { %v1626_v57 = vpop.f32.mrf.mxu3  ;;  %v1677_v18 = vpop.f32.mrf.mxu0  ;;  %2001 = vmatpush.bf16.msrb.mxu3 %v4992_v31 }
 0x120   : > { %v1627_v59 = vadd.f32 %v1626_v57, %v1578_v55 }
 0x121   : > { %v1726_v61 = vpop.f32.mrf.mxu1 }
 0x122   : > { %v1676_v29 = vadd.f32 %v1675_v17, %v1627_v59  ;;  %v5219_v17 = vld [vmem:[%s8772_s3 + $0x20] sm:$0xf]  ;;  %v5882_v59 = vld [vmem:[%s8772_s3 + $0xf4] sm:$0xf0] }
 0x124   : > { %v7131_v30 = vadd.f32 %v1724_v25, %v1676_v29  ;;  %v4909_v29 = vld [vmem:[%s8771_s2 + $0x238] sm:$0xf0] }
 0x125   : > { %v1579_v40 = vpop.f32.mrf.mxu2 }
 0x126   : > { %v1580_v3 = vadd.f32 %v1579_v40, %v7014_v39  ;;  %v4920_v39 = vor.u32 %v5827_v44, %v4917_v38  ;;  %v5880_v44 = vld [vmem:[%s8772_s3 + $0xe4] sm:$0xf0] }
 0x127   : > { %v1628_v45 = vpop.f32.mrf.mxu3  ;;  %v1680_v32 = vpop.f32.mrf.mxu0 }
 0x128   : > { %v1629_v2 = vadd.f32 %v1628_v45, %v1580_v3  ;;  %1953 = vmatpush.bf16.msrb.mxu2 %v4920_v39  ;;  %v5841_v45 = vld [vmem:[%s8771_s2 + $0x2b4] sm:$0xf] }
 0x129   : > { %v1729_v9 = vpop.f32.mrf.mxu1 }
 0x12a   : > { %v1678_v47 = vadd.f32 %v1677_v18, %v1629_v2  ;;  %1777 = vmatmul.bf16.gmra.mxu2 %v6650_v12  ;;  %1875 = vmatmul.bf16.gmra.mxu0 %v6790_v46  ;;  %v5856_v12 = vld [vmem:[%s8772_s3 + $0x24] sm:$0xf0]  ;;  %v5843_v46 = vld [vmem:[%s8771_s2 + $0x2c4] sm:$0xf] }
 0x12b   : > { %v5220_v63 = vor.u32 %v5856_v12, %v5219_v17 }
 0x12c   : > { %1826 = vmatmul.bf16.gmra.mxu3 %v6654_v14  ;;  %1924 = vmatmul.bf16.gmra.mxu1 %v6794_v48  ;;  %v4981_v14 = vld [vmem:[%s8771_s2 + $0x2c8] sm:$0xf0]  ;;  %v7156_v25 = vadd.f32 %v1726_v61, %v1678_v47  ;;  %v5315_v47 = vld [vmem:[%s8772_s3 + $0xe0] sm:$0xf] }
 0x12d   : > { %v1582_v48 = vpop.f32.mrf.mxu2  ;;  %v4984_v37 = vor.u32 %v5843_v46, %v4981_v14  ;;  %2869 = vmatpush.bf16.msrb.mxu0 %v5220_v63  ;;  %v5316_v17 = vor.u32 %v5880_v44, %v5315_v47  ;;  %v5307_v14 = vld [vmem:[%s8772_s3 + $0xd0] sm:$0xf] }
 0x12e   : > { %v1583_v16 = vadd.f32 %v1582_v48, %v7034_v24  ;;  %v5323_v24 = vld [vmem:[%s8772_s3 + $0xf0] sm:$0xf]  ;;  %v5878_v48 = vld [vmem:[%s8772_s3 + $0xd4] sm:$0xf0] }
 0x12f   : > { %v1631_v33 = vpop.f32.mrf.mxu3  ;;  %v1682_v19 = vpop.f32.mrf.mxu0  ;;  %2002 = vmatpush.bf16.msrb.mxu3 %v4984_v37  ;;  %v5324_v40 = vor.u32 %v5882_v59, %v5323_v24  ;;  %v4901_v59 = vld [vmem:[%s8771_s2 + $0x228] sm:$0xf0] }
 0x130   : > { %v1632_v36 = vadd.f32 %v1631_v33, %v1583_v16  ;;  %v5308_v16 = vor.u32 %v5878_v48, %v5307_v14  ;;  %v5870_v14 = vld [vmem:[%s8772_s3 + $0x94] sm:$0xf0] }
 0x131   : > { %v1731_v51 = vpop.f32.mrf.mxu1  ;;  %2913 = vmatpush.bf16.msrb.mxu1 %v5324_v40 }
 0x132   : > { %v1681_v21 = vadd.f32 %v1680_v32, %v1632_v36  ;;  %v5876_v36 = vld [vmem:[%s8772_s3 + $0xc4] sm:$0xf0] }
 0x134   : > { %v7159_v22 = vadd.f32 %v1729_v9, %v1681_v21 }
 0x135   : > { %v1584_v53 = vpop.f32.mrf.mxu2  ;;  %2914 = vmatpush.bf16.msrb.mxu1 %v5316_v17 }
 0x136   : > { %v1585_v23 = vadd.f32 %v1584_v53, %v7048_v8  ;;  %v5825_v8 = vld [vmem:[%s8771_s2 + $0x234] sm:$0xf] }
 0x137   : > { %v1633_v31 = vpop.f32.mrf.mxu3  ;;  %v1685_v55 = vpop.f32.mrf.mxu0  ;;  %v4912_v3 = vor.u32 %v5825_v8, %v4909_v29  ;;  %v5839_v29 = vld [vmem:[%s8771_s2 + $0x2a4] sm:$0xf] }
 0x138   : > { %v1634_v57 = vadd.f32 %v1633_v31, %v1585_v23 }
 0x139   : > { %v1734_v18 = vpop.f32.mrf.mxu1  ;;  %1954 = vmatpush.bf16.msrb.mxu2 %v4912_v3  ;;  %2915 = vmatpush.bf16.msrb.mxu1 %v5308_v16 }
 0x13a   : > { %v1683_v61 = vadd.f32 %v1682_v19, %v1634_v57  ;;  %1782 = vmatmul.bf16.gmra.mxu2 %v6406_v0  ;;  %1880 = vmatmul.bf16.gmra.mxu0 %v6828_v27  ;;  %v5211_v0 = vld [vmem:[%s8772_s3 + $0x10] sm:$0xf]  ;;  %v5854_v27 = vld [vmem:[%s8772_s3 + $0x14] sm:$0xf0]  ;;  %v5299_v19 = vld [vmem:[%s8772_s3 + $0xc0] sm:$0xf] }
 0x13b   : > { %v5212_v32 = vor.u32 %v5854_v27, %v5211_v0  ;;  %v5300_v53 = vor.u32 %v5876_v36, %v5299_v19  ;;  %v5291_v57 = vld [vmem:[%s8772_s3 + $0xb0] sm:$0xf]  ;;  %v5283_v27 = vld [vmem:[%s8772_s3 + $0xa0] sm:$0xf]  ;;  %v5819_v19 = vld [vmem:[%s8771_s2 + $0x204] sm:$0xf] }
 0x13c   : > { %1831 = vmatmul.bf16.gmra.mxu3 %v6416_v4  ;;  %1929 = vmatmul.bf16.gmra.mxu1 %v6832_v34  ;;  %v4973_v4 = vld [vmem:[%s8771_s2 + $0x2b8] sm:$0xf0]  ;;  %v7190_v34 = vadd.f32 %v1731_v51, %v1683_v61  ;;  %v4885_v36 = vld [vmem:[%s8771_s2 + $0x208] sm:$0xf0] }
 0x13d   : > { %v1587_v2 = vpop.f32.mrf.mxu2  ;;  %v4976_v9 = vor.u32 %v5841_v45, %v4973_v4  ;;  %2870 = vmatpush.bf16.msrb.mxu0 %v5212_v32  ;;  %2916 = vmatpush.bf16.msrb.mxu1 %v5300_v53  ;;  %v5872_v45 = vld [vmem:[%s8772_s3 + $0xa4] sm:$0xf0] }
 0x13e   : > { %v1588_v38 = vadd.f32 %v1587_v2, %v6872_v10  ;;  %v5284_v2 = vor.u32 %v5872_v45, %v5283_v27 }
 0x13f   : > { %v1636_v39 = vpop.f32.mrf.mxu3  ;;  %v1687_v12 = vpop.f32.mrf.mxu0  ;;  %2003 = vmatpush.bf16.msrb.mxu3 %v4976_v9 }
 0x140   : > { %v1637_v46 = vadd.f32 %v1636_v39, %v1588_v38  ;;  %v5821_v38 = vld [vmem:[%s8771_s2 + $0x214] sm:$0xf]  ;;  %v4893_v39 = vld [vmem:[%s8771_s2 + $0x218] sm:$0xf0] }
 0x141   : > { %v1736_v63 = vpop.f32.mrf.mxu1 }
 0x142   : > { %v1686_v37 = vadd.f32 %v1685_v55, %v1637_v46  ;;  %v4957_v46 = vld [vmem:[%s8771_s2 + $0x298] sm:$0xf0] }
 0x144   : > { %v7205_v10 = vadd.f32 %v1734_v18, %v1686_v37  ;;  %v5874_v18 = vld [vmem:[%s8772_s3 + $0xb4] sm:$0xf0] }
 0x145   : > { %v1589_v33 = vpop.f32.mrf.mxu2  ;;  %v5292_v61 = vor.u32 %v5874_v18, %v5291_v57  ;;  %v5868_v57 = vld [vmem:[%s8772_s3 + $0x84] sm:$0xf0] }
 0x146   : > { %8851 = vst [vmem:[#allocation28_spill] sm:$0xff] %v7205_v10  ;;  %v1590_v51 = vadd.f32 %v1589_v33, %v6900_v5  ;;  %v5823_v5 = vld [vmem:[%s8771_s2 + $0x224] sm:$0xf] }
 0x147   : > { %v1638_v21 = vpop.f32.mrf.mxu3  ;;  %v1690_v23 = vpop.f32.mrf.mxu0  ;;  %v4904_v8 = vor.u32 %v5823_v5, %v4901_v59  ;;  %2917 = vmatpush.bf16.msrb.mxu1 %v5292_v61  ;;  %v5911_v10 = vld [vmem:[%s8772_s3 + $0x1e4] sm:$0xf] }
 0x148   : > { %v1639_v31 = vadd.f32 %v1638_v21, %v1590_v51  ;;  %v5835_v51 = vld [vmem:[%s8771_s2 + $0x284] sm:$0xf] }
 0x149   : > { %v1739_v55 = vpop.f32.mrf.mxu1  ;;  %1955 = vmatpush.bf16.msrb.mxu2 %v4904_v8  ;;  %v5515_v8 = vld [vmem:[%s8772_s3 + $0x270] sm:$0xf] }
 0x14a   : > { %v1688_v24 = vadd.f32 %v1687_v12, %v1639_v31  ;;  %1787 = vmatmul.bf16.gmra.mxu2 %v6516_v56  ;;  %1885 = vmatmul.bf16.gmra.mxu0 %v6896_v1  ;;  %v5203_v56 = vld [vmem:[%s8772_s3] sm:$0xf]  ;;  %v5852_v1 = vld [vmem:[%s8772_s3 + $0x4] sm:$0xf0]  ;;  %v4896_v12 = vor.u32 %v5821_v38, %v4893_v39  ;;  %v4949_v31 = vld [vmem:[%s8771_s2 + $0x288] sm:$0xf0] }
 0x14b   : > { %v5204_v40 = vor.u32 %v5852_v1, %v5203_v56  ;;  %2918 = vmatpush.bf16.msrb.mxu1 %v5284_v2  ;;  %v5930_v56 = vld [vmem:[%s8772_s3 + $0x274] sm:$0xf0] }
 0x14c   : > { %1836 = vmatmul.bf16.gmra.mxu3 %v6526_v60  ;;  %1934 = vmatmul.bf16.gmra.mxu1 %v6902_v7  ;;  %v4965_v60 = vld [vmem:[%s8771_s2 + $0x2a8] sm:$0xf0]  ;;  %v7242_v7 = vadd.f32 %v1736_v63, %v1688_v24  ;;  %v5275_v63 = vld [vmem:[%s8772_s3 + $0x90] sm:$0xf]  ;;  %v4952_v24 = vor.u32 %v5835_v51, %v4949_v31  ;;  %v5516_v1 = vor.u32 %v5930_v56, %v5515_v8  ;;  %v5914_v56 = vld [vmem:[%s8772_s3 + $0x1f4] sm:$0xf0] }
 0x14d   : > { %v1592_v3 = vpop.f32.mrf.mxu2  ;;  %v4968_v0 = vor.u32 %v5839_v29, %v4965_v60  ;;  %2871 = vmatpush.bf16.msrb.mxu0 %v5204_v40  ;;  %v5276_v37 = vor.u32 %v5870_v14, %v5275_v63  ;;  %1956 = vmatpush.bf16.msrb.mxu2 %v4896_v12  ;;  %v5011_v12 = vld [vmem:[%s7324_s27] sm:$0xf]  ;;  %v5707_v63 = vld [vmem:[%s7324_s27 + $0x4] sm:$0xf]  ;;  %v5387_v31 = vld [vmem:[%s8772_s3 + $0x170] sm:$0xf] }
 0x14e   : > { %8852 = vst [vmem:[#allocation29_spill] sm:$0xff] %v7242_v7  ;;  %v1593_v32 = vadd.f32 %v1592_v3, %v6942_v6  ;;  %v5837_v6 = vld [vmem:[%s8771_s2 + $0x294] sm:$0xf] }
 0x14f   : > { %v1641_v4 = vpop.f32.mrf.mxu3  ;;  %v1692_v9 = vpop.f32.mrf.mxu0  ;;  %2004 = vmatpush.bf16.msrb.mxu3 %v4968_v0  ;;  %v4960_v48 = vor.u32 %v5837_v6, %v4957_v46  ;;  %2919 = vmatpush.bf16.msrb.mxu1 %v5276_v37  ;;  %v5710_v46 = vld [vmem:[%s7324_s27 + $0x14] sm:$0xf0]  ;;  %v8859_v37 = vld [vmem:[#allocation27_spill] sm:$0xff]  ;;  %v5733_v7 = vld [vmem:[%s7324_s27 + $0xd4] sm:$0xf] }
 0x150   : > { %v1642_v47 = vadd.f32 %v1641_v4, %v1593_v32 }
 0x151   : > { %v1741_v44 = vpop.f32.mrf.mxu1  ;;  %3060 = vmatpush.bf16.msra.mxu0 %v5516_v1 }
 0x152   : > { %v1691_v17 = vadd.f32 %v1690_v23, %v1642_v47  ;;  %v4888_v23 = vor.u32 %v5819_v19, %v4885_v36  ;;  %v7333_v36 = vor.u32 %v5710_v46, %v5011_v12  ;;  %v8864_v12 = vld [vmem:[#allocation14_spill] sm:$0xff] }
 0x153   : > { %2005 = vmatpush.bf16.msrb.mxu3 %v4960_v48  ;;  %v5491_v46 = vld [vmem:[%s8772_s3 + $0x240] sm:$0xf] }
 0x154   : > { %v7269_v16 = vadd.f32 %v1739_v55, %v1691_v17  ;;  %v5267_v55 = vld [vmem:[%s8772_s3 + $0x80] sm:$0xf]  ;;  %1957 = vmatpush.bf16.msrb.mxu2 %v4888_v23 }
 0x155   : > { %v1594_v33 = vpop.f32.mrf.mxu2  ;;  %v5268_v5 = vor.u32 %v5868_v57, %v5267_v55  ;;  %v5898_v55 = vld [vmem:[%s8772_s3 + $0x174] sm:$0xf0] }
 0x156   : > { %8853 = vst [vmem:[#allocation30_spill] sm:$0xff] %v7269_v16  ;;  %v1595_v21 = vadd.f32 %v1594_v33, %v6994_v28 }
 0x157   : > { %v1643_v53 = vpop.f32.mrf.mxu3  ;;  %v1695_v18 = vpop.f32.mrf.mxu0  ;;  %2006 = vmatpush.bf16.msrb.mxu3 %v4952_v24  ;;  %2920 = vmatpush.bf16.msrb.mxu1 %v5268_v5  ;;  %v5388_v24 = vor.u32 %v5898_v55, %v5387_v31  ;;  %v8861_v5 = vld [vmem:[#allocation12_spill] sm:$0xff] }
 0x158   : > { %v1644_v59 = vadd.f32 %v1643_v53, %v1595_v21 }
 0x159   : > { %v1744_v61 = vpop.f32.mrf.mxu1  ;;  %2962 = vmatpush.bf16.msra.mxu2 %v5388_v24  ;;  %v5722_v24 = vld [vmem:[%s7324_s27 + $0x74] sm:$0xf0] }
 0x15a   : > { %v1693_v28 = vadd.f32 %v1692_v9, %v1644_v59  ;;  %1792 = vmatmul.bf16.gmra.mxu2 %v6626_v52  ;;  %1890 = vmatmul.bf16.gmra.mxu0 %v6981_v35  ;;  %v5499_v59 = vld [vmem:[%s8772_s3 + $0x250] sm:$0xf] }
 0x15c   : > { %1841 = vmatmul.bf16.gmra.mxu3 %v6630_v54  ;;  %1939 = vmatmul.bf16.gmra.mxu1 %v6996_v20  ;;  %v7300_v29 = vadd.f32 %v1741_v44, %v1693_v28  ;;  %v5451_v28 = vld [vmem:[%s8772_s3 + $0x1f0] sm:$0xf] }
 0x15d   : > { %v1597_v40 = vpop.f32.mrf.mxu2 }
 0x15e   : > { %8854 = vst [vmem:[#allocation31_spill] sm:$0xff] %v7300_v29  ;;  %v1598_v52 = vadd.f32 %v1597_v40, %v7012_v26  ;;  %v5507_v26 = vld [vmem:[%s8772_s3 + $0x260] sm:$0xf]  ;;  %v5721_v29 = vld [vmem:[%s7324_s27 + $0x74] sm:$0xf] }
 0x15f   : > { %v1646_v60 = vpop.f32.mrf.mxu3  ;;  %v1697_v35 = vpop.f32.mrf.mxu0 }
 0x160   : > { %v1647_v54 = vadd.f32 %v1646_v60, %v1598_v52  ;;  %v5452_v52 = vor.u32 %v5914_v56, %v5451_v28 }
 0x161   : > { %v1746_v3 = vpop.f32.mrf.mxu1 }
 0x162   : > { %v1696_v20 = vadd.f32 %v1695_v18, %v1647_v54  ;;  %v8860_v18 = vld [vmem:[#allocation11_spill] sm:$0xff]  ;;  %3011 = vmatpush.bf16.msra.mxu3 %v5452_v52 }
 0x164   : > { %v7303_v0 = vadd.f32 %v1744_v61, %v1696_v20  ;;  %v5926_v61 = vld [vmem:[%s8772_s3 + $0x254] sm:$0xf0] }
 0x165   : > { %v1599_v27 = vpop.f32.mrf.mxu2  ;;  %v5500_v8 = vor.u32 %v5926_v61, %v5499_v59  ;;  %v5719_v59 = vld [vmem:[%s7324_s27 + $0x64] sm:$0xf]  ;;  %v5061_v61 = vld [vmem:[%s7324_s27 + $0x78] sm:$0xf0] }
 0x166   : > { %8855 = vst [vmem:[#allocation32_spill] sm:$0xff] %v7303_v0  ;;  %v1600_v45 = vadd.f32 %v1599_v27, %v7028_v50  ;;  %v5928_v50 = vld [vmem:[%s8772_s3 + $0x264] sm:$0xf0]  ;;  %v5035_v27 = vld [vmem:[%s7324_s27 + $0x30] sm:$0xf] }
 0x167   : > { %v1648_v32 = vpop.f32.mrf.mxu3  ;;  %v1700_v4 = vpop.f32.mrf.mxu0  ;;  %v5508_v44 = vor.u32 %v5928_v50, %v5507_v26 }
 0x168   : > { %v1649_v2 = vadd.f32 %v1648_v32, %v1600_v45  ;;  %v5716_v45 = vld [vmem:[%s7324_s27 + $0x44] sm:$0xf0] }
 0x169   : > { %v1749_v9 = vpop.f32.mrf.mxu1  ;;  %3061 = vmatpush.bf16.msra.mxu0 %v5508_v44  ;;  %v7367_v26 = vor.u32 %v5716_v45, %v5035_v27  ;;  %v8865_v27 = vld [vmem:[#allocation15_spill] sm:$0xff] }
 0x16a   : > { %v1698_v47 = vadd.f32 %v1697_v35, %v1649_v2  ;;  %1797 = vmatmul.bf16.gmra.mxu2 %v6652_v13  ;;  %1895 = vmatmul.bf16.gmra.mxu0 %v7024_v42  ;;  %v5037_v2 = vld [vmem:[%s7324_s27 + $0x48] sm:$0xf0] }
 0x16c   : > { %1846 = vmatmul.bf16.gmra.mxu3 %v6656_v15  ;;  %1944 = vmatmul.bf16.gmra.mxu1 %v7030_v11  ;;  %v7316_v38 = vadd.f32 %v1746_v3, %v1698_v47 }
 0x16d   : > { %v1602_v39 = vpop.f32.mrf.mxu2  ;;  %3062 = vmatpush.bf16.msra.mxu0 %v5500_v8 }
 0x16e   : > { %8856 = vst [vmem:[#allocation33_spill] sm:$0xff] %v7316_v38  ;;  %v1603_v13 = vadd.f32 %v1602_v39, %v7046_v41  ;;  %v5013_v41 = vld [vmem:[%s7324_s27 + $0x18] sm:$0xf0] }
 0x16f   : > { %v1651_v6 = vpop.f32.mrf.mxu3  ;;  %v1702_v42 = vpop.f32.mrf.mxu0  ;;  %v7335_v21 = vor.u32 %v5707_v63, %v5013_v41  ;;  %v5924_v63 = vld [vmem:[%s8772_s3 + $0x244] sm:$0xf0]  ;;  %v5443_v41 = vld [vmem:[%s8772_s3 + $0x1e0] sm:$0xf] }
 0x170   : > { %v1652_v15 = vadd.f32 %v1651_v6, %v1603_v13 }
 0x171   : > { %v1751_v11 = vpop.f32.mrf.mxu1 }
 0x172   : > { %v1701_v17 = vadd.f32 %v1700_v4, %v1652_v15  ;;  %v5713_v4 = vld [vmem:[%s7324_s27 + $0x34] sm:$0xf]  ;;  %v5896_v15 = vld [vmem:[%s8772_s3 + $0x164] sm:$0xf0] }
 0x173   : > { %v7369_v39 = vor.u32 %v5713_v4, %v5037_v2  ;;  %v8866_v4 = vld [vmem:[#allocation16_spill] sm:$0xff] }
 0x174   : > { %v7330_v14 = vadd.f32 %v1749_v9, %v1701_v17  ;;  %v5483_v2 = vld [vmem:[%s8772_s3 + $0x230] sm:$0xf] }
 0x175   : > { %v1604_v48 = vpop.f32.mrf.mxu2 }
 0x176   : > { %8858 = vst [vmem:[#allocation34_spill] sm:$0xff] %v7330_v14  ;;  %v1605_v33 = vadd.f32 %v1604_v48, %v8859_v37  ;;  %v5492_v37 = vor.u32 %v5924_v63, %v5491_v46  ;;  %v5083_v63 = vld [vmem:[%s7324_s27 + $0x90] sm:$0xf]  ;;  %v5021_v14 = vld [vmem:[%s7324_s27 + $0x20] sm:$0xf0] }
 0x177   : > { %v1653_v19 = vpop.f32.mrf.mxu3  ;;  %v1861_v51 = vpop.f32.mrf.mxu0 }
 0x178   : > { %v1654_v53 = vadd.f32 %v1653_v19, %v1605_v33  ;;  %v5912_v33 = vld [vmem:[%s8772_s3 + $0x1e4] sm:$0xf0]  ;;  %3063 = vmatpush.bf16.msra.mxu0 %v5492_v37 }
 0x179   : > { %v1910_v23 = vpop.f32.mrf.mxu1 }
 0x17a   : > { %v1703_v57 = vadd.f32 %v1702_v42, %v1654_v53  ;;  %1958 = vmatmul.bf16.vlgmr.msrb.gmra.mxu2 %v8860_v18  ;;  %2872 = vmatmul.bf16.vlgmr.msrb.gmra.mxu0 %v7333_v36  ;;  %v5379_v42 = vld [vmem:[%s8772_s3 + $0x160] sm:$0xf] }
 0x17b   : > { %v5380_v17 = vor.u32 %v5896_v15, %v5379_v42  ;;  %v5059_v18 = vld [vmem:[%s7324_s27 + $0x60] sm:$0xf] }
 0x17c   : > { %2007 = vmatmul.bf16.vlgmr.msrb.gmra.mxu3 %v8861_v5  ;;  %2921 = vmatmul.bf16.vlgmr.msrb.gmra.mxu1 %v7335_v21  ;;  %v7359_v1 = vadd.f32 %v1751_v11, %v1703_v57  ;;  %v8863_v11 = vld [vmem:[#allocation13_spill] sm:$0xff]  ;;  %v7401_v56 = vor.u32 %v5722_v24, %v5059_v18 }
 0x17d   : > { %v1763_v40 = vpop.f32.mrf.mxu2  ;;  %2963 = vmatpush.bf16.msra.mxu2 %v5380_v17 }
 0x17e   : > { %8862 = vst [vmem:[#allocation27_spill] sm:$0xff] %v7359_v1 }
 0x17f   : > { %v1812_v60 = vpop.f32.mrf.mxu3  ;;  %v1863_v54 = vpop.f32.mrf.mxu0 }
 0x180   : > { %v1813_v35 = vadd.f32 %v1812_v60, %v1763_v40  ;;  %v7403_v60 = vor.u32 %v5719_v59, %v5061_v61  ;;  %v5363_v59 = vld [vmem:[%s8772_s3 + $0x140] sm:$0xf]  ;;  %v5892_v61 = vld [vmem:[%s8772_s3 + $0x144] sm:$0xf0] }
 0x181   : > { %v1912_v3 = vpop.f32.mrf.mxu1 }
 0x182   : > { %v1862_v20 = vadd.f32 %v1861_v51, %v1813_v35  ;;  %v5444_v51 = vor.u32 %v5912_v33, %v5443_v41  ;;  %v5728_v41 = vld [vmem:[%s7324_s27 + $0xa4] sm:$0xf0]  ;;  %v5725_v33 = vld [vmem:[%s7324_s27 + $0x94] sm:$0xf] }
 0x184   : > { %v7363_v32 = vadd.f32 %v1910_v23, %v1862_v20  ;;  %3012 = vmatpush.bf16.msra.mxu3 %v5444_v51  ;;  %v5894_v20 = vld [vmem:[%s8772_s3 + $0x154] sm:$0xf0] }
 0x185   : > { %v1765_v9 = vpop.f32.mrf.mxu2 }
 0x187   : > { %v1814_v47 = vpop.f32.mrf.mxu3  ;;  %v1866_v44 = vpop.f32.mrf.mxu0 }
 0x188   : > { %v1815_v50 = vadd.f32 %v1814_v47, %v1765_v9  ;;  %v5922_v9 = vld [vmem:[%s8772_s3 + $0x234] sm:$0xf0]  ;;  %v5435_v47 = vld [vmem:[%s8772_s3 + $0x1d0] sm:$0xf] }
 0x189   : > { %v1915_v13 = vpop.f32.mrf.mxu1 }
 0x18a   : > { %v1864_v6 = vadd.f32 %v1863_v54, %v1815_v50  ;;  %1963 = vmatmul.bf16.gmra.mxu2 %v8863_v11  ;;  %2877 = vmatmul.bf16.gmra.mxu0 %v7367_v26 }
 0x18c   : > { %2012 = vmatmul.bf16.gmra.mxu3 %v8864_v12  ;;  %2926 = vmatmul.bf16.gmra.mxu1 %v7369_v39  ;;  %v7390_v48 = vadd.f32 %v1912_v3, %v1864_v6  ;;  %v5371_v3 = vld [vmem:[%s8772_s3 + $0x150] sm:$0xf] }
 0x18d   : > { %v1768_v19 = vpop.f32.mrf.mxu2  ;;  %v5372_v45 = vor.u32 %v5894_v20, %v5371_v3 }
 0x18f   : > { %v1817_v53 = vpop.f32.mrf.mxu3  ;;  %v1868_v31 = vpop.f32.mrf.mxu0  ;;  %2964 = vmatpush.bf16.msra.mxu2 %v5372_v45 }
 0x190   : > { %v1818_v23 = vadd.f32 %v1817_v53, %v1768_v19  ;;  %v5085_v19 = vld [vmem:[%s7324_s27 + $0xa8] sm:$0xf0] }
 0x191   : > { %v1917_v55 = vpop.f32.mrf.mxu1 }
 0x192   : > { %v1867_v57 = vadd.f32 %v1866_v44, %v1818_v23  ;;  %v5484_v44 = vor.u32 %v5922_v9, %v5483_v2  ;;  %v7435_v23 = vor.u32 %v5728_v41, %v5083_v63 }
 0x194   : > { %v7397_v5 = vadd.f32 %v1915_v13, %v1867_v57  ;;  %v5910_v13 = vld [vmem:[%s8772_s3 + $0x1d4] sm:$0xf0]  ;;  %3064 = vmatpush.bf16.msra.mxu0 %v5484_v44  ;;  %v7437_v57 = vor.u32 %v5725_v33, %v5085_v19 }
 0x195   : > { %v1770_v28 = vpop.f32.mrf.mxu2  ;;  %v5436_v42 = vor.u32 %v5910_v13, %v5435_v47 }
 0x197   : > { %v1819_v8 = vpop.f32.mrf.mxu3  ;;  %v1871_v52 = vpop.f32.mrf.mxu0  ;;  %3013 = vmatpush.bf16.msra.mxu3 %v5436_v42  ;;  %v5734_v42 = vld [vmem:[%s7324_s27 + $0xd4] sm:$0xf0] }
 0x198   : > { %v1820_v40 = vadd.f32 %v1819_v8, %v1770_v28  ;;  %v8867_v28 = vld [vmem:[#allocation17_spill] sm:$0xff]  ;;  %v5364_v8 = vor.u32 %v5892_v61, %v5363_v59  ;;  %v8870_v59 = vld [vmem:[#allocation20_spill] sm:$0xff] }
 0x199   : > { %v1920_v35 = vpop.f32.mrf.mxu1  ;;  %v5467_v61 = vld [vmem:[%s8772_s3 + $0x210] sm:$0xf] }
 0x19a   : > { %v1869_v54 = vadd.f32 %v1868_v31, %v1820_v40  ;;  %1968 = vmatmul.bf16.gmra.mxu2 %v8865_v27  ;;  %2882 = vmatmul.bf16.gmra.mxu0 %v7401_v56  ;;  %v8868_v40 = vld [vmem:[#allocation18_spill] sm:$0xff]  ;;  %v5908_v27 = vld [vmem:[%s8772_s3 + $0x1c4] sm:$0xf0] }
 0x19b   : > { %2965 = vmatpush.bf16.msra.mxu2 %v5364_v8  ;;  %v5419_v8 = vld [vmem:[%s8772_s3 + $0x1b0] sm:$0xf] }
 0x19c   : > { %2017 = vmatmul.bf16.gmra.mxu3 %v8866_v4  ;;  %2931 = vmatmul.bf16.gmra.mxu1 %v7403_v60  ;;  %v7424_v50 = vadd.f32 %v1917_v55, %v1869_v54  ;;  %v5427_v54 = vld [vmem:[%s8772_s3 + $0x1c0] sm:$0xf] }
 0x19d   : > { %v1773_v6 = vpop.f32.mrf.mxu2  ;;  %v5428_v4 = vor.u32 %v5908_v27, %v5427_v54 }
 0x19f   : > { %v1822_v15 = vpop.f32.mrf.mxu3  ;;  %v1873_v17 = vpop.f32.mrf.mxu0  ;;  %3014 = vmatpush.bf16.msra.mxu3 %v5428_v4 }
 0x1a0   : > { %v1823_v11 = vadd.f32 %v1822_v15, %v1773_v6  ;;  %v5107_v6 = vld [vmem:[%s7324_s27 + $0xc0] sm:$0xf] }
 0x1a1   : > { %v1922_v12 = vpop.f32.mrf.mxu1  ;;  %v7469_v63 = vor.u32 %v5734_v42, %v5107_v6  ;;  %v5946_v6 = vld [vmem:[%s8772_s3 + $0x2f4] sm:$0xf0] }
 0x1a2   : > { %v1872_v46 = vadd.f32 %v1871_v52, %v1823_v11  ;;  %v5475_v52 = vld [vmem:[%s8772_s3 + $0x220] sm:$0xf]  ;;  %v5731_v11 = vld [vmem:[%s7324_s27 + $0xc4] sm:$0xf] }
 0x1a4   : > { %v7431_v37 = vadd.f32 %v1920_v35, %v1872_v46  ;;  %v5920_v35 = vld [vmem:[%s8772_s3 + $0x224] sm:$0xf0] }
 0x1a5   : > { %v1775_v51 = vpop.f32.mrf.mxu2  ;;  %v5476_v20 = vor.u32 %v5920_v35, %v5475_v52  ;;  %v5906_v35 = vld [vmem:[%s8772_s3 + $0x1b4] sm:$0xf0] }
 0x1a7   : > { %v1824_v53 = vpop.f32.mrf.mxu3  ;;  %v1876_v55 = vpop.f32.mrf.mxu0  ;;  %3065 = vmatpush.bf16.msra.mxu0 %v5476_v20  ;;  %v5420_v20 = vor.u32 %v5906_v35, %v5419_v8  ;;  %v5888_v8 = vld [vmem:[%s8772_s3 + $0x124] sm:$0xf0] }
 0x1a8   : > { %v1825_v31 = vadd.f32 %v1824_v53, %v1775_v51 }
 0x1a9   : > { %v1925_v18 = vpop.f32.mrf.mxu1  ;;  %3015 = vmatpush.bf16.msra.mxu3 %v5420_v20  ;;  %v5459_v20 = vld [vmem:[%s8772_s3 + $0x200] sm:$0xf] }
 0x1aa   : > { %v1874_v24 = vadd.f32 %v1873_v17, %v1825_v31  ;;  %1973 = vmatmul.bf16.gmra.mxu2 %v8867_v28  ;;  %2887 = vmatmul.bf16.gmra.mxu0 %v7435_v23  ;;  %v5109_v17 = vld [vmem:[%s7324_s27 + $0xd8] sm:$0xf0]  ;;  %v5355_v31 = vld [vmem:[%s8772_s3 + $0x130] sm:$0xf]  ;;  %v5918_v28 = vld [vmem:[%s8772_s3 + $0x214] sm:$0xf0] }
 0x1ab   : > { %v7471_v19 = vor.u32 %v5731_v11, %v5109_v17  ;;  %v5468_v52 = vor.u32 %v5918_v28, %v5467_v61  ;;  %v5737_v11 = vld [vmem:[%s7324_s27 + $0xf4] sm:$0xf]  ;;  %v5133_v17 = vld [vmem:[%s7324_s27 + $0x108] sm:$0xf0]  ;;  %v5347_v28 = vld [vmem:[%s8772_s3 + $0x120] sm:$0xf] }
 0x1ac   : > { %2022 = vmatmul.bf16.gmra.mxu3 %v8868_v40  ;;  %2936 = vmatmul.bf16.gmra.mxu1 %v7437_v57  ;;  %v7458_v3 = vadd.f32 %v1922_v12, %v1874_v24  ;;  %v5348_v35 = vor.u32 %v5888_v8, %v5347_v28  ;;  %v5886_v28 = vld [vmem:[%s8772_s3 + $0x114] sm:$0xf0]  ;;  %v5403_v8 = vld [vmem:[%s8772_s3 + $0x190] sm:$0xf] }
 0x1ad   : > { %v1778_v45 = vpop.f32.mrf.mxu2  ;;  %3066 = vmatpush.bf16.msra.mxu0 %v5468_v52  ;;  %v8873_v52 = vld [vmem:[#allocation21_spill] sm:$0xff] }
 0x1af   : > { %v1827_v2 = vpop.f32.mrf.mxu3  ;;  %v1878_v47 = vpop.f32.mrf.mxu0 }
 0x1b0   : > { %v1828_v9 = vadd.f32 %v1827_v2, %v1778_v45 }
 0x1b1   : > { %v1927_v44 = vpop.f32.mrf.mxu1 }
 0x1b2   : > { %v1877_v13 = vadd.f32 %v1876_v55, %v1828_v9  ;;  %v5890_v55 = vld [vmem:[%s8772_s3 + $0x134] sm:$0xf0] }
 0x1b3   : > { %v5356_v24 = vor.u32 %v5890_v55, %v5355_v31  ;;  %v7511_v55 = vor.u32 %v5737_v11, %v5133_v17 }
 0x1b4   : > { %v7465_v15 = vadd.f32 %v1925_v18, %v1877_v13  ;;  %v8869_v18 = vld [vmem:[#allocation19_spill] sm:$0xff]  ;;  %v5579_v13 = vld [vmem:[%s8772_s3 + $0x2f0] sm:$0xf] }
 0x1b5   : > { %v1780_v12 = vpop.f32.mrf.mxu2  ;;  %2966 = vmatpush.bf16.msra.mxu2 %v5356_v24  ;;  %8872 = vst [vmem:[#allocation12_spill] sm:$0xff] %v7511_v55 }
 0x1b7   : > { %v1829_v46 = vpop.f32.mrf.mxu3  ;;  %v1881_v33 = vpop.f32.mrf.mxu0 }
 0x1b8   : > { %v1830_v41 = vadd.f32 %v1829_v46, %v1780_v12  ;;  %v5580_v12 = vor.u32 %v5946_v6, %v5579_v13  ;;  %v5942_v13 = vld [vmem:[%s8772_s3 + $0x2d4] sm:$0xf0] }
 0x1b9   : > { %v1930_v51 = vpop.f32.mrf.mxu1  ;;  %2967 = vmatpush.bf16.msra.mxu2 %v5348_v35 }
 0x1ba   : > { %v1879_v53 = vadd.f32 %v1878_v47, %v1830_v41  ;;  %1978 = vmatmul.bf16.gmra.mxu2 %v8869_v18  ;;  %2892 = vmatmul.bf16.gmra.mxu0 %v7469_v63  ;;  %v5131_v47 = vld [vmem:[%s7324_s27 + $0xf0] sm:$0xf]  ;;  %v5571_v18 = vld [vmem:[%s8772_s3 + $0x2e0] sm:$0xf] }
 0x1bb   : > { %3109 = vmatpush.bf16.msra.mxu1 %v5580_v12 }
 0x1bc   : > { %2027 = vmatmul.bf16.gmra.mxu3 %v8870_v59  ;;  %2941 = vmatmul.bf16.gmra.mxu1 %v7471_v19  ;;  %v7492_v40 = vadd.f32 %v1927_v44, %v1879_v53  ;;  %v5740_v44 = vld [vmem:[%s7324_s27 + $0x104] sm:$0xf0] }
 0x1bd   : > { %v1783_v54 = vpop.f32.mrf.mxu2  ;;  %v7509_v53 = vor.u32 %v5740_v44, %v5131_v47  ;;  %v5904_v47 = vld [vmem:[%s8772_s3 + $0x1a4] sm:$0xf0]  ;;  %v5563_v44 = vld [vmem:[%s8772_s3 + $0x2d0] sm:$0xf] }
 0x1bf   : > { %v1832_v27 = vpop.f32.mrf.mxu3  ;;  %v1883_v4 = vpop.f32.mrf.mxu0  ;;  %8871 = vst [vmem:[#allocation11_spill] sm:$0xff] %v7509_v53 }
 0x1c0   : > { %v1833_v45 = vadd.f32 %v1832_v27, %v1783_v54  ;;  %v8874_v54 = vld [vmem:[#allocation22_spill] sm:$0xff]  ;;  %v5916_v27 = vld [vmem:[%s8772_s3 + $0x204] sm:$0xf0] }
 0x1c1   : > { %v1932_v2 = vpop.f32.mrf.mxu1 }
 0x1c2   : > { %v1882_v9 = vadd.f32 %v1881_v33, %v1833_v45  ;;  %v5411_v45 = vld [vmem:[%s8772_s3 + $0x1a0] sm:$0xf] }
 0x1c3   : > { %v5412_v11 = vor.u32 %v5904_v47, %v5411_v45  ;;  %v5938_v45 = vld [vmem:[%s8772_s3 + $0x2b4] sm:$0xf0]  ;;  %v5743_v47 = vld [vmem:[%s7324_s27 + $0x124] sm:$0xf] }
 0x1c4   : > { %v7505_v42 = vadd.f32 %v1930_v51, %v1882_v9  ;;  %v5944_v51 = vld [vmem:[%s8772_s3 + $0x2e4] sm:$0xf0]  ;;  %v5460_v9 = vor.u32 %v5916_v27, %v5459_v20  ;;  %v5746_v20 = vld [vmem:[%s7324_s27 + $0x134] sm:$0xf0]  ;;  %v5547_v27 = vld [vmem:[%s8772_s3 + $0x2b0] sm:$0xf] }
 0x1c5   : > { %v1785_v46 = vpop.f32.mrf.mxu2  ;;  %v5572_v59 = vor.u32 %v5944_v51, %v5571_v18  ;;  %3016 = vmatpush.bf16.msra.mxu3 %v5412_v11  ;;  %v5331_v11 = vld [vmem:[%s8772_s3 + $0x100] sm:$0xf] }
 0x1c6   : > { %3067 = vmatpush.bf16.msra.mxu0 %v5460_v9 }
 0x1c7   : > { %v1834_v41 = vpop.f32.mrf.mxu3  ;;  %v1886_v31 = vpop.f32.mrf.mxu0  ;;  %3110 = vmatpush.bf16.msra.mxu1 %v5572_v59 }
 0x1c8   : > { %v1835_v33 = vadd.f32 %v1834_v41, %v1785_v46  ;;  %v5555_v41 = vld [vmem:[%s8772_s3 + $0x2c0] sm:$0xf] }
 0x1c9   : > { %v1935_v24 = vpop.f32.mrf.mxu1 }
 0x1ca   : > { %v1884_v61 = vadd.f32 %v1883_v4, %v1835_v33  ;;  %1983 = vmatmul.bf16.gmra.mxu2 %v8873_v52  ;;  %2897 = vmatmul.bf16.gmra.mxu0 %v7509_v53  ;;  %v5940_v33 = vld [vmem:[%s8772_s3 + $0x2c4] sm:$0xf0]  ;;  %v5155_v52 = vld [vmem:[%s7324_s27 + $0x120] sm:$0xf] }
 0x1cb   : > { %v5556_v51 = vor.u32 %v5940_v33, %v5555_v41  ;;  %v5900_v33 = vld [vmem:[%s8772_s3 + $0x184] sm:$0xf0] }
 0x1cc   : > { %2032 = vmatmul.bf16.gmra.mxu3 %v8874_v54  ;;  %2946 = vmatmul.bf16.gmra.mxu1 %v7511_v55  ;;  %v7538_v4 = vadd.f32 %v1932_v2, %v1884_v61  ;;  %v5564_v2 = vor.u32 %v5942_v13, %v5563_v44  ;;  %v5339_v61 = vld [vmem:[%s8772_s3 + $0x110] sm:$0xf]  ;;  %v5902_v54 = vld [vmem:[%s8772_s3 + $0x194] sm:$0xf0]  ;;  %v5157_v44 = vld [vmem:[%s7324_s27 + $0x138] sm:$0xf0]  ;;  %v5548_v13 = vor.u32 %v5938_v45, %v5547_v27 }
 0x1cd   : > { %v1788_v6 = vpop.f32.mrf.mxu2  ;;  %v5340_v35 = vor.u32 %v5886_v28, %v5339_v61  ;;  %v7593_v61 = vor.u32 %v5743_v47, %v5157_v44  ;;  %v8878_v27 = vld [vmem:[#allocation24_spill] sm:$0xff]  ;;  %v5897_v45 = vld [vmem:[%s8772_s3 + $0x174] sm:$0xf]  ;;  %v5389_v47 = vld [vmem:[%s8772_s3 + $0x178] sm:$0xf0] }
 0x1ce   : > { %3111 = vmatpush.bf16.msra.mxu1 %v5564_v2  ;;  %v5884_v2 = vld [vmem:[%s8772_s3 + $0x104] sm:$0xf0] }
 0x1cf   : > { %v1837_v17 = vpop.f32.mrf.mxu3  ;;  %v1888_v46 = vpop.f32.mrf.mxu0  ;;  %2968 = vmatpush.bf16.msra.mxu2 %v5340_v35  ;;  %v5332_v41 = vor.u32 %v5884_v2, %v5331_v11  ;;  %8876 = vst [vmem:[#allocation14_spill] sm:$0xff] %v7593_v61  ;;  %v5936_v35 = vld [vmem:[%s8772_s3 + $0x2a4] sm:$0xf0] }
 0x1d0   : > { %v1838_v12 = vadd.f32 %v1837_v17, %v1788_v6 }
 0x1d1   : > { %v1937_v18 = vpop.f32.mrf.mxu1 }
 0x1d2   : > { %v1887_v59 = vadd.f32 %v1886_v31, %v1838_v12  ;;  %v5404_v31 = vor.u32 %v5902_v54, %v5403_v8  ;;  %3112 = vmatpush.bf16.msra.mxu1 %v5556_v51  ;;  %v7588_v12 = vor.u32 %v5746_v20, %v5155_v52  ;;  %v5539_v8 = vld [vmem:[%s8772_s3 + $0x2a0] sm:$0xf] }
 0x1d3   : > { %2969 = vmatpush.bf16.msra.mxu2 %v5332_v41  ;;  %v5540_v54 = vor.u32 %v5936_v35, %v5539_v8  ;;  %v5179_v35 = vld [vmem:[%s7324_s27 + $0x150] sm:$0xf] }
 0x1d4   : > { %v7575_v9 = vadd.f32 %v1935_v24, %v1887_v59  ;;  %3017 = vmatpush.bf16.msra.mxu3 %v5404_v31  ;;  %v5395_v24 = vld [vmem:[%s8772_s3 + $0x180] sm:$0xf]  ;;  %8875 = vst [vmem:[#allocation13_spill] sm:$0xff] %v7588_v12 }
 0x1d5   : > { %v1790_v6 = vpop.f32.mrf.mxu2  ;;  %v5396_v28 = vor.u32 %v5900_v33, %v5395_v24  ;;  %v8877_v31 = vld [vmem:[#allocation23_spill] sm:$0xff] }
 0x1d6   : > { %3113 = vmatpush.bf16.msra.mxu1 %v5548_v13  ;;  %v5392_v13 = vor.u32 %v5897_v45, %v5389_v47  ;;  %v5932_v33 = vld [vmem:[%s8772_s3 + $0x284] sm:$0xf0] }
 0x1d7   : > { %v1839_v17 = vpop.f32.mrf.mxu3  ;;  %v1891_v59 = vpop.f32.mrf.mxu0 }
 0x1d8   : > { %v1840_v51 = vadd.f32 %v1839_v17, %v1790_v6  ;;  %3018 = vmatpush.bf16.msra.mxu3 %v5396_v28  ;;  %v5934_v6 = vld [vmem:[%s8772_s3 + $0x294] sm:$0xf0]  ;;  %3256 = vmatpush.bf16.msrb.mxu0 %v5392_v13 }
 0x1d9   : > { %v1940_v52 = vpop.f32.mrf.mxu1 }
 0x1da   : > { %v1889_v20 = vadd.f32 %v1888_v46, %v1840_v51  ;;  %1988 = vmatmul.bf16.gmra.mxu2 %v8877_v31  ;;  %2902 = vmatmul.bf16.gmra.mxu0 %v7588_v12  ;;  %v5531_v46 = vld [vmem:[%s8772_s3 + $0x290] sm:$0xf]  ;;  %v5749_v31 = vld [vmem:[%s7324_s27 + $0x154] sm:$0xf]  ;;  %v5727_v12 = vld [vmem:[%s7324_s27 + $0xa4] sm:$0xf] }
 0x1db   : > { %3114 = vmatpush.bf16.msra.mxu1 %v5540_v54  ;;  %v5532_v2 = vor.u32 %v5934_v6, %v5531_v46  ;;  %v5752_v54 = vld [vmem:[%s7324_s27 + $0x164] sm:$0xf0] }
 0x1dc   : > { %2037 = vmatmul.bf16.gmra.mxu3 %v8878_v27  ;;  %2951 = vmatmul.bf16.gmra.mxu1 %v7593_v61  ;;  %v7614_v44 = vadd.f32 %v1937_v18, %v1889_v20  ;;  %v5523_v18 = vld [vmem:[%s8772_s3 + $0x280] sm:$0xf]  ;;  %v5181_v27 = vld [vmem:[%s7324_s27 + $0x168] sm:$0xf0]  ;;  %v7631_v46 = vor.u32 %v5752_v54, %v5179_v35 }
 0x1dd   : > { %v1793_v11 = vpop.f32.mrf.mxu2  ;;  %v5524_v28 = vor.u32 %v5932_v33, %v5523_v18 }
 0x1de   : > { %8879 = vst [vmem:[#allocation15_spill] sm:$0xff] %v7631_v46 }
 0x1df   : > { %v1842_v24 = vpop.f32.mrf.mxu3  ;;  %v1893_v41 = vpop.f32.mrf.mxu0  ;;  %3115 = vmatpush.bf16.msra.mxu1 %v5532_v2  ;;  %v8881_v2 = vld [vmem:[#allocation25_spill] sm:$0xff] }
 0x1e0   : > { %v1843_v17 = vadd.f32 %v1842_v24, %v1793_v11  ;;  %v7633_v11 = vor.u32 %v5749_v31, %v5181_v27  ;;  %v5019_v27 = vld [vmem:[%s7324_s27 + $0x8] sm:$0xf] }
 0x1e1   : > { %v1942_v51 = vpop.f32.mrf.mxu1 }
 0x1e2   : > { %v1892_v8 = vadd.f32 %v1891_v59, %v1843_v17  ;;  %8880 = vst [vmem:[#allocation16_spill] sm:$0xff] %v7633_v11  ;;  %v8882_v59 = vld [vmem:[#allocation26_spill] sm:$0xff]  ;;  %v5381_v17 = vld [vmem:[%s8772_s3 + $0x168] sm:$0xf0] }
 0x1e3   : > { %3116 = vmatpush.bf16.msra.mxu1 %v5524_v28 }
 0x1e4   : > { %v7627_v20 = vadd.f32 %v1940_v52, %v1892_v8  ;;  %v5895_v52 = vld [vmem:[%s8772_s3 + $0x164] sm:$0xf] }
 0x1e5   : > { %v1795_v45 = vpop.f32.mrf.mxu2  ;;  %v5384_v18 = vor.u32 %v5895_v52, %v5381_v17 }
 0x1e7   : > { %v1844_v47 = vpop.f32.mrf.mxu3  ;;  %v1896_v6 = vpop.f32.mrf.mxu0  ;;  %3257 = vmatpush.bf16.msrb.mxu0 %v5384_v18 }
 0x1e8   : > { %v1845_v13 = vadd.f32 %v1844_v47, %v1795_v45  ;;  %v5711_v45 = vld [vmem:[%s7324_s27 + $0x1c] sm:$0xf0]  ;;  %v5708_v47 = vld [vmem:[%s7324_s27 + $0xc] sm:$0xf] }
 0x1e9   : > { %v1945_v24 = vpop.f32.mrf.mxu1  ;;  %v7657_v17 = vor.u32 %v5711_v45, %v5019_v27  ;;  %v5881_v27 = vld [vmem:[%s8772_s3 + $0xf4] sm:$0xf] }
 0x1ea   : > { %v1894_v1 = vadd.f32 %v1893_v41, %v1845_v13  ;;  %1993 = vmatmul.bf16.gmra.mxu2 %v8881_v2  ;;  %2907 = vmatmul.bf16.gmra.mxu0 %v7631_v46  ;;  %v5027_v13 = vld [vmem:[%s7324_s27 + $0x10] sm:$0xf]  ;;  %v5712_v2 = vld [vmem:[%s7324_s27 + $0x24] sm:$0xf0] }
 0x1ec   : > { %2042 = vmatmul.bf16.gmra.mxu3 %v8882_v59  ;;  %2956 = vmatmul.bf16.gmra.mxu1 %v7633_v11  ;;  %v7645_v41 = vadd.f32 %v1942_v51, %v1894_v1  ;;  %v5709_v1 = vld [vmem:[%s7324_s27 + $0x14] sm:$0xf]  ;;  %v5029_v51 = vld [vmem:[%s7324_s27 + $0x28] sm:$0xf0]  ;;  %v7659_v11 = vor.u32 %v5712_v2, %v5027_v13  ;;  %v5325_v13 = vld [vmem:[%s8772_s3 + $0xf8] sm:$0xf0] }
 0x1ed   : > { %v1798_v33 = vpop.f32.mrf.mxu2 }
 0x1ee   : > { %8883 = vst [vmem:[#allocation17_spill] sm:$0xff] %v7659_v11 }
 0x1ef   : > { %v1847_v28 = vpop.f32.mrf.mxu3  ;;  %v1898_v35 = vpop.f32.mrf.mxu0 }
 0x1f0   : > { %v1848_v8 = vadd.f32 %v1847_v28, %v1798_v33  ;;  %v7661_v28 = vor.u32 %v5708_v47, %v5021_v14 }
 0x1f1   : > { %v1947_v54 = vpop.f32.mrf.mxu1 }
 0x1f2   : > { %v1897_v31 = vadd.f32 %v1896_v6, %v1848_v8  ;;  %v7663_v6 = vor.u32 %v5709_v1, %v5029_v51  ;;  %v5328_v1 = vor.u32 %v5881_v27, %v5325_v13  ;;  %v5053_v27 = vld [vmem:[%s7324_s27 + $0x58] sm:$0xf0] }
 0x1f4   : > { %v7652_v59 = vadd.f32 %v1945_v24, %v1897_v31  ;;  %8884 = vst [vmem:[#allocation18_spill] sm:$0xff] %v7663_v6  ;;  %v5865_v24 = vld [vmem:[%s8772_s3 + $0x74] sm:$0xf]  ;;  %v5373_v31 = vld [vmem:[%s8772_s3 + $0x158] sm:$0xf0]  ;;  %3207 = vmatpush.bf16.msrb.mxu3 %v5328_v1 }
 0x1f5   : > { %v1800_v38 = vpop.f32.mrf.mxu2 }
 0x1f7   : > { %v1849_v52 = vpop.f32.mrf.mxu3  ;;  %v2873_v33 = vpop.f32.mrf.mxu0 }
 0x1f8   : > { %v1850_v18 = vadd.f32 %v1849_v52, %v1800_v38  ;;  %v5261_v38 = vld [vmem:[%s8772_s3 + $0x78] sm:$0xf0] }
 0x1f9   : > { %v2922_v8 = vpop.f32.mrf.mxu1  ;;  %v5264_v14 = vor.u32 %v5865_v24, %v5261_v38  ;;  %v5717_v24 = vld [vmem:[%s7324_s27 + $0x4c] sm:$0xf0]  ;;  %v5714_v38 = vld [vmem:[%s7324_s27 + $0x3c] sm:$0xf] }
 0x1fa   : > { %v1899_v46 = vadd.f32 %v1898_v35, %v1850_v18  ;;  %v7665_v0 = vadd.f32 %v2922_v8, %v2873_v33  ;;  %2970 = vmatmul.bf16.vlgmr.msra.gmra.mxu2 %v7657_v17  ;;  %3068 = vmatmul.bf16.vlgmr.msra.gmra.mxu0 %v7659_v11  ;;  %v5893_v35 = vld [vmem:[%s8772_s3 + $0x154] sm:$0xf]  ;;  %v5043_v8 = vld [vmem:[%s7324_s27 + $0x38] sm:$0xf] }
 0x1fb   : > { %v5376_v47 = vor.u32 %v5893_v35, %v5373_v31  ;;  %3158 = vmatpush.bf16.msrb.mxu2 %v5264_v14  ;;  %v5051_v35 = vld [vmem:[%s7324_s27 + $0x40] sm:$0xf]  ;;  %v5718_v31 = vld [vmem:[%s7324_s27 + $0x54] sm:$0xf0]  ;;  %v5045_v14 = vld [vmem:[%s7324_s27 + $0x50] sm:$0xf0] }
 0x1fc   : > { %3019 = vmatmul.bf16.vlgmr.msra.gmra.mxu3 %v7661_v28  ;;  %3117 = vmatmul.bf16.vlgmr.msra.gmra.mxu1 %v7663_v6  ;;  %v7686_v45 = vadd.f32 %v1947_v54, %v1899_v46  ;;  %v5715_v6 = vld [vmem:[%s7324_s27 + $0x44] sm:$0xf]  ;;  %v7707_v1 = vor.u32 %v5718_v31, %v5051_v35  ;;  %v5317_v31 = vld [vmem:[%s8772_s3 + $0xe8] sm:$0xf0] }
 0x1fd   : > { %v1959_v2 = vpop.f32.mrf.mxu2  ;;  %3258 = vmatpush.bf16.msrb.mxu0 %v5376_v47  ;;  %v7705_v47 = vor.u32 %v5717_v24, %v5043_v8  ;;  %v5253_v8 = vld [vmem:[%s8772_s3 + $0x68] sm:$0xf0] }
 0x1fe   : > { %v1960_v51 = vadd.f32 %v1959_v2, %v7363_v32  ;;  %8886 = vst [vmem:[#allocation20_spill] sm:$0xff] %v7707_v1  ;;  %v5365_v24 = vld [vmem:[%s8772_s3 + $0x148] sm:$0xf0] }
 0x1ff   : > { %v2008_v52 = vpop.f32.mrf.mxu3  ;;  %v2875_v46 = vpop.f32.mrf.mxu0 }
 0x200   : > { %v7692_v54 = vadd.f32 %v2008_v52, %v1960_v51  ;;  %v7709_v52 = vor.u32 %v5714_v38, %v5045_v14  ;;  %v5879_v38 = vld [vmem:[%s8772_s3 + $0xe4] sm:$0xf] }
 0x201   : > { %v2924_v18 = vpop.f32.mrf.mxu1 }
 0x202   : > { %8885 = vst [vmem:[#allocation19_spill] sm:$0xff] %v7692_v54  ;;  %v7694_v33 = vadd.f32 %v2924_v18, %v2875_v46  ;;  %v7711_v46 = vor.u32 %v5715_v6, %v5053_v27  ;;  %v5320_v27 = vor.u32 %v5879_v38, %v5317_v31  ;;  %v5077_v38 = vld [vmem:[%s7324_s27 + $0x88] sm:$0xf0] }
 0x204   : > { %8887 = vst [vmem:[#allocation21_spill] sm:$0xff] %v7711_v46  ;;  %3208 = vmatpush.bf16.msrb.mxu3 %v5320_v27 }
 0x205   : > { %v1961_v13 = vpop.f32.mrf.mxu2 }
 0x206   : > { %v1962_v32 = vadd.f32 %v1961_v13, %v7390_v48  ;;  %v5863_v48 = vld [vmem:[%s8772_s3 + $0x64] sm:$0xf] }
 0x207   : > { %v2010_v2 = vpop.f32.mrf.mxu3  ;;  %v2878_v51 = vpop.f32.mrf.mxu0  ;;  %v5256_v6 = vor.u32 %v5863_v48, %v5253_v8 }
 0x208   : > { %v7713_v18 = vadd.f32 %v2010_v2, %v1962_v32 }
 0x209   : > { %v2927_v54 = vpop.f32.mrf.mxu1  ;;  %3159 = vmatpush.bf16.msrb.mxu2 %v5256_v6  ;;  %v5069_v6 = vld [vmem:[%s7324_s27 + $0x80] sm:$0xf0] }
 0x20a   : > { %8888 = vst [vmem:[#allocation22_spill] sm:$0xff] %v7713_v18  ;;  %v7715_v11 = vadd.f32 %v2927_v54, %v2878_v51  ;;  %2975 = vmatmul.bf16.gmra.mxu2 %v7705_v47  ;;  %3073 = vmatmul.bf16.gmra.mxu0 %v7707_v1  ;;  %v5891_v54 = vld [vmem:[%s8772_s3 + $0x144] sm:$0xf]  ;;  %v5720_v18 = vld [vmem:[%s7324_s27 + $0x6c] sm:$0xf] }
 0x20b   : > { %v5368_v35 = vor.u32 %v5891_v54, %v5365_v24  ;;  %v5067_v54 = vld [vmem:[%s7324_s27 + $0x68] sm:$0xf]  ;;  %v5723_v24 = vld [vmem:[%s7324_s27 + $0x7c] sm:$0xf0] }
 0x20c   : > { %3024 = vmatmul.bf16.gmra.mxu3 %v7709_v52  ;;  %3122 = vmatmul.bf16.gmra.mxu1 %v7711_v46  ;;  %v5075_v46 = vld [vmem:[%s7324_s27 + $0x70] sm:$0xf]  ;;  %v5724_v1 = vld [vmem:[%s7324_s27 + $0x84] sm:$0xf0] }
 0x20d   : > { %v1964_v14 = vpop.f32.mrf.mxu2  ;;  %3259 = vmatpush.bf16.msrb.mxu0 %v5368_v35  ;;  %v7753_v35 = vor.u32 %v5723_v24, %v5067_v54  ;;  %v7755_v27 = vor.u32 %v5724_v1, %v5075_v46  ;;  %v5245_v1 = vld [vmem:[%s8772_s3 + $0x58] sm:$0xf0]  ;;  %v5889_v46 = vld [vmem:[%s8772_s3 + $0x134] sm:$0xf] }
 0x20e   : > { %v1965_v13 = vadd.f32 %v1964_v14, %v7397_v5  ;;  %v5309_v24 = vld [vmem:[%s8772_s3 + $0xd8] sm:$0xf0] }
 0x20f   : > { %v2013_v32 = vpop.f32.mrf.mxu3  ;;  %v2880_v2 = vpop.f32.mrf.mxu0  ;;  %8890 = vst [vmem:[#allocation24_spill] sm:$0xff] %v7755_v27 }
 0x210   : > { %v7740_v51 = vadd.f32 %v2013_v32, %v1965_v13  ;;  %v7757_v32 = vor.u32 %v5720_v18, %v5069_v6  ;;  %v5357_v18 = vld [vmem:[%s8772_s3 + $0x138] sm:$0xf0] }
 0x211   : > { %v2929_v48 = vpop.f32.mrf.mxu1  ;;  %v5360_v54 = vor.u32 %v5889_v46, %v5357_v18  ;;  %v5091_v46 = vld [vmem:[%s7324_s27 + $0x98] sm:$0xf]  ;;  %v5729_v18 = vld [vmem:[%s7324_s27 + $0xac] sm:$0xf0] }
 0x212   : > { %8889 = vst [vmem:[#allocation23_spill] sm:$0xff] %v7740_v51  ;;  %v7742_v8 = vadd.f32 %v2929_v48, %v2880_v2  ;;  %v7759_v2 = vor.u32 %v5721_v29, %v5077_v38 }
 0x213   : > { %3260 = vmatpush.bf16.msrb.mxu0 %v5360_v54  ;;  %v7801_v54 = vor.u32 %v5729_v18, %v5091_v46  ;;  %v5301_v18 = vld [vmem:[%s8772_s3 + $0xc8] sm:$0xf0] }
 0x214   : > { %8891 = vst [vmem:[#allocation25_spill] sm:$0xff] %v7759_v2 }
 0x215   : > { %v1966_v31 = vpop.f32.mrf.mxu2 }
 0x216   : > { %v1967_v5 = vadd.f32 %v1966_v31, %v7424_v50  ;;  %v5861_v50 = vld [vmem:[%s8772_s3 + $0x54] sm:$0xf] }
 0x217   : > { %v2015_v14 = vpop.f32.mrf.mxu3  ;;  %v2883_v13 = vpop.f32.mrf.mxu0  ;;  %v5248_v29 = vor.u32 %v5861_v50, %v5245_v1 }
 0x218   : > { %v7761_v48 = vadd.f32 %v2015_v14, %v1967_v5 }
 0x219   : > { %v2932_v51 = vpop.f32.mrf.mxu1  ;;  %3160 = vmatpush.bf16.msrb.mxu2 %v5248_v29  ;;  %v5093_v29 = vld [vmem:[%s7324_s27 + $0xb0] sm:$0xf0] }
 0x21a   : > { %8892 = vst [vmem:[#allocation26_spill] sm:$0xff] %v7761_v48  ;;  %v7763_v61 = vadd.f32 %v2932_v51, %v2883_v13  ;;  %2980 = vmatmul.bf16.gmra.mxu2 %v7753_v35  ;;  %3078 = vmatmul.bf16.gmra.mxu0 %v7755_v27  ;;  %v5877_v51 = vld [vmem:[%s8772_s3 + $0xd4] sm:$0xf]  ;;  %v5726_v48 = vld [vmem:[%s7324_s27 + $0x9c] sm:$0xf] }
 0x21b   : > { %v5312_v38 = vor.u32 %v5877_v51, %v5309_v24  ;;  %v5730_v27 = vld [vmem:[%s7324_s27 + $0xb4] sm:$0xf0]  ;;  %v5101_v51 = vld [vmem:[%s7324_s27 + $0xb8] sm:$0xf0] }
 0x21c   : > { %3029 = vmatmul.bf16.gmra.mxu3 %v7757_v32  ;;  %3127 = vmatmul.bf16.gmra.mxu1 %v7759_v2  ;;  %v5099_v2 = vld [vmem:[%s7324_s27 + $0xa0] sm:$0xf] }
 0x21d   : > { %v1969_v6 = vpop.f32.mrf.mxu2  ;;  %3209 = vmatpush.bf16.msrb.mxu3 %v5312_v38  ;;  %v7803_v38 = vor.u32 %v5730_v27, %v5099_v2  ;;  %v5237_v27 = vld [vmem:[%s8772_s3 + $0x48] sm:$0xf0]  ;;  %v5887_v2 = vld [vmem:[%s8772_s3 + $0x124] sm:$0xf] }
 0x21e   : > { %v1970_v31 = vadd.f32 %v1969_v6, %v7431_v37 }
 0x21f   : > { %v2018_v5 = vpop.f32.mrf.mxu3  ;;  %v2885_v14 = vpop.f32.mrf.mxu0  ;;  %8894 = vst [vmem:[#allocation36_spill] sm:$0xff] %v7803_v38 }
 0x220   : > { %v7788_v13 = vadd.f32 %v2018_v5, %v1970_v31  ;;  %v7805_v5 = vor.u32 %v5726_v48, %v5093_v29  ;;  %v5349_v48 = vld [vmem:[%s8772_s3 + $0x128] sm:$0xf0] }
 0x221   : > { %v2934_v50 = vpop.f32.mrf.mxu1  ;;  %v5352_v46 = vor.u32 %v5887_v2, %v5349_v48  ;;  %v5115_v2 = vld [vmem:[%s7324_s27 + $0xc8] sm:$0xf]  ;;  %v5735_v48 = vld [vmem:[%s7324_s27 + $0xdc] sm:$0xf0] }
 0x222   : > { %8893 = vst [vmem:[#allocation35_spill] sm:$0xff] %v7788_v13  ;;  %v7790_v1 = vadd.f32 %v2934_v50, %v2885_v14  ;;  %v7807_v14 = vor.u32 %v5727_v12, %v5101_v51 }
 0x223   : > { %3261 = vmatpush.bf16.msrb.mxu0 %v5352_v46  ;;  %v7849_v46 = vor.u32 %v5735_v48, %v5115_v2  ;;  %v5293_v48 = vld [vmem:[%s8772_s3 + $0xb8] sm:$0xf0] }
 0x224   : > { %8895 = vst [vmem:[#allocation37_spill] sm:$0xff] %v7807_v14 }
 0x225   : > { %v1971_v24 = vpop.f32.mrf.mxu2 }
 0x226   : > { %v1972_v37 = vadd.f32 %v1971_v24, %v7458_v3  ;;  %v5859_v3 = vld [vmem:[%s8772_s3 + $0x44] sm:$0xf] }
 0x227   : > { %v2020_v6 = vpop.f32.mrf.mxu3  ;;  %v2888_v31 = vpop.f32.mrf.mxu0  ;;  %v5240_v12 = vor.u32 %v5859_v3, %v5237_v27 }
 0x228   : > { %v7809_v50 = vadd.f32 %v2020_v6, %v1972_v37 }
 0x229   : > { %v2937_v13 = vpop.f32.mrf.mxu1  ;;  %3161 = vmatpush.bf16.msrb.mxu2 %v5240_v12  ;;  %v5117_v12 = vld [vmem:[%s7324_s27 + $0xe0] sm:$0xf0] }
 0x22a   : > { %8896 = vst [vmem:[#allocation38_spill] sm:$0xff] %v7809_v50  ;;  %v7811_v16 = vadd.f32 %v2937_v13, %v2888_v31  ;;  %2985 = vmatmul.bf16.gmra.mxu2 %v7801_v54  ;;  %3083 = vmatmul.bf16.gmra.mxu0 %v7803_v38  ;;  %v5875_v13 = vld [vmem:[%s8772_s3 + $0xc4] sm:$0xf]  ;;  %v5732_v50 = vld [vmem:[%s7324_s27 + $0xcc] sm:$0xf] }
 0x22b   : > { %v5304_v51 = vor.u32 %v5875_v13, %v5301_v18  ;;  %v5736_v38 = vld [vmem:[%s7324_s27 + $0xe4] sm:$0xf0]  ;;  %v5125_v13 = vld [vmem:[%s7324_s27 + $0xe8] sm:$0xf0] }
 0x22c   : > { %3034 = vmatmul.bf16.gmra.mxu3 %v7805_v5  ;;  %3132 = vmatmul.bf16.gmra.mxu1 %v7807_v14  ;;  %v5123_v14 = vld [vmem:[%s7324_s27 + $0xd0] sm:$0xf] }
 0x22d   : > { %v1974_v29 = vpop.f32.mrf.mxu2  ;;  %3210 = vmatpush.bf16.msrb.mxu3 %v5304_v51  ;;  %v7851_v51 = vor.u32 %v5736_v38, %v5123_v14  ;;  %v5229_v38 = vld [vmem:[%s8772_s3 + $0x38] sm:$0xf0]  ;;  %v5885_v14 = vld [vmem:[%s8772_s3 + $0x114] sm:$0xf] }
 0x22e   : > { %v1975_v24 = vadd.f32 %v1974_v29, %v7465_v15 }
 0x22f   : > { %v2023_v37 = vpop.f32.mrf.mxu3  ;;  %v2890_v6 = vpop.f32.mrf.mxu0  ;;  %8898 = vst [vmem:[#allocation40_spill] sm:$0xff] %v7851_v51 }
 0x230   : > { %v7836_v31 = vadd.f32 %v2023_v37, %v1975_v24  ;;  %v7853_v37 = vor.u32 %v5732_v50, %v5117_v12  ;;  %v5341_v50 = vld [vmem:[%s8772_s3 + $0x118] sm:$0xf0] }
 0x231   : > { %v2939_v3 = vpop.f32.mrf.mxu1  ;;  %v5344_v2 = vor.u32 %v5885_v14, %v5341_v50  ;;  %v5139_v14 = vld [vmem:[%s7324_s27 + $0xf8] sm:$0xf]  ;;  %v5741_v50 = vld [vmem:[%s7324_s27 + $0x10c] sm:$0xf0] }
 0x232   : > { %8897 = vst [vmem:[#allocation39_spill] sm:$0xff] %v7836_v31  ;;  %v7838_v27 = vadd.f32 %v2939_v3, %v2890_v6  ;;  %v7855_v6 = vor.u32 %v5733_v7, %v5125_v13 }
 0x233   : > { %3262 = vmatpush.bf16.msrb.mxu0 %v5344_v2  ;;  %v5141_v2 = vld [vmem:[%s7324_s27 + $0x110] sm:$0xf0] }
 0x234   : > { %8899 = vst [vmem:[#allocation41_spill] sm:$0xff] %v7855_v6 }
 0x235   : > { %v1976_v18 = vpop.f32.mrf.mxu2 }
 0x236   : > { %v1977_v15 = vadd.f32 %v1976_v18, %v7492_v40  ;;  %v5857_v40 = vld [vmem:[%s8772_s3 + $0x34] sm:$0xf] }
 0x237   : > { %v2025_v29 = vpop.f32.mrf.mxu3  ;;  %v2893_v24 = vpop.f32.mrf.mxu0  ;;  %v5232_v7 = vor.u32 %v5857_v40, %v5229_v38 }
 0x238   : > { %v7857_v3 = vadd.f32 %v2025_v29, %v1977_v15 }
 0x239   : > { %v2942_v31 = vpop.f32.mrf.mxu1  ;;  %3162 = vmatpush.bf16.msrb.mxu2 %v5232_v7  ;;  %v5742_v7 = vld [vmem:[%s7324_s27 + $0x114] sm:$0xf0] }
 0x23a   : > { %8900 = vst [vmem:[#allocation42_spill] sm:$0xff] %v7857_v3  ;;  %v7859_v55 = vadd.f32 %v2942_v31, %v2893_v24  ;;  %2990 = vmatmul.bf16.gmra.mxu2 %v7849_v46  ;;  %3088 = vmatmul.bf16.gmra.mxu0 %v7851_v51  ;;  %v5873_v31 = vld [vmem:[%s8772_s3 + $0xb4] sm:$0xf]  ;;  %v5738_v3 = vld [vmem:[%s7324_s27 + $0xfc] sm:$0xf] }
 0x23b   : > { %v5296_v13 = vor.u32 %v5873_v31, %v5293_v48  ;;  %v5453_v31 = vld [vmem:[%s8772_s3 + $0x1f8] sm:$0xf0]  ;;  %v5739_v48 = vld [vmem:[%s7324_s27 + $0x104] sm:$0xf]  ;;  %v7907_v53 = vor.u32 %v5738_v3, %v5141_v2 }
 0x23c   : > { %8901 = vst [vmem:[#allocation43_spill] sm:$0xff] %v7859_v55  ;;  %3039 = vmatmul.bf16.gmra.mxu3 %v7853_v37  ;;  %3137 = vmatmul.bf16.gmra.mxu1 %v7855_v6  ;;  %v5147_v6 = vld [vmem:[%s7324_s27 + $0x100] sm:$0xf]  ;;  %v5855_v3 = vld [vmem:[%s8772_s3 + $0x24] sm:$0xf] }
 0x23d   : > { %v1979_v12 = vpop.f32.mrf.mxu2  ;;  %3211 = vmatpush.bf16.msrb.mxu3 %v5296_v13  ;;  %8906 = vst [vmem:[#allocation48_spill] sm:$0xff] %v7907_v53  ;;  %v5871_v2 = vld [vmem:[%s8772_s3 + $0xa4] sm:$0xf] }
 0x23e   : > { %v1980_v18 = vadd.f32 %v1979_v12, %v7505_v42  ;;  %v5913_v42 = vld [vmem:[%s8772_s3 + $0x1f4] sm:$0xf]  ;;  %v5149_v12 = vld [vmem:[%s7324_s27 + $0x118] sm:$0xf0] }
 0x23f   : > { %v2028_v15 = vpop.f32.mrf.mxu3  ;;  %v2895_v29 = vpop.f32.mrf.mxu0  ;;  %v5456_v13 = vor.u32 %v5913_v42, %v5453_v31  ;;  %v5445_v42 = vld [vmem:[%s8772_s3 + $0x1e8] sm:$0xf0] }
 0x240   : > { %v7884_v24 = vadd.f32 %v2028_v15, %v1980_v18 }
 0x241   : > { %v2944_v40 = vpop.f32.mrf.mxu1  ;;  %3305 = vmatpush.bf16.msrb.mxu1 %v5456_v13  ;;  %v5909_v13 = vld [vmem:[%s8772_s3 + $0x1d4] sm:$0xf] }
 0x242   : > { %8902 = vst [vmem:[#allocation44_spill] sm:$0xff] %v7884_v24  ;;  %v7886_v38 = vadd.f32 %v2944_v40, %v2895_v29  ;;  %v7903_v40 = vor.u32 %v5741_v50, %v5139_v14  ;;  %v7905_v24 = vor.u32 %v5742_v7, %v5147_v6  ;;  %v5448_v50 = vor.u32 %v5911_v10, %v5445_v42  ;;  %v5221_v7 = vld [vmem:[%s8772_s3 + $0x28] sm:$0xf0]  ;;  %v5883_v10 = vld [vmem:[%s8772_s3 + $0x104] sm:$0xf] }
 0x243   : > { %v5224_v31 = vor.u32 %v5855_v3, %v5221_v7  ;;  %v5907_v7 = vld [vmem:[%s8772_s3 + $0x1c4] sm:$0xf] }
 0x244   : > { %8903 = vst [vmem:[#allocation45_spill] sm:$0xff] %v7886_v38  ;;  %v7909_v38 = vor.u32 %v5739_v48, %v5149_v12  ;;  %v5285_v12 = vld [vmem:[%s8772_s3 + $0xa8] sm:$0xf0] }
 0x245   : > { %v1981_v18 = vpop.f32.mrf.mxu2  ;;  %8904 = vst [vmem:[#allocation46_spill] sm:$0xff] %v7903_v40  ;;  %3306 = vmatpush.bf16.msrb.mxu1 %v5448_v50  ;;  %3163 = vmatpush.bf16.msrb.mxu2 %v5224_v31  ;;  %v5429_v31 = vld [vmem:[%s8772_s3 + $0x1c8] sm:$0xf0] }
 0x246   : > { %v1982_v15 = vadd.f32 %v1981_v18, %v7538_v4  ;;  %8905 = vst [vmem:[#allocation47_spill] sm:$0xff] %v7905_v24  ;;  %v5437_v18 = vld [vmem:[%s8772_s3 + $0x1d8] sm:$0xf0] }
 0x247   : > { %v2030_v29 = vpop.f32.mrf.mxu3  ;;  %v2898_v51 = vpop.f32.mrf.mxu0  ;;  %8907 = vst [vmem:[#allocation49_spill] sm:$0xff] %v7909_v38  ;;  %v5440_v42 = vor.u32 %v5909_v13, %v5437_v18  ;;  %v5853_v13 = vld [vmem:[%s8772_s3 + $0x14] sm:$0xf]  ;;  %v5213_v18 = vld [vmem:[%s8772_s3 + $0x18] sm:$0xf0] }
 0x248   : > { %v7917_v4 = vadd.f32 %v2030_v29, %v1982_v15  ;;  %v5288_v29 = vor.u32 %v5871_v2, %v5285_v12  ;;  %v5747_v12 = vld [vmem:[%s7324_s27 + $0x13c] sm:$0xf0] }
 0x249   : > { %v2947_v14 = vpop.f32.mrf.mxu1  ;;  %3307 = vmatpush.bf16.msrb.mxu1 %v5440_v42  ;;  %v5171_v42 = vld [vmem:[%s7324_s27 + $0x130] sm:$0xf] }
 0x24a   : > { %8908 = vst [vmem:[#allocation50_spill] sm:$0xff] %v7917_v4  ;;  %v7919_v6 = vadd.f32 %v2947_v14, %v2898_v51  ;;  %2995 = vmatmul.bf16.gmra.mxu2 %v7903_v40  ;;  %3093 = vmatmul.bf16.gmra.mxu0 %v7905_v24  ;;  %v5333_v51 = vld [vmem:[%s8772_s3 + $0x108] sm:$0xf0]  ;;  %v5745_v4 = vld [vmem:[%s7324_s27 + $0x134] sm:$0xf] }
 0x24b   : > { %v5336_v48 = vor.u32 %v5883_v10, %v5333_v51  ;;  %3212 = vmatpush.bf16.msrb.mxu3 %v5288_v29  ;;  %v5744_v29 = vld [vmem:[%s7324_s27 + $0x12c] sm:$0xf]  ;;  %v5867_v24 = vld [vmem:[%s8772_s3 + $0x84] sm:$0xf] }
 0x24c   : > { %8909 = vst [vmem:[#allocation51_spill] sm:$0xff] %v7919_v6  ;;  %3044 = vmatmul.bf16.gmra.mxu3 %v7907_v53  ;;  %3142 = vmatmul.bf16.gmra.mxu1 %v7909_v38  ;;  %v5173_v38 = vld [vmem:[%s7324_s27 + $0x148] sm:$0xf0] }
 0x24d   : > { %v1984_v15 = vpop.f32.mrf.mxu2  ;;  %3263 = vmatpush.bf16.msrb.mxu0 %v5336_v48  ;;  %v5163_v48 = vld [vmem:[%s7324_s27 + $0x128] sm:$0xf]  ;;  %v8005_v40 = vor.u32 %v5745_v4, %v5173_v38  ;;  %v5901_v38 = vld [vmem:[%s8772_s3 + $0x194] sm:$0xf] }
 0x24e   : > { %v1985_v14 = vadd.f32 %v1984_v15, %v7575_v9  ;;  %v5432_v9 = vor.u32 %v5907_v7, %v5429_v31  ;;  %v5869_v15 = vld [vmem:[%s8772_s3 + $0x94] sm:$0xf] }
 0x24f   : > { %v2033_v50 = vpop.f32.mrf.mxu3  ;;  %v2900_v3 = vpop.f32.mrf.mxu0  ;;  %v5905_v31 = vld [vmem:[%s8772_s3 + $0x1b4] sm:$0xf]  ;;  %8912 = vst [vmem:[#allocation54_spill] sm:$0xff] %v8005_v40 }
 0x250   : > { %v7956_v10 = vadd.f32 %v2033_v50, %v1985_v14  ;;  %v5216_v14 = vor.u32 %v5853_v13, %v5213_v18  ;;  %v5277_v50 = vld [vmem:[%s8772_s3 + $0x98] sm:$0xf0]  ;;  %3308 = vmatpush.bf16.msrb.mxu1 %v5432_v9  ;;  %v7996_v9 = vor.u32 %v5747_v12, %v5163_v48  ;;  %v5413_v48 = vld [vmem:[%s8772_s3 + $0x1a8] sm:$0xf0] }
 0x251   : > { %v2949_v51 = vpop.f32.mrf.mxu1  ;;  %v5280_v7 = vor.u32 %v5869_v15, %v5277_v50  ;;  %v5851_v15 = vld [vmem:[%s8772_s3 + $0x4] sm:$0xf]  ;;  %v5205_v50 = vld [vmem:[%s8772_s3 + $0x8] sm:$0xf0] }
 0x252   : > { %8910 = vst [vmem:[#allocation52_spill] sm:$0xff] %v7956_v10  ;;  %v7958_v2 = vadd.f32 %v2949_v51, %v2900_v3  ;;  %v5748_v3 = vld [vmem:[%s7324_s27 + $0x144] sm:$0xf0]  ;;  %v5421_v51 = vld [vmem:[%s8772_s3 + $0x1b8] sm:$0xf0]  ;;  %3164 = vmatpush.bf16.msrb.mxu2 %v5216_v14 }
 0x253   : > { %v5165_v10 = vld [vmem:[%s7324_s27 + $0x140] sm:$0xf0]  ;;  %v5424_v13 = vor.u32 %v5905_v31, %v5421_v51  ;;  %3213 = vmatpush.bf16.msrb.mxu3 %v5280_v7  ;;  %v7998_v14 = vor.u32 %v5748_v3, %v5171_v42  ;;  %v5208_v7 = vor.u32 %v5851_v15, %v5205_v50  ;;  %v5269_v31 = vld [vmem:[%s8772_s3 + $0x88] sm:$0xf0] }
 0x254   : > { %8911 = vst [vmem:[#allocation53_spill] sm:$0xff] %v7958_v2  ;;  %v8003_v53 = vor.u32 %v5744_v29, %v5165_v10  ;;  %v5272_v55 = vor.u32 %v5867_v24, %v5269_v31  ;;  %v5954_v24 = vld [vmem:[%s8776_s7 + $0x38] sm:$0xff]  ;;  %v5397_v15 = vld [vmem:[%s8772_s3 + $0x188] sm:$0xf0] }
 0x255   : > { %v1986_v18 = vpop.f32.mrf.mxu2  ;;  %3309 = vmatpush.bf16.msrb.mxu1 %v5424_v13  ;;  %3636 = vmatpush.bf16.msra.mxu0 %v5954_v24  ;;  %v5899_v13 = vld [vmem:[%s8772_s3 + $0x184] sm:$0xf]  ;;  %v5189_v24 = vld [vmem:[%s7324_s27 + $0x170] sm:$0xf0] }
 0x256   : > { %v1987_v2 = vadd.f32 %v1986_v18, %v7614_v44  ;;  %v5903_v44 = vld [vmem:[%s8772_s3 + $0x1a4] sm:$0xf]  ;;  %3165 = vmatpush.bf16.msrb.mxu2 %v5208_v7  ;;  %v5400_v31 = vor.u32 %v5899_v13, %v5397_v15 }
 0x257   : > { %v2035_v6 = vpop.f32.mrf.mxu3  ;;  %v2903_v51 = vpop.f32.mrf.mxu0  ;;  %v5416_v3 = vor.u32 %v5903_v44, %v5413_v48  ;;  %3214 = vmatpush.bf16.msrb.mxu3 %v5272_v55  ;;  %v5405_v55 = vld [vmem:[%s8772_s3 + $0x198] sm:$0xf0]  ;;  %v5753_v44 = vld [vmem:[%s7324_s27 + $0x16c] sm:$0xf0] }
 0x258   : > { %v8013_v12 = vadd.f32 %v2035_v6, %v1987_v2  ;;  %v5408_v4 = vor.u32 %v5901_v38, %v5405_v55  ;;  %v5750_v48 = vld [vmem:[%s7324_s27 + $0x15c] sm:$0xf]  ;;  %v5751_v38 = vld [vmem:[%s7324_s27 + $0x164] sm:$0xf] }
 0x259   : > { %v2952_v42 = vpop.f32.mrf.mxu1  ;;  %3310 = vmatpush.bf16.msrb.mxu1 %v5416_v3  ;;  %v5754_v3 = vld [vmem:[%s7324_s27 + $0x174] sm:$0xf0]  ;;  %v5197_v55 = vld [vmem:[%s7324_s27 + $0x178] sm:$0xf0] }
 0x25a   : > { %8913 = vst [vmem:[#allocation55_spill] sm:$0xff] %v8013_v12  ;;  %v8015_v18 = vadd.f32 %v2952_v42, %v2903_v51  ;;  %3000 = vmatmul.bf16.gmra.mxu2 %v7996_v9  ;;  %3098 = vmatmul.bf16.gmra.mxu0 %v7998_v14  ;;  %v5195_v42 = vld [vmem:[%s7324_s27 + $0x160] sm:$0xf]  ;;  %v8056_v13 = vor.u32 %v5751_v38, %v5197_v55 }
 0x25c   : > { %3049 = vmatmul.bf16.gmra.mxu3 %v8003_v53  ;;  %3147 = vmatmul.bf16.gmra.mxu1 %v8005_v40 }
 0x25d   : > { %v1989_v6 = vpop.f32.mrf.mxu2  ;;  %3311 = vmatpush.bf16.msrb.mxu1 %v5408_v4 }
 0x25e   : > { %v1990_v10 = vadd.f32 %v1989_v6, %v7627_v20  ;;  %v5187_v20 = vld [vmem:[%s7324_s27 + $0x158] sm:$0xf]  ;;  %s512_s27 = scalar_lea.vmem [#allocation3], %s511_s20 }
 0x25f   : > { %v2038_v2 = vpop.f32.mrf.mxu3  ;;  %v2905_v29 = vpop.f32.mrf.mxu0  ;;  %s4356_s26 = sshll.u32 %s512_s27, 4  ;;  %s4357_s26 = int_to_ptr.vmem [resolvable:$true] %s4356_s26 }
 0x260   : > { %v8037_v50 = vadd.f32 %v2038_v2, %v1990_v10  ;;  %v8050_v10 = vor.u32 %v5753_v44, %v5187_v20  ;;  %v8052_v2 = vor.u32 %v5754_v3, %v5195_v42  ;;  %v5953_v42 = vld [vmem:[%s8776_s7 + $0x30] sm:$0xff] }
 0x261   : > { %v2954_v7 = vpop.f32.mrf.mxu1  ;;  %3312 = vmatpush.bf16.msrb.mxu1 %v5400_v31  ;;  %3637 = vmatpush.bf16.msra.mxu0 %v5953_v42 }
 0x262   : > { %8914 = vst [vmem:[#allocation56_spill] sm:$0xff] %v8037_v50  ;;  %v8039_v51 = vadd.f32 %v2954_v7, %v2905_v29  ;;  %v8054_v29 = vor.u32 %v5750_v48, %v5189_v24 }
 0x265   : > { %v1991_v6 = vpop.f32.mrf.mxu2 }
 0x266   : > { %v1992_v12 = vadd.f32 %v1991_v6, %v7645_v41 }
 0x267   : > { %v2040_v40 = vpop.f32.mrf.mxu3  ;;  %v2908_v4 = vpop.f32.mrf.mxu0 }
 0x268   : > { %v8058_v15 = vadd.f32 %v2040_v40, %v1992_v12 }
 0x269   : > { %v2957_v7 = vpop.f32.mrf.mxu1 }
 0x26a   : > { %v8060_v50 = vadd.f32 %v2957_v7, %v2908_v4  ;;  %3005 = vmatmul.bf16.gmra.mxu2 %v8050_v10  ;;  %3103 = vmatmul.bf16.gmra.mxu0 %v8052_v2 }
 0x26c   : > { %3054 = vmatmul.bf16.gmra.mxu3 %v8054_v29  ;;  %3152 = vmatmul.bf16.gmra.mxu1 %v8056_v13 }
 0x26d   : > { %v1994_v41 = vpop.f32.mrf.mxu2 }
 0x26e   : > { %v1995_v31 = vadd.f32 %v1994_v41, %v7652_v59 }
 0x26f   : > { %v2043_v20 = vpop.f32.mrf.mxu3  ;;  %v2910_v44 = vpop.f32.mrf.mxu0 }
 0x270   : > { %v8067_v48 = vadd.f32 %v2043_v20, %v1995_v31 }
 0x271   : > { %v2959_v40 = vpop.f32.mrf.mxu1 }
 0x272   : > { %v8069_v12 = vadd.f32 %v2959_v40, %v2910_v44  ;;  %v5929_v44 = vld [vmem:[%s8772_s3 + $0x274] sm:$0xf] }
 0x275   : > { %v1996_v3 = vpop.f32.mrf.mxu2 }
 0x276   : > { %v1997_v24 = vadd.f32 %v1996_v3, %v7686_v45 }
 0x277   : > { %v2045_v38 = vpop.f32.mrf.mxu3  ;;  %v3069_v55 = vpop.f32.mrf.mxu0 }
 0x278   : > { %v8075_v6 = vadd.f32 %v2045_v38, %v1997_v24 }
 0x279   : > { %v3118_v59 = vpop.f32.mrf.mxu1 }
 0x27a   : > { %8915 = vst [vmem:[#allocation57_spill] sm:$0xff] %v8075_v6  ;;  %3166 = vmatmul.bf16.vlgmr.msrb.gmra.mxu2 %v7333_v36  ;;  %3264 = vmatmul.bf16.vlgmr.msrb.gmra.mxu0 %v7657_v17  ;;  %v5517_v36 = vld [vmem:[%s8772_s3 + $0x278] sm:$0xf0]  ;;  %v8102_v6 = vld [vmem:[%s8775_s6] ss:$0 sm:$0xff] }
 0x27b   : > { %v5520_v17 = vor.u32 %v5929_v44, %v5517_v36 }
 0x27c   : > { %3215 = vmatmul.bf16.vlgmr.msrb.gmra.mxu3 %v7335_v21  ;;  %3313 = vmatmul.bf16.vlgmr.msrb.gmra.mxu1 %v7661_v28  ;;  %v5952_v21 = vld [vmem:[%s8776_s7 + $0x28] sm:$0xff]  ;;  %v5581_v28 = vld [vmem:[%s8772_s3 + $0x2f8] sm:$0xf0] }
 0x27d   : > { %v2971_v4 = vpop.f32.mrf.mxu2  ;;  %3638 = vmatpush.bf16.msra.mxu0 %v5952_v21  ;;  %3354 = vmatpush.bf16.msra.mxu2 %v5520_v17 }
 0x27e   : > { %v2972_v7 = vadd.f32 %v2971_v4, %v7665_v0  ;;  %v5945_v0 = vld [vmem:[%s8772_s3 + $0x2f4] sm:$0xf] }
 0x27f   : > { %v3020_v41 = vpop.f32.mrf.mxu3  ;;  %v3071_v31 = vpop.f32.mrf.mxu0  ;;  %v5584_v42 = vor.u32 %v5945_v0, %v5581_v28 }
 0x280   : > { %v3021_v45 = vadd.f32 %v3020_v41, %v2972_v7 }
 0x281   : > { %v3120_v20 = vpop.f32.mrf.mxu1  ;;  %3403 = vmatpush.bf16.msra.mxu3 %v5584_v42 }
 0x282   : > { %v3070_v40 = vadd.f32 %v3069_v55, %v3021_v45 }
 0x284   : > { %v3119_v3 = vadd.f32 %v3118_v59, %v3070_v40 }
 0x285   : > { %v2973_v24 = vpop.f32.mrf.mxu2 }
 0x286   : > { %v3508_v38 = vadd.f32 %v3119_v3, %v7075_v62  ;;  %v2974_v4 = vadd.f32 %v2973_v24, %v7694_v33 }
 0x287   : > { %v3022_v7 = vpop.f32.mrf.mxu3  ;;  %v3074_v41 = vpop.f32.mrf.mxu0 }
 0x288   : > { %v3023_v44 = vadd.f32 %v3022_v7, %v2974_v4  ;;  %v3528_v59 = vadd.f32 %v8102_v6, %v3508_v38 }
 0x289   : > { %v3123_v36 = vpop.f32.mrf.mxu1 }
 0x28a   : > { %v3072_v55 = vadd.f32 %v3071_v31, %v3023_v44  ;;  %3171 = vmatmul.bf16.gmra.mxu2 %v7367_v26  ;;  %3269 = vmatmul.bf16.gmra.mxu0 %v7705_v47  ;;  %v5509_v47 = vld [vmem:[%s8772_s3 + $0x268] sm:$0xf0]  ;;  %v3544_v40 = vmax.f32 %v3528_v59, 0.0 }
 0x28c   : > { %3220 = vmatmul.bf16.gmra.mxu3 %v7369_v39  ;;  %3318 = vmatmul.bf16.gmra.mxu1 %v7709_v52  ;;  %v3121_v62 = vadd.f32 %v3120_v20, %v3072_v55  ;;  %v5927_v39 = vld [vmem:[%s8772_s3 + $0x264] sm:$0xf]  ;;  %v5573_v20 = vld [vmem:[%s8772_s3 + $0x2e8] sm:$0xf0] }
 0x28d   : > { %v2976_v33 = vpop.f32.mrf.mxu2  ;;  %v5512_v52 = vor.u32 %v5927_v39, %v5509_v47 }
 0x28e   : > { %v3509_v45 = vadd.f32 %v3121_v62, %v7100_v49  ;;  %v2977_v21 = vadd.f32 %v2976_v33, %v7715_v11  ;;  %v5951_v49 = vld [vmem:[%s8776_s7 + $0x20] sm:$0xff] }
 0x28f   : > { %v3025_v17 = vpop.f32.mrf.mxu3  ;;  %v3076_v0 = vpop.f32.mrf.mxu0  ;;  %v5943_v11 = vld [vmem:[%s8772_s3 + $0x2e4] sm:$0xf]  ;;  %3639 = vmatpush.bf16.msra.mxu0 %v5951_v49  ;;  %3355 = vmatpush.bf16.msra.mxu2 %v5512_v52 }
 0x290   : > { %v3529_v31 = vadd.f32 %v8102_v6, %v3509_v45  ;;  %v3026_v28 = vadd.f32 %v3025_v17, %v2977_v21  ;;  %v5576_v24 = vor.u32 %v5943_v11, %v5573_v20 }
 0x291   : > { %v3125_v26 = vpop.f32.mrf.mxu1 }
 0x292   : > { %v3545_v42 = vmax.f32 %v3529_v31, 0.0  ;;  %v3075_v3 = vadd.f32 %v3074_v41, %v3026_v28  ;;  %3404 = vmatpush.bf16.msra.mxu3 %v5576_v24 }
 0x294   : > { %v8127_v38 = vpack.c.bf16 %v3545_v42, %v3544_v40  ;;  %v3124_v4 = vadd.f32 %v3123_v36, %v3075_v3 }
 0x295   : > { %v2978_v7 = vpop.f32.mrf.mxu2 }
 0x296   : > { %v3510_v44 = vadd.f32 %v3124_v4, %v7103_v43  ;;  %v2979_v55 = vadd.f32 %v2978_v7, %v7742_v8 }
 0x297   : > { %v3027_v62 = vpop.f32.mrf.mxu3  ;;  %v3079_v33 = vpop.f32.mrf.mxu0 }
 0x298   : > { %v3028_v45 = vadd.f32 %v3027_v62, %v2979_v55  ;;  %v3530_v59 = vadd.f32 %v8102_v6, %v3510_v44 }
 0x299   : > { %v3128_v21 = vpop.f32.mrf.mxu1 }
 0x29a   : > { %v3077_v17 = vadd.f32 %v3076_v0, %v3028_v45  ;;  %3176 = vmatmul.bf16.gmra.mxu2 %v7401_v56  ;;  %3274 = vmatmul.bf16.gmra.mxu0 %v7753_v35  ;;  %v5501_v35 = vld [vmem:[%s8772_s3 + $0x258] sm:$0xf0]  ;;  %v3546_v47 = vmax.f32 %v3530_v59, 0.0 }
 0x29c   : > { %3225 = vmatmul.bf16.gmra.mxu3 %v7403_v60  ;;  %3323 = vmatmul.bf16.gmra.mxu1 %v7757_v32  ;;  %v3126_v41 = vadd.f32 %v3125_v26, %v3077_v17  ;;  %v5925_v60 = vld [vmem:[%s8772_s3 + $0x254] sm:$0xf]  ;;  %v5565_v26 = vld [vmem:[%s8772_s3 + $0x2d8] sm:$0xf0] }
 0x29d   : > { %v2981_v36 = vpop.f32.mrf.mxu2  ;;  %v5504_v32 = vor.u32 %v5925_v60, %v5501_v35 }
 0x29e   : > { %v3511_v43 = vadd.f32 %v3126_v41, %v7128_v58  ;;  %v2982_v8 = vadd.f32 %v2981_v36, %v7763_v61  ;;  %v5950_v58 = vld [vmem:[%s8776_s7 + $0x18] sm:$0xff]  ;;  %v5941_v61 = vld [vmem:[%s8772_s3 + $0x2d4] sm:$0xf] }
 0x29f   : > { %v3030_v31 = vpop.f32.mrf.mxu3  ;;  %v3081_v28 = vpop.f32.mrf.mxu0  ;;  %3640 = vmatpush.bf16.msra.mxu0 %v5950_v58  ;;  %v5568_v52 = vor.u32 %v5941_v61, %v5565_v26  ;;  %3356 = vmatpush.bf16.msra.mxu2 %v5504_v32 }
 0x2a0   : > { %v3531_v0 = vadd.f32 %v8102_v6, %v3511_v43  ;;  %v3031_v39 = vadd.f32 %v3030_v31, %v2982_v8  ;;  %v5557_v43 = vld [vmem:[%s8772_s3 + $0x2c8] sm:$0xf0] }
 0x2a1   : > { %v3130_v56 = vpop.f32.mrf.mxu1  ;;  %3405 = vmatpush.bf16.msra.mxu3 %v5568_v52 }
 0x2a2   : > { %v3080_v49 = vadd.f32 %v3079_v33, %v3031_v39  ;;  %v3547_v11 = vmax.f32 %v3531_v0, 0.0 }
 0x2a4   : > { %v3129_v20 = vadd.f32 %v3128_v21, %v3080_v49  ;;  %v8154_v40 = vpack.c.bf16 %v3547_v11, %v3546_v47 }
 0x2a5   : > { %v2983_v42 = vpop.f32.mrf.mxu2 }
 0x2a6   : > { %v3512_v3 = vadd.f32 %v3129_v20, %v7131_v30  ;;  %v2984_v24 = vadd.f32 %v2983_v42, %v7790_v1 }
 0x2a7   : > { %v3032_v4 = vpop.f32.mrf.mxu3  ;;  %v3084_v7 = vpop.f32.mrf.mxu0 }
 0x2a8   : > { %v3033_v44 = vadd.f32 %v3032_v4, %v2984_v24  ;;  %v3532_v21 = vadd.f32 %v8102_v6, %v3512_v3 }
 0x2a9   : > { %v3133_v55 = vpop.f32.mrf.mxu1 }
 0x2aa   : > { %v3082_v62 = vadd.f32 %v3081_v28, %v3033_v44  ;;  %3181 = vmatmul.bf16.gmra.mxu2 %v7435_v23  ;;  %3279 = vmatmul.bf16.gmra.mxu0 %v7801_v54  ;;  %v5493_v54 = vld [vmem:[%s8772_s3 + $0x248] sm:$0xf0]  ;;  %v3548_v8 = vmax.f32 %v3532_v21, 0.0  ;;  %v5937_v44 = vld [vmem:[%s8772_s3 + $0x2b4] sm:$0xf] }
 0x2ac   : > { %3230 = vmatmul.bf16.gmra.mxu3 %v7437_v57  ;;  %3328 = vmatmul.bf16.gmra.mxu1 %v7805_v5  ;;  %v3131_v33 = vadd.f32 %v3130_v56, %v3082_v62  ;;  %v5923_v57 = vld [vmem:[%s8772_s3 + $0x244] sm:$0xf] }
 0x2ad   : > { %v2986_v45 = vpop.f32.mrf.mxu2  ;;  %v5496_v5 = vor.u32 %v5923_v57, %v5493_v54 }
 0x2ae   : > { %v3513_v30 = vadd.f32 %v3131_v33, %v7156_v25  ;;  %v2987_v1 = vadd.f32 %v2986_v45, %v7811_v16  ;;  %v5949_v25 = vld [vmem:[%s8776_s7 + $0x10] sm:$0xff]  ;;  %v5939_v16 = vld [vmem:[%s8772_s3 + $0x2c4] sm:$0xf] }
 0x2af   : > { %v3035_v17 = vpop.f32.mrf.mxu3  ;;  %v3086_v41 = vpop.f32.mrf.mxu0  ;;  %3641 = vmatpush.bf16.msra.mxu0 %v5949_v25  ;;  %v5560_v28 = vor.u32 %v5939_v16, %v5557_v43  ;;  %3357 = vmatpush.bf16.msra.mxu2 %v5496_v5  ;;  %v8919_v43 = vld [vmem:[#allocation11_spill] sm:$0xff] }
 0x2b0   : > { %v3533_v36 = vadd.f32 %v8102_v6, %v3513_v30  ;;  %v3036_v59 = vadd.f32 %v3035_v17, %v2987_v1 }
 0x2b1   : > { %v3135_v23 = vpop.f32.mrf.mxu1  ;;  %3406 = vmatpush.bf16.msra.mxu3 %v5560_v28  ;;  %v8922_v28 = vld [vmem:[#allocation48_spill] sm:$0xff] }
 0x2b2   : > { %v3085_v31 = vadd.f32 %v3084_v7, %v3036_v59  ;;  %v3549_v0 = vmax.f32 %v3533_v36, 0.0  ;;  %v8918_v59 = vld [vmem:[#allocation45_spill] sm:$0xff] }
 0x2b4   : > { %v3134_v39 = vadd.f32 %v3133_v55, %v3085_v31  ;;  %v8181_v56 = vpack.c.bf16 %v3549_v0, %v3548_v8  ;;  %v5549_v55 = vld [vmem:[%s8772_s3 + $0x2b8] sm:$0xf0]  ;;  %v8921_v31 = vld [vmem:[#allocation12_spill] sm:$0xff] }
 0x2b5   : > { %v2988_v60 = vpop.f32.mrf.mxu2  ;;  %v5552_v45 = vor.u32 %v5937_v44, %v5549_v55  ;;  %v8920_v8 = vld [vmem:[#allocation46_spill] sm:$0xff]  ;;  %v5933_v44 = vld [vmem:[%s8772_s3 + $0x294] sm:$0xf] }
 0x2b6   : > { %v3514_v35 = vadd.f32 %v3134_v39, %v7159_v22  ;;  %v2989_v58 = vadd.f32 %v2988_v60, %v7838_v27  ;;  %v8916_v27 = vld [vmem:[#allocation43_spill] sm:$0xff]  ;;  %v5533_v55 = vld [vmem:[%s8772_s3 + $0x298] sm:$0xf0] }
 0x2b7   : > { %v3037_v32 = vpop.f32.mrf.mxu3  ;;  %v3089_v61 = vpop.f32.mrf.mxu0  ;;  %3407 = vmatpush.bf16.msra.mxu3 %v5552_v45  ;;  %v5919_v60 = vld [vmem:[%s8772_s3 + $0x224] sm:$0xf] }
 0x2b8   : > { %v3038_v26 = vadd.f32 %v3037_v32, %v2989_v58  ;;  %v3534_v20 = vadd.f32 %v8102_v6, %v3514_v35  ;;  %v5477_v35 = vld [vmem:[%s8772_s3 + $0x228] sm:$0xf0]  ;;  %v8923_v32 = vld [vmem:[#allocation29_spill] sm:$0xff] }
 0x2b9   : > { %v3138_v47 = vpop.f32.mrf.mxu1 }
 0x2ba   : > { %v3087_v49 = vadd.f32 %v3086_v41, %v3038_v26  ;;  %3186 = vmatmul.bf16.gmra.mxu2 %v7469_v63  ;;  %3284 = vmatmul.bf16.gmra.mxu0 %v7849_v46  ;;  %v5485_v46 = vld [vmem:[%s8772_s3 + $0x238] sm:$0xf0]  ;;  %v3550_v62 = vmax.f32 %v3534_v20, 0.0  ;;  %v8917_v41 = vld [vmem:[#allocation28_spill] sm:$0xff]  ;;  %v8924_v26 = vld [vmem:[#allocation51_spill] sm:$0xff] }
 0x2bb   : > { %v5935_v20 = vld [vmem:[%s8772_s3 + $0x2a4] sm:$0xf] }
 0x2bc   : > { %3235 = vmatmul.bf16.gmra.mxu3 %v7471_v19  ;;  %3333 = vmatmul.bf16.gmra.mxu1 %v7853_v37  ;;  %v3136_v52 = vadd.f32 %v3135_v23, %v3087_v49  ;;  %v5921_v19 = vld [vmem:[%s8772_s3 + $0x234] sm:$0xf] }
 0x2bd   : > { %v2991_v11 = vpop.f32.mrf.mxu2  ;;  %v5488_v37 = vor.u32 %v5921_v19, %v5485_v46 }
 0x2be   : > { %v3515_v22 = vadd.f32 %v3136_v52, %v7190_v34  ;;  %v2992_v42 = vadd.f32 %v2991_v11, %v8916_v27  ;;  %v5948_v34 = vld [vmem:[%s8776_s7 + $0x8] sm:$0xff]  ;;  %v5480_v52 = vor.u32 %v5919_v60, %v5477_v35 }
 0x2bf   : > { %v3040_v3 = vpop.f32.mrf.mxu3  ;;  %v3091_v24 = vpop.f32.mrf.mxu0  ;;  %3642 = vmatpush.bf16.msra.mxu0 %v5948_v34  ;;  %3358 = vmatpush.bf16.msra.mxu2 %v5488_v37 }
 0x2c0   : > { %v3535_v4 = vadd.f32 %v8102_v6, %v3515_v22  ;;  %v3041_v7 = vadd.f32 %v3040_v3, %v2992_v42  ;;  %v5541_v22 = vld [vmem:[%s8772_s3 + $0x2a8] sm:$0xf0] }
 0x2c1   : > { %v3140_v63 = vpop.f32.mrf.mxu1 }
 0x2c2   : > { %v3090_v33 = vadd.f32 %v3089_v61, %v3041_v7  ;;  %v3551_v21 = vmax.f32 %v3535_v4, 0.0  ;;  %v5544_v4 = vor.u32 %v5935_v20, %v5541_v22  ;;  %v5917_v7 = vld [vmem:[%s8772_s3 + $0x214] sm:$0xf] }
 0x2c3   : > { %3359 = vmatpush.bf16.msra.mxu2 %v5480_v52 }
 0x2c4   : > { %v3139_v30 = vadd.f32 %v3138_v47, %v3090_v33  ;;  %v8208_v1 = vpack.c.bf16 %v3551_v21, %v3550_v62  ;;  %3408 = vmatpush.bf16.msra.mxu3 %v5544_v4  ;;  %v5536_v33 = vor.u32 %v5933_v44, %v5533_v55  ;;  %v8931_v44 = vld [vmem:[#allocation15_spill] sm:$0xff]  ;;  %v8932_v55 = vld [vmem:[#allocation16_spill] sm:$0xff] }
 0x2c5   : > { %v2993_v17 = vpop.f32.mrf.mxu2 }
 0x2c6   : > { %v3516_v36 = vadd.f32 %v3139_v30, %v8917_v41  ;;  %v2994_v23 = vadd.f32 %v2993_v17, %v8918_v59  ;;  %v5915_v30 = vld [vmem:[%s8772_s3 + $0x204] sm:$0xf]  ;;  %v5461_v17 = vld [vmem:[%s8772_s3 + $0x208] sm:$0xf0]  ;;  %v8925_v41 = vld [vmem:[#allocation30_spill] sm:$0xff] }
 0x2c7   : > { %v3042_v57 = vpop.f32.mrf.mxu3  ;;  %v3094_v54 = vpop.f32.mrf.mxu0  ;;  %v8926_v59 = vld [vmem:[#allocation53_spill] sm:$0xff] }
 0x2c8   : > { %v3043_v25 = vadd.f32 %v3042_v57, %v2994_v23  ;;  %v3536_v58 = vadd.f32 %v8102_v6, %v3516_v36  ;;  %3409 = vmatpush.bf16.msra.mxu3 %v5536_v33 }
 0x2c9   : > { %v3143_v5 = vpop.f32.mrf.mxu1 }
 0x2ca   : > { %v3092_v16 = vadd.f32 %v3091_v24, %v3043_v25  ;;  %3191 = vmatmul.bf16.gmra.mxu2 %v8919_v43  ;;  %3289 = vmatmul.bf16.gmra.mxu0 %v8920_v8  ;;  %v5947_v24 = vld [vmem:[%s8776_s7] sm:$0xff]  ;;  %v3552_v19 = vmax.f32 %v3536_v58, 0.0 }
 0x2cb   : > { %3643 = vmatpush.bf16.msra.mxu0 %v5947_v24  ;;  %v8930_v24 = vld [vmem:[#allocation32_spill] sm:$0xff] }
 0x2cc   : > { %3240 = vmatmul.bf16.gmra.mxu3 %v8921_v31  ;;  %3338 = vmatmul.bf16.gmra.mxu1 %v8922_v28  ;;  %v3141_v0 = vadd.f32 %v3140_v63, %v3092_v16  ;;  %v5469_v63 = vld [vmem:[%s8772_s3 + $0x218] sm:$0xf0]  ;;  %v5525_v16 = vld [vmem:[%s8772_s3 + $0x288] sm:$0xf0] }
 0x2cd   : > { %v2996_v39 = vpop.f32.mrf.mxu2  ;;  %v5472_v34 = vor.u32 %v5917_v7, %v5469_v63 }
 0x2ce   : > { %v3517_v61 = vadd.f32 %v3141_v0, %v8923_v32  ;;  %v2997_v47 = vadd.f32 %v2996_v39, %v8924_v26  ;;  %v8927_v0 = vld [vmem:[#allocation13_spill] sm:$0xff]  ;;  %v8928_v39 = vld [vmem:[#allocation14_spill] sm:$0xff]  ;;  %v8929_v32 = vld [vmem:[#allocation31_spill] sm:$0xff] }
 0x2cf   : > { %v3045_v49 = vpop.f32.mrf.mxu3  ;;  %v3096_v11 = vpop.f32.mrf.mxu0  ;;  %3360 = vmatpush.bf16.msra.mxu2 %v5472_v34 }
 0x2d0   : > { %v3537_v27 = vadd.f32 %v8102_v6, %v3517_v61  ;;  %v3046_v42 = vadd.f32 %v3045_v49, %v2997_v47 }
 0x2d1   : > { %v3145_v3 = vpop.f32.mrf.mxu1 }
 0x2d2   : > { %v3095_v46 = vadd.f32 %v3094_v54, %v3046_v42  ;;  %v3553_v37 = vmax.f32 %v3537_v27, 0.0  ;;  %v5464_v54 = vor.u32 %v5915_v30, %v5461_v17 }
 0x2d4   : > { %v3144_v62 = vadd.f32 %v3143_v5, %v3095_v46  ;;  %v8247_v45 = vpack.c.bf16 %v3553_v37, %v3552_v19  ;;  %v5931_v5 = vld [vmem:[%s8772_s3 + $0x284] sm:$0xf]  ;;  %3361 = vmatpush.bf16.msra.mxu2 %v5464_v54 }
 0x2d5   : > { %v2998_v21 = vpop.f32.mrf.mxu2  ;;  %v5528_v31 = vor.u32 %v5931_v5, %v5525_v16 }
 0x2d6   : > { %v3518_v36 = vadd.f32 %v3144_v62, %v8925_v41  ;;  %v2999_v23 = vadd.f32 %v2998_v21, %v8926_v59  ;;  %v8933_v21 = vld [vmem:[#allocation33_spill] sm:$0xff] }
 0x2d7   : > { %v3047_v57 = vpop.f32.mrf.mxu3  ;;  %v3099_v25 = vpop.f32.mrf.mxu0  ;;  %3410 = vmatpush.bf16.msra.mxu3 %v5528_v31 }
 0x2d8   : > { %v3048_v43 = vadd.f32 %v3047_v57, %v2999_v23  ;;  %v3538_v58 = vadd.f32 %v8102_v6, %v3518_v36 }
 0x2d9   : > { %v3148_v8 = vpop.f32.mrf.mxu1 }
 0x2da   : > { %v3097_v28 = vadd.f32 %v3096_v11, %v3048_v43  ;;  %3196 = vmatmul.bf16.gmra.mxu2 %v8927_v0  ;;  %3294 = vmatmul.bf16.gmra.mxu0 %v7996_v9  ;;  %v3554_v9 = vmax.f32 %v3538_v58, 0.0  ;;  %v8934_v43 = vld [vmem:[#allocation34_spill] sm:$0xff] }
 0x2db   : > { %v8936_v58 = vld [vmem:[#allocation18_spill] sm:$0xff] }
 0x2dc   : > { %3245 = vmatmul.bf16.gmra.mxu3 %v8928_v39  ;;  %3343 = vmatmul.bf16.gmra.mxu1 %v8003_v53  ;;  %v3146_v60 = vadd.f32 %v3145_v3, %v3097_v28 }
 0x2dd   : > { %v3001_v35 = vpop.f32.mrf.mxu2 }
 0x2de   : > { %v3519_v61 = vadd.f32 %v3146_v60, %v8929_v32  ;;  %v3002_v26 = vadd.f32 %v3001_v35, %v8015_v18  ;;  %v5958_v18 = vld [vmem:[%s8778_s9 + $0x18] sm:$0xff] }
 0x2df   : > { %v3050_v47 = vpop.f32.mrf.mxu3  ;;  %v3101_v49 = vpop.f32.mrf.mxu0  ;;  %3774 = vmatpush.bf16.msra.mxu1 %v5958_v18  ;;  %v8935_v35 = vld [vmem:[#allocation17_spill] sm:$0xff] }
 0x2e0   : > { %v3539_v52 = vadd.f32 %v8102_v6, %v3519_v61  ;;  %v3051_v11 = vadd.f32 %v3050_v47, %v3002_v26  ;;  %v8937_v47 = vld [vmem:[#allocation27_spill] sm:$0xff] }
 0x2e1   : > { %v3150_v20 = vpop.f32.mrf.mxu1 }
 0x2e2   : > { %v3100_v22 = vadd.f32 %v3099_v25, %v3051_v11  ;;  %v3555_v27 = vmax.f32 %v3539_v52, 0.0 }
 0x2e4   : > { %v3149_v42 = vadd.f32 %v3148_v8, %v3100_v22  ;;  %v8271_v53 = vpack.c.bf16 %v3555_v27, %v3554_v9 }
 0x2e5   : > { %v3003_v3 = vpop.f32.mrf.mxu2 }
 0x2e6   : > { %v3520_v4 = vadd.f32 %v3149_v42, %v8930_v24  ;;  %v3004_v7 = vadd.f32 %v3003_v3, %v8039_v51 }
 0x2e7   : > { %v3052_v63 = vpop.f32.mrf.mxu3  ;;  %v3104_v19 = vpop.f32.mrf.mxu0 }
 0x2e8   : > { %v3053_v46 = vadd.f32 %v3052_v63, %v3004_v7  ;;  %v3540_v33 = vadd.f32 %v8102_v6, %v3520_v4  ;;  %v5957_v63 = vld [vmem:[%s8778_s9 + $0x10] sm:$0xff] }
 0x2e9   : > { %v3153_v34 = vpop.f32.mrf.mxu1  ;;  %3775 = vmatpush.bf16.msra.mxu1 %v5957_v63 }
 0x2ea   : > { %v3102_v37 = vadd.f32 %v3101_v49, %v3053_v46  ;;  %3201 = vmatmul.bf16.gmra.mxu2 %v8931_v44  ;;  %3299 = vmatmul.bf16.gmra.mxu0 %v8050_v10  ;;  %v3556_v54 = vmax.f32 %v3540_v33, 0.0  ;;  %v8939_v46 = vld [vmem:[#allocation21_spill] sm:$0xff] }
 0x2ec   : > { %3250 = vmatmul.bf16.gmra.mxu3 %v8932_v55  ;;  %3348 = vmatmul.bf16.gmra.mxu1 %v8054_v29  ;;  %v3151_v62 = vadd.f32 %v3150_v20, %v3102_v37 }
 0x2ed   : > { %v3006_v51 = vpop.f32.mrf.mxu2 }
 0x2ee   : > { %v3521_v30 = vadd.f32 %v3151_v62, %v8933_v21  ;;  %v3007_v17 = vadd.f32 %v3006_v51, %v8060_v50 }
 0x2ef   : > { %v3055_v41 = vpop.f32.mrf.mxu3  ;;  %v3106_v36 = vpop.f32.mrf.mxu0 }
 0x2f0   : > { %v3541_v59 = vadd.f32 %v8102_v6, %v3521_v30  ;;  %v3056_v23 = vadd.f32 %v3055_v41, %v3007_v17 }
 0x2f1   : > { %v3155_v57 = vpop.f32.mrf.mxu1 }
 0x2f2   : > { %v3105_v10 = vadd.f32 %v3104_v19, %v3056_v23  ;;  %v3557_v25 = vmax.f32 %v3541_v59, 0.0  ;;  %v8940_v59 = vld [vmem:[#allocation24_spill] sm:$0xff] }
 0x2f4   : > { %v3154_v5 = vadd.f32 %v3153_v34, %v3105_v10  ;;  %v8286_v16 = vpack.c.bf16 %v3557_v25, %v3556_v54 }
 0x2f5   : > { %v3008_v29 = vpop.f32.mrf.mxu2 }
 0x2f6   : > { %v3522_v8 = vadd.f32 %v3154_v5, %v8934_v43  ;;  %v3009_v31 = vadd.f32 %v3008_v29, %v8069_v12 }
 0x2f7   : > { %v3057_v28 = vpop.f32.mrf.mxu3  ;;  %v3265_v0 = vpop.f32.mrf.mxu0 }
 0x2f8   : > { %v3058_v50 = vadd.f32 %v3057_v28, %v3009_v31  ;;  %v3542_v26 = vadd.f32 %v8102_v6, %v3522_v8  ;;  %v5956_v28 = vld [vmem:[%s8778_s9 + $0x8] sm:$0xff] }
 0x2f9   : > { %v8290_v39 = vpop.f32.mrf.mxu1  ;;  %3776 = vmatpush.bf16.msra.mxu1 %v5956_v28 }
 0x2fa   : > { %v3107_v60 = vadd.f32 %v3106_v36, %v3058_v50  ;;  %3362 = vmatmul.bf16.vlgmr.msra.gmra.mxu2 %v8935_v35  ;;  %3644 = vmatmul.bf16.vlgmr.msra.gmra.mxu0 %v8127_v38  ;;  %v3558_v27 = vmax.f32 %v3542_v26, 0.0  ;;  %v8942_v50 = vld [vmem:[#allocation36_spill] sm:$0xff] }
 0x2fc   : > { %3411 = vmatmul.bf16.vlgmr.msra.gmra.mxu3 %v8936_v58  ;;  %v3156_v32 = vadd.f32 %v3155_v57, %v3107_v60  ;;  %v8943_v60 = vld [vmem:[#allocation37_spill] sm:$0xff] }
 0x2fd   : > { %v3167_v61 = vpop.f32.mrf.mxu2 }
 0x2fe   : > { %v3523_v49 = vadd.f32 %v3156_v32, %v8937_v47 }
 0x2ff   : > { %v3216_v52 = vpop.f32.mrf.mxu3  ;;  %v3267_v11 = vpop.f32.mrf.mxu0 }
 0x300   : > { %v3217_v12 = vadd.f32 %v3216_v52, %v3167_v61  ;;  %v3543_v20 = vadd.f32 %v8102_v6, %v3523_v49  ;;  %v8938_v6 = vld [vmem:[#allocation20_spill] sm:$0xff] }
 0x301   : > { %v8298_v9 = vpop.f32.mrf.mxu1 }
 0x302   : > { %v8300_v22 = vadd.f32 %v3265_v0, %v3217_v12  ;;  %v3559_v42 = vmax.f32 %v3543_v20, 0.0 }
 0x304   : > { %v8302_v38 = vpack.c.bf16 %v3559_v42, %v3558_v27  ;;  %v8944_v42 = vld [vmem:[#allocation40_spill] sm:$0xff] }
 0x305   : > { %v3169_v3 = vpop.f32.mrf.mxu2 }
 0x307   : > { %v3218_v24 = vpop.f32.mrf.mxu3  ;;  %v3270_v7 = vpop.f32.mrf.mxu0 }
 0x308   : > { %v3219_v4 = vadd.f32 %v3218_v24, %v3169_v3 }
 0x309   : > { %v8307_v19 = vpop.f32.mrf.mxu1 }
 0x30a   : > { %v8309_v18 = vadd.f32 %v3267_v11, %v3219_v4  ;;  %3367 = vmatmul.bf16.gmra.mxu2 %v8938_v6  ;;  %3649 = vmatmul.bf16.gmra.mxu0 %v8154_v40  ;;  %v8941_v40 = vld [vmem:[#allocation25_spill] sm:$0xff] }
 0x30c   : > { %3416 = vmatmul.bf16.gmra.mxu3 %v8939_v46 }
 0x30d   : > { %v3172_v34 = vpop.f32.mrf.mxu2 }
 0x30f   : > { %v3221_v37 = vpop.f32.mrf.mxu3  ;;  %v3272_v55 = vpop.f32.mrf.mxu0 }
 0x310   : > { %v3222_v44 = vadd.f32 %v3221_v37, %v3172_v34 }
 0x311   : > { %v8314_v62 = vpop.f32.mrf.mxu1 }
 0x312   : > { %v8316_v51 = vadd.f32 %v3270_v7, %v3222_v44 }
 0x315   : > { %v3174_v33 = vpop.f32.mrf.mxu2 }
 0x317   : > { %v3223_v21 = vpop.f32.mrf.mxu3  ;;  %v3275_v17 = vpop.f32.mrf.mxu0 }
 0x318   : > { %v3224_v30 = vadd.f32 %v3223_v21, %v3174_v33  ;;  %v8946_v21 = vld [vmem:[#allocation47_spill] sm:$0xff] }
 0x319   : > { %v8318_v41 = vpop.f32.mrf.mxu1 }
 0x31a   : > { %v8320_v36 = vadd.f32 %v3272_v55, %v3224_v30  ;;  %3372 = vmatmul.bf16.gmra.mxu2 %v8940_v59  ;;  %3654 = vmatmul.bf16.gmra.mxu0 %v8181_v56  ;;  %v5955_v55 = vld [vmem:[%s8778_s9] sm:$0xff]  ;;  %v8947_v30 = vld [vmem:[#allocation49_spill] sm:$0xff] }
 0x31b   : > { %3777 = vmatpush.bf16.msra.mxu1 %v5955_v55 }
 0x31c   : > { %3421 = vmatmul.bf16.gmra.mxu3 %v8941_v40 }
 0x31d   : > { %v3177_v23 = vpop.f32.mrf.mxu2 }
 0x31f   : > { %v3226_v57 = vpop.f32.mrf.mxu3  ;;  %v3277_v10 = vpop.f32.mrf.mxu0 }
 0x320   : > { %v3227_v54 = vadd.f32 %v3226_v57, %v3177_v23 }
 0x321   : > { %v8325_v25 = vpop.f32.mrf.mxu1 }
 0x322   : > { %v8327_v5 = vadd.f32 %v3275_v17, %v3227_v54 }
 0x325   : > { %v3179_v29 = vpop.f32.mrf.mxu2 }
 0x327   : > { %v3228_v43 = vpop.f32.mrf.mxu3  ;;  %v3280_v31 = vpop.f32.mrf.mxu0 }
 0x328   : > { %v3229_v8 = vadd.f32 %v3228_v43, %v3179_v29 }
 0x329   : > { %v8332_v0 = vpop.f32.mrf.mxu1 }
 0x32a   : > { %v8334_v56 = vadd.f32 %v3277_v10, %v3229_v8  ;;  %3377 = vmatmul.bf16.gmra.mxu2 %v8942_v50  ;;  %3659 = vmatmul.bf16.gmra.mxu0 %v8208_v1  ;;  %v8945_v1 = vld [vmem:[#allocation41_spill] sm:$0xff] }
 0x32c   : > { %3426 = vmatmul.bf16.gmra.mxu3 %v8943_v60 }
 0x32d   : > { %v3182_v35 = vpop.f32.mrf.mxu2 }
 0x32f   : > { %v3231_v58 = vpop.f32.mrf.mxu3  ;;  %v3282_v61 = vpop.f32.mrf.mxu0 }
 0x330   : > { %v3232_v32 = vadd.f32 %v3231_v58, %v3182_v35 }
 0x331   : > { %v8339_v26 = vpop.f32.mrf.mxu1 }
 0x332   : > { %v8341_v47 = vadd.f32 %v3280_v31, %v3232_v32 }
 0x335   : > { %v3184_v49 = vpop.f32.mrf.mxu2 }
 0x337   : > { %v3233_v52 = vpop.f32.mrf.mxu3  ;;  %v3285_v11 = vpop.f32.mrf.mxu0 }
 0x338   : > { %v3234_v12 = vadd.f32 %v3233_v52, %v3184_v49 }
 0x339   : > { %v8343_v20 = vpop.f32.mrf.mxu1 }
 0x33a   : > { %v8345_v27 = vadd.f32 %v3282_v61, %v3234_v12  ;;  %3382 = vmatmul.bf16.gmra.mxu2 %v8944_v42  ;;  %3664 = vmatmul.bf16.gmra.mxu0 %v8247_v45 }
 0x33c   : > { %3431 = vmatmul.bf16.gmra.mxu3 %v8945_v1 }
 0x33d   : > { %v3187_v3 = vpop.f32.mrf.mxu2 }
 0x33f   : > { %v3236_v24 = vpop.f32.mrf.mxu3  ;;  %v3287_v7 = vpop.f32.mrf.mxu0 }
 0x340   : > { %v3237_v4 = vadd.f32 %v3236_v24, %v3187_v3 }
 0x341   : > { %v8350_v63 = vpop.f32.mrf.mxu1 }
 0x342   : > { %v8352_v6 = vadd.f32 %v3285_v11, %v3237_v4 }
 0x345   : > { %v3189_v46 = vpop.f32.mrf.mxu2 }
 0x347   : > { %v3238_v34 = vpop.f32.mrf.mxu3  ;;  %v3290_v44 = vpop.f32.mrf.mxu0 }
 0x348   : > { %v3239_v37 = vadd.f32 %v3238_v34, %v3189_v46 }
 0x349   : > { %v8357_v33 = vpop.f32.mrf.mxu1 }
 0x34a   : > { %v8359_v45 = vadd.f32 %v3287_v7, %v3239_v37  ;;  %3387 = vmatmul.bf16.gmra.mxu2 %v8946_v21  ;;  %3669 = vmatmul.bf16.gmra.mxu0 %v8271_v53  ;;  %v8948_v53 = vld [vmem:[#allocation54_spill] sm:$0xff] }
 0x34b   : > { %v8398_v21 = vld [vmem:[%s8773_s4] ss:$0 sm:$0xff] }
 0x34c   : > { %3436 = vmatmul.bf16.gmra.mxu3 %v8947_v30 }
 0x34d   : > { %v3192_v17 = vpop.f32.mrf.mxu2 }
 0x34f   : > { %v3241_v59 = vpop.f32.mrf.mxu3  ;;  %v3292_v23 = vpop.f32.mrf.mxu0 }
 0x350   : > { %v3242_v40 = vadd.f32 %v3241_v59, %v3192_v17 }
 0x351   : > { %v8366_v54 = vpop.f32.mrf.mxu1 }
 0x352   : > { %v8364_v57 = vadd.f32 %v3290_v44, %v3242_v40  ;;  %v8404_v40 = vld [vmem:[%s8774_s5] ss:$0 sm:$0xff] }
 0x355   : > { %v3194_v10 = vpop.f32.mrf.mxu2 }
 0x357   : > { %v3243_v29 = vpop.f32.mrf.mxu3  ;;  %v3295_v8 = vpop.f32.mrf.mxu0 }
 0x358   : > { %v3244_v43 = vadd.f32 %v3243_v29, %v3194_v10 }
 0x359   : > { %v8373_v28 = vpop.f32.mrf.mxu1 }
 0x35a   : > { %v8368_v31 = vadd.f32 %v3292_v23, %v3244_v43  ;;  %3392 = vmatmul.bf16.gmra.mxu2 %v7998_v14  ;;  %3674 = vmatmul.bf16.gmra.mxu0 %v8286_v16 }
 0x35c   : > { %3441 = vmatmul.bf16.gmra.mxu3 %v8948_v53 }
 0x35d   : > { %v3197_v50 = vpop.f32.mrf.mxu2 }
 0x35f   : > { %v3246_v60 = vpop.f32.mrf.mxu3  ;;  %v3297_v58 = vpop.f32.mrf.mxu0 }
 0x360   : > { %v3247_v35 = vadd.f32 %v3246_v60, %v3197_v50  ;;  %v8413_v50 = vld [vmem:[%s8780_s11] ss:$0 sm:$0xff]  ;;  %v3317_v60 = vadd.f32 %v8298_v9, %v8309_v18  ;;  %v3320_v18 = vadd.f32 %v8307_v19, %v8316_v51 }
 0x361   : > { %v8377_v52 = vpop.f32.mrf.mxu1 }
 0x362   : > { %v8375_v32 = vadd.f32 %v3295_v8, %v3247_v35 }
 0x365   : > { %v3199_v61 = vpop.f32.mrf.mxu2 }
 0x367   : > { %v3248_v49 = vpop.f32.mrf.mxu3  ;;  %v3300_v11 = vpop.f32.mrf.mxu0 }
 0x368   : > { %v3249_v12 = vadd.f32 %v3248_v49, %v3199_v61 }
 0x369   : > { %v3349_v24 = vpop.f32.mrf.mxu1 }
 0x36a   : > { %v8379_v42 = vadd.f32 %v3297_v58, %v3249_v12  ;;  %3397 = vmatmul.bf16.gmra.mxu2 %v8052_v2  ;;  %3679 = vmatmul.bf16.gmra.mxu0 %v8302_v38  ;;  %v8391_v2 = vld [vmem:[%s8777_s8] ss:$0 sm:$0xff] }
 0x36c   : > { %3446 = vmatmul.bf16.gmra.mxu3 %v8056_v13  ;;  %v3315_v13 = vadd.f32 %v8290_v39, %v8300_v22  ;;  %v8949_v39 = vld [vmem:[#allocation19_spill] sm:$0xff] }
 0x36d   : > { %v3202_v14 = vpop.f32.mrf.mxu2  ;;  %v3456_v22 = vadd.f32 %v8398_v21, %v8949_v39  ;;  %v3322_v39 = vadd.f32 %v8314_v62, %v8320_v36  ;;  %v3325_v62 = vadd.f32 %v8318_v41, %v8327_v5 }
 0x36f   : > { %v3251_v16 = vpop.f32.mrf.mxu3  ;;  %v3302_v3 = vpop.f32.mrf.mxu0 }
 0x370   : > { %v3252_v1 = vadd.f32 %v3251_v16, %v3202_v14 }
 0x372   : > { %v3301_v4 = vadd.f32 %v3300_v11, %v3252_v1 }
 0x374   : > { %v8384_v7 = vadd.f32 %v3349_v24, %v3301_v4 }
 0x375   : > { %v3204_v46 = vpop.f32.mrf.mxu2 }
 0x377   : > { %v3253_v34 = vpop.f32.mrf.mxu3  ;;  %v3645_v44 = vpop.f32.mrf.mxu0 }
 0x378   : > { %v3254_v37 = vadd.f32 %v3253_v34, %v3204_v46  ;;  %v3646_v30 = vadd.f32 %v8391_v2, %v3645_v44 }
 0x37a   : > { %v8386_v55 = vadd.f32 %v3302_v3, %v3254_v37  ;;  %v3685_v43 = vmax.f32 %v3646_v30, 0.0  ;;  %v8950_v3 = vld [vmem:[#allocation22_spill] sm:$0xff] }
 0x37b   : > { %v3457_v24 = vadd.f32 %v8398_v21, %v8950_v3 }
 0x37d   : > { %v3363_v38 = vpop.f32.mrf.mxu2 }
 0x37e   : > { %v3364_v17 = vadd.f32 %v3363_v38, %v3315_v13 }
 0x37f   : > { %v3412_v59 = vpop.f32.mrf.mxu3  ;;  %v3647_v23 = vpop.f32.mrf.mxu0 }
 0x380   : > { %v3413_v10 = vadd.f32 %v3412_v59, %v3364_v17  ;;  %v3648_v29 = vadd.f32 %v8391_v2, %v3647_v23  ;;  %v8951_v23 = vld [vmem:[#allocation23_spill] sm:$0xff] }
 0x382   : > { %v3476_v8 = vadd.f32 %v8404_v40, %v3413_v10  ;;  %v3686_v53 = vmax.f32 %v3648_v29, 0.0  ;;  %v3458_v10 = vadd.f32 %v8398_v21, %v8951_v23 }
 0x384   : > { %v3701_v35 = vpack.c.bf16 %v3686_v53, %v3685_v43  ;;  %v3492_v58 = vmul.f32 %v3476_v8, %v3456_v22 }
 0x385   : > { %v3365_v61 = vpop.f32.mrf.mxu2 }
 0x386   : > { %v3366_v49 = vadd.f32 %v3365_v61, %v3317_v60  ;;  %5633 = vmatmul.msk.bf16.vlgmr.msra.gmra.mxu1 %vm3745_vm0, %v3701_v35  ;;  %v3839_v11 = vmul.f32 %v8413_v50, %v3492_v58 }
 0x387   : > { %v3414_v12 = vpop.f32.mrf.mxu3  ;;  %v3650_v14 = vpop.f32.mrf.mxu0 }
 0x388   : > { %v3415_v16 = vadd.f32 %v3414_v12, %v3366_v49  ;;  %v3856_v1 = vsel %vm3855_vm1, %v3839_v11, 0.0  ;;  %v3651_v34 = vadd.f32 %v8391_v2, %v3650_v14  ;;  %v8952_v12 = vld [vmem:[#allocation26_spill] sm:$0xff] }
 0x389   : > { %3857 = vadd.xlane.f32.xlu0 %v3856_v1  ;;  %v3459_v11 = vadd.f32 %v8398_v21, %v8952_v12 }
 0x38a   : > { %v3477_v9 = vadd.f32 %v8404_v40, %v3415_v16  ;;  %v3687_v29 = vmax.f32 %v3651_v34, 0.0 }
 0x38c   : > { %v3493_v4 = vmul.f32 %v3477_v9, %v3457_v24 }
 0x38d   : > { %v3368_v46 = vpop.f32.mrf.mxu2 }
 0x38e   : > { %v3369_v37 = vadd.f32 %v3368_v46, %v3320_v18  ;;  %v3840_v13 = vmul.f32 %v8413_v50, %v3493_v4 }
 0x38f   : > { %v3417_v44 = vpop.f32.mrf.mxu3  ;;  %v3652_v38 = vpop.f32.mrf.mxu0 }
 0x390   : > { %v3418_v30 = vadd.f32 %v3417_v44, %v3369_v37  ;;  %v3653_v17 = vadd.f32 %v8391_v2, %v3652_v38  ;;  %v3859_v59 = vsel %vm3855_vm1, %v3840_v13, 0.0  ;;  %v8953_v37 = vld [vmem:[#allocation35_spill] sm:$0xff]  ;;  %v3327_v38 = vadd.f32 %v8325_v25, %v8334_v56 }
 0x391   : > { %3860 = vadd.xlane.f32.xlu0 %v3859_v59  ;;  %v3460_v44 = vadd.f32 %v8398_v21, %v8953_v37  ;;  %v3330_v25 = vadd.f32 %v8332_v0, %v8341_v47 }
 0x392   : > { %v3478_v19 = vadd.f32 %v8404_v40, %v3418_v30  ;;  %v3688_v51 = vmax.f32 %v3653_v17, 0.0 }
 0x394   : > { %v3702_v22 = vpack.c.bf16 %v3688_v51, %v3687_v29  ;;  %v3494_v43 = vmul.f32 %v3478_v19, %v3458_v10 }
 0x395   : > { %v3370_v8 = vpop.f32.mrf.mxu2 }
 0x396   : > { %v3371_v53 = vadd.f32 %v3370_v8, %v3322_v39  ;;  %5634 = vmatmul.msk.bf16.gmra.mxu1 %vm3745_vm0, %v3702_v22  ;;  %v3841_v35 = vmul.f32 %v8413_v50, %v3494_v43  ;;  %v8954_v22 = vld [vmem:[#allocation38_spill] sm:$0xff] }
 0x397   : > { %v3419_v60 = vpop.f32.mrf.mxu3  ;;  %v3655_v58 = vpop.f32.mrf.mxu0  ;;  %v3461_v43 = vadd.f32 %v8398_v21, %v8954_v22 }
 0x398   : > { %v3420_v61 = vadd.f32 %v3419_v60, %v3371_v53  ;;  %v3862_v49 = vsel %vm3855_vm1, %v3841_v35, 0.0  ;;  %v3656_v1 = vadd.f32 %v8391_v2, %v3655_v58 }
 0x399   : > { %3863 = vadd.xlane.f32.xlu1 %v3862_v49 }
 0x39a   : > { %v3479_v14 = vadd.f32 %v8404_v40, %v3420_v61  ;;  %v3689_v13 = vmax.f32 %v3656_v1, 0.0  ;;  %v3332_v1 = vadd.f32 %v8339_v26, %v8345_v27  ;;  %v3335_v26 = vadd.f32 %v8343_v20, %v8352_v6 }
 0x39c   : > { %v3495_v36 = vmul.f32 %v3479_v14, %v3459_v11 }
 0x39d   : > { %v3373_v16 = vpop.f32.mrf.mxu2 }
 0x39e   : > { %v3374_v3 = vadd.f32 %v3373_v16, %v3325_v62  ;;  %v3842_v9 = vmul.f32 %v8413_v50, %v3495_v36  ;;  %v8955_v62 = vld [vmem:[#allocation39_spill] sm:$0xff] }
 0x39f   : > { %v3422_v24 = vpop.f32.mrf.mxu3  ;;  %v3657_v18 = vpop.f32.mrf.mxu0  ;;  %v3462_v36 = vadd.f32 %v8398_v21, %v8955_v62 }
 0x3a0   : > { %v3423_v4 = vadd.f32 %v3422_v24, %v3374_v3  ;;  %v3658_v46 = vadd.f32 %v8391_v2, %v3657_v18  ;;  %v3865_v34 = vsel %vm3855_vm1, %v3842_v9, 0.0 }
 0x3a1   : > { %3866 = vadd.xlane.f32.xlu1 %v3865_v34 }
 0x3a2   : > { %v3480_v41 = vadd.f32 %v8404_v40, %v3423_v4  ;;  %v3690_v5 = vmax.f32 %v3658_v46, 0.0 }
 0x3a4   : > { %v3703_v30 = vpack.c.bf16 %v3690_v5, %v3689_v13  ;;  %v3496_v17 = vmul.f32 %v3480_v41, %v3460_v44  ;;  %v8956_v13 = vld [vmem:[#allocation42_spill] sm:$0xff] }
 0x3a5   : > { %v3375_v59 = vpop.f32.mrf.mxu2  ;;  %v3463_v41 = vadd.f32 %v8398_v21, %v8956_v13 }
 0x3a6   : > { %v3376_v23 = vadd.f32 %v3375_v59, %v3327_v38  ;;  %5635 = vmatmul.msk.bf16.gmra.mxu1 %vm3745_vm0, %v3703_v30  ;;  %v3843_v29 = vmul.f32 %v8413_v50, %v3496_v17 }
 0x3a7   : > { %v3424_v10 = vpop.f32.mrf.mxu3  ;;  %v3660_v19 = vpop.f32.mrf.mxu0 }
 0x3a8   : > { %v3425_v51 = vadd.f32 %v3424_v10, %v3376_v23  ;;  %v3868_v39 = vsel %vm3855_vm1, %v3843_v29, 0.0  ;;  %v3661_v60 = vadd.f32 %v8391_v2, %v3660_v19 }
 0x3a9   : > { %3869 = vadd.xlane.f32.xlu2 %v3868_v39  ;;  %v8957_v39 = vld [vmem:[#allocation44_spill] sm:$0xff] }
 0x3aa   : > { %v3481_v8 = vadd.f32 %v8404_v40, %v3425_v51  ;;  %v3691_v16 = vmax.f32 %v3661_v60, 0.0  ;;  %v3464_v22 = vadd.f32 %v8398_v21, %v8957_v39 }
 0x3ac   : > { %v3497_v56 = vmul.f32 %v3481_v8, %v3461_v43  ;;  %v3337_v8 = vadd.f32 %v8350_v63, %v8359_v45  ;;  %v3340_v63 = vadd.f32 %v8357_v33, %v8364_v57 }
 0x3ad   : > { %v3378_v53 = vpop.f32.mrf.mxu2 }
 0x3ae   : > { %v3379_v35 = vadd.f32 %v3378_v53, %v3330_v25  ;;  %v3844_v61 = vmul.f32 %v8413_v50, %v3497_v56 }
 0x3af   : > { %v3427_v58 = vpop.f32.mrf.mxu3  ;;  %v3662_v49 = vpop.f32.mrf.mxu0 }
 0x3b0   : > { %v3428_v12 = vadd.f32 %v3427_v58, %v3379_v35  ;;  %v3663_v11 = vadd.f32 %v8391_v2, %v3662_v49  ;;  %v3871_v14 = vsel %vm3855_vm1, %v3844_v61, 0.0 }
 0x3b1   : > { %3872 = vadd.xlane.f32.xlu2 %v3871_v14 }
 0x3b2   : > { %v3482_v0 = vadd.f32 %v8404_v40, %v3428_v12  ;;  %v3692_v47 = vmax.f32 %v3663_v11, 0.0  ;;  %v8958_v11 = vld [vmem:[#allocation50_spill] sm:$0xff] }
 0x3b3   : > { %v3465_v14 = vadd.f32 %v8398_v21, %v8958_v11 }
 0x3b4   : > { %v3704_v3 = vpack.c.bf16 %v3692_v47, %v3691_v16  ;;  %v3498_v24 = vmul.f32 %v3482_v0, %v3462_v36 }
 0x3b5   : > { %v3380_v9 = vpop.f32.mrf.mxu2 }
 0x3b6   : > { %v3381_v18 = vadd.f32 %v3380_v9, %v3332_v1  ;;  %5636 = vmatmul.msk.bf16.gmra.mxu1 %vm3745_vm0, %v3704_v3  ;;  %v3845_v46 = vmul.f32 %v8413_v50, %v3498_v24 }
 0x3b7   : > { %v3429_v4 = vpop.f32.mrf.mxu3  ;;  %v3665_v34 = vpop.f32.mrf.mxu0 }
 0x3b8   : > { %v3430_v37 = vadd.f32 %v3429_v4, %v3381_v18  ;;  %v3874_v44 = vsel %vm3855_vm1, %v3845_v46, 0.0  ;;  %v3666_v30 = vadd.f32 %v8391_v2, %v3665_v34  ;;  %v8959_v4 = vld [vmem:[#allocation52_spill] sm:$0xff] }
 0x3b9   : > { %3875 = vadd.xlane.f32.xlu0 %v3874_v44  ;;  %v3466_v46 = vadd.f32 %v8398_v21, %v8959_v4  ;;  %v3351_v4 = vpop.f32.mrf.mxu1 }
 0x3ba   : > { %v3483_v5 = vadd.f32 %v8404_v40, %v3430_v37  ;;  %v3693_v43 = vmax.f32 %v3666_v30, 0.0  ;;  %v3342_v37 = vadd.f32 %v8366_v54, %v8368_v31  ;;  %v3345_v54 = vadd.f32 %v8373_v28, %v8375_v32 }
 0x3bc   : > { %v3499_v27 = vmul.f32 %v3483_v5, %v3463_v41 }
 0x3bd   : > { %v3383_v38 = vpop.f32.mrf.mxu2 }
 0x3be   : > { %v3384_v17 = vadd.f32 %v3383_v38, %v3335_v26  ;;  %v3846_v23 = vmul.f32 %v8413_v50, %v3499_v27 }
 0x3bf   : > { %v3432_v59 = vpop.f32.mrf.mxu3  ;;  %v3667_v10 = vpop.f32.mrf.mxu0 }
 0x3c0   : > { %v3433_v29 = vadd.f32 %v3432_v59, %v3384_v17  ;;  %v3668_v19 = vadd.f32 %v8391_v2, %v3667_v10  ;;  %v3877_v51 = vsel %vm3855_vm1, %v3846_v23, 0.0  ;;  %v8960_v59 = vld [vmem:[#allocation55_spill] sm:$0xff] }
 0x3c1   : > { %3878 = vadd.xlane.f32.xlu2 %v3877_v51  ;;  %v3467_v23 = vadd.f32 %v8398_v21, %v8960_v59 }
 0x3c2   : > { %v3484_v20 = vadd.f32 %v8404_v40, %v3433_v29  ;;  %v3694_v6 = vmax.f32 %v3668_v19, 0.0 }
 0x3c4   : > { %v3705_v25 = vpack.c.bf16 %v3694_v6, %v3693_v43  ;;  %v3500_v56 = vmul.f32 %v3484_v20, %v3464_v22 }
 0x3c5   : > { %v3385_v53 = vpop.f32.mrf.mxu2 }
 0x3c6   : > { %v3386_v60 = vadd.f32 %v3385_v53, %v3337_v8  ;;  %5637 = vmatmul.msk.bf16.gmra.mxu1 %vm3745_vm0, %v3705_v25  ;;  %v3847_v58 = vmul.f32 %v8413_v50, %v3500_v56  ;;  %v8961_v25 = vld [vmem:[#allocation56_spill] sm:$0xff] }
 0x3c7   : > { %v3434_v35 = vpop.f32.mrf.mxu3  ;;  %v3670_v61 = vpop.f32.mrf.mxu0  ;;  %v3468_v56 = vadd.f32 %v8398_v21, %v8961_v25 }
 0x3c8   : > { %v3435_v49 = vadd.f32 %v3434_v35, %v3386_v60  ;;  %v3880_v12 = vsel %vm3855_vm1, %v3847_v58, 0.0  ;;  %v3671_v16 = vadd.f32 %v8391_v2, %v3670_v61  ;;  %v3347_v60 = vadd.f32 %v8377_v52, %v8379_v42 }
 0x3c9   : > { %3881 = vadd.xlane.f32.xlu1 %v3880_v12 }
 0x3ca   : > { %v3485_v62 = vadd.f32 %v8404_v40, %v3435_v49  ;;  %v3695_v34 = vmax.f32 %v3671_v16, 0.0 }
 0x3cc   : > { %v3501_v45 = vmul.f32 %v3485_v62, %v3465_v14 }
 0x3cd   : > { %v3388_v36 = vpop.f32.mrf.mxu2 }
 0x3ce   : > { %v3389_v0 = vadd.f32 %v3388_v36, %v3340_v63  ;;  %v3848_v1 = vmul.f32 %v8413_v50, %v3501_v45  ;;  %v3469_v45 = vadd.f32 %v8398_v21, %v8058_v15  ;;  %v3470_v15 = vadd.f32 %v8398_v21, %v8067_v48 }
 0x3cf   : > { %v3437_v47 = vpop.f32.mrf.mxu3  ;;  %v3672_v3 = vpop.f32.mrf.mxu0 }
 0x3d0   : > { %v3438_v24 = vadd.f32 %v3437_v47, %v3389_v0  ;;  %v3673_v9 = vadd.f32 %v8391_v2, %v3672_v3  ;;  %v3883_v18 = vsel %vm3855_vm1, %v3848_v1, 0.0 }
 0x3d1   : > { %3884 = vadd.xlane.f32.xlu0 %v3883_v18 }
 0x3d2   : > { %v3486_v33 = vadd.f32 %v8404_v40, %v3438_v24  ;;  %v3696_v57 = vmax.f32 %v3673_v9, 0.0 }
 0x3d4   : > { %v3706_v44 = vpack.c.bf16 %v3696_v57, %v3695_v34  ;;  %v3502_v13 = vmul.f32 %v3486_v33, %v3466_v46 }
 0x3d5   : > { %v3390_v41 = vpop.f32.mrf.mxu2 }
 0x3d6   : > { %v3391_v5 = vadd.f32 %v3390_v41, %v3342_v37  ;;  %5638 = vmatmul.msk.bf16.gmra.mxu1 %vm3745_vm0, %v3706_v44  ;;  %v3849_v27 = vmul.f32 %v8413_v50, %v3502_v13 }
 0x3d7   : > { %v3439_v26 = vpop.f32.mrf.mxu3  ;;  %v3675_v38 = vpop.f32.mrf.mxu0 }
 0x3d8   : > { %v3440_v30 = vadd.f32 %v3439_v26, %v3391_v5  ;;  %v3886_v17 = vsel %vm3855_vm1, %v3849_v27, 0.0  ;;  %v3676_v19 = vadd.f32 %v8391_v2, %v3675_v38  ;;  %v8962_v5 = vld [vmem:[#allocation57_spill] sm:$0xff] }
 0x3d9   : > { %3887 = vadd.xlane.f32.xlu2 %v3886_v17  ;;  %v3471_v26 = vadd.f32 %v8398_v21, %v8962_v5  ;;  %v8551_v17 = vld [vmem:[%s8781_s12] ss:$0 sm:$0xff] }
 0x3da   : > { %v3487_v10 = vadd.f32 %v8404_v40, %v3440_v30  ;;  %v3697_v53 = vmax.f32 %v3676_v19, 0.0 }
 0x3dc   : > { %v3503_v31 = vmul.f32 %v3487_v10, %v3467_v23 }
 0x3dd   : > { %v3393_v29 = vpop.f32.mrf.mxu2 }
 0x3de   : > { %v3394_v51 = vadd.f32 %v3393_v29, %v3345_v54  ;;  %v3850_v22 = vmul.f32 %v8413_v50, %v3503_v31 }
 0x3df   : > { %v3442_v39 = vpop.f32.mrf.mxu3  ;;  %v3677_v43 = vpop.f32.mrf.mxu0 }
 0x3e0   : > { %v3443_v20 = vadd.f32 %v3442_v39, %v3394_v51  ;;  %v3678_v6 = vadd.f32 %v8391_v2, %v3677_v43  ;;  %v3889_v8 = vsel %vm3855_vm1, %v3850_v22, 0.0 }
 0x3e1   : > { %3890 = vadd.xlane.f32.xlu1 %v3889_v8 }
 0x3e2   : > { %v3488_v28 = vadd.f32 %v8404_v40, %v3443_v20  ;;  %v3698_v32 = vmax.f32 %v3678_v6, 0.0 }
 0x3e4   : > { %v3707_v35 = vpack.c.bf16 %v3698_v32, %v3697_v53  ;;  %v3504_v58 = vmul.f32 %v3488_v28, %v3468_v56 }
 0x3e5   : > { %v3395_v61 = vpop.f32.mrf.mxu2 }
 0x3e6   : > { %v3396_v49 = vadd.f32 %v3395_v61, %v3347_v60  ;;  %5639 = vmatmul.msk.bf16.gmra.mxu1 %vm3745_vm0, %v3707_v35  ;;  %v3851_v11 = vmul.f32 %v8413_v50, %v3504_v58 }
 0x3e7   : > { %v3444_v12 = vpop.f32.mrf.mxu3  ;;  %v3680_v14 = vpop.f32.mrf.mxu0 }
 0x3e8   : > { %v3445_v62 = vadd.f32 %v3444_v12, %v3396_v49  ;;  %v3892_v63 = vsel %vm3855_vm1, %v3851_v11, 0.0  ;;  %v3681_v16 = vadd.f32 %v8391_v2, %v3680_v14 }
 0x3e9   : > { %3893 = vadd.xlane.f32.xlu0 %v3892_v63 }
 0x3ea   : > { %v3489_v36 = vadd.f32 %v8404_v40, %v3445_v62  ;;  %v3699_v46 = vmax.f32 %v3681_v16, 0.0 }
 0x3ec   : > { %v3505_v52 = vmul.f32 %v3489_v36, %v3469_v45 }
 0x3ed   : > { %v3398_v42 = vpop.f32.mrf.mxu2 }
 0x3ee   : > { %v3399_v0 = vadd.f32 %v3398_v42, %v8384_v7  ;;  %v3852_v1 = vmul.f32 %v8413_v50, %v3505_v52  ;;  %v3352_v7 = vadd.f32 %v3351_v4, %v8386_v55  ;;  %v8545_v55 = vld [vmem:[%s8779_s10] ss:$0 sm:$0xff] }
 0x3ef   : > { %v3447_v47 = vpop.f32.mrf.mxu3  ;;  %v3682_v3 = vpop.f32.mrf.mxu0 }
 0x3f0   : > { %v3448_v24 = vadd.f32 %v3447_v47, %v3399_v0  ;;  %v3683_v9 = vadd.f32 %v8391_v2, %v3682_v3  ;;  %v3895_v18 = vsel %vm3855_vm1, %v3852_v1, 0.0 }
 0x3f1   : > { %3896 = vadd.xlane.f32.xlu2 %v3895_v18 }
 0x3f2   : > { %v3490_v34 = vadd.f32 %v8404_v40, %v3448_v24  ;;  %v3700_v33 = vmax.f32 %v3683_v9, 0.0 }
 0x3f4   : > { %v3708_v57 = vpack.c.bf16 %v3700_v33, %v3699_v46  ;;  %v8534_v37 = vmul.f32 %v3490_v34, %v3470_v15 }
 0x3f5   : > { %v3400_v44 = vpop.f32.mrf.mxu2 }
 0x3f6   : > { %v3401_v13 = vadd.f32 %v3400_v44, %v3352_v7  ;;  %5640 = vmatmul.msk.bf16.gmra.mxu1 %vm3745_vm0, %v3708_v57 }
 0x3f7   : > { %v3449_v2 = vpop.f32.mrf.mxu3 }
 0x3f8   : > { %v3450_v41 = vadd.f32 %v3449_v2, %v3401_v13 }
 0x3fa   : > { %v3491_v48 = vadd.f32 %v8404_v40, %v3450_v41 }
 0x3fc   : > { %v8540_v27 = vmul.f32 %v3491_v48, %v3471_v26 }
 0x403   : > { %v3779_v38 = vpop.f32.mrf.mxu1 }
 0x404   : > { %v3780_v30 = vadd.f32 %v8545_v55, %v3779_v38 }
 0x406   : > { %v3819_v59 = vmax.f32 %v3780_v30, 0.0 }
 0x408   : > { %v3908_v21 = vmul.f32 %v8551_v17, %v3819_v59 }
 0x40a   : > { %v3924_v40 = vsel %vm3855_vm1, %v3908_v21, 0.0  ;;  %v3858_v21 = vpop.xlane.xlu0 %3857 }
 0x40b   : > { %v3781_v23 = vpop.f32.mrf.mxu1  ;;  %3925 = vadd.xlane.f32.xlu1 %v3924_v40 }
 0x40c   : > { %v3782_v10 = vadd.f32 %v8545_v55, %v3781_v23  ;;  %v8585_v5 = vpop.xlane.xlu1 %3863 }
 0x40e   : > { %v3820_v54 = vmax.f32 %v3782_v10, 0.0 }
 0x410   : > { %v3909_v31 = vmul.f32 %v8551_v17, %v3820_v54 }
 0x412   : > { %v3927_v29 = vsel %vm3855_vm1, %v3909_v31, 0.0 }
 0x413   : > { %v3784_v19 = vpop.f32.mrf.mxu1  ;;  %3928 = vadd.xlane.f32.xlu2 %v3927_v29 }
 0x414   : > { %v3785_v51 = vadd.f32 %v8545_v55, %v3784_v19  ;;  %v8593_v10 = vpop.xlane.xlu1 %3866 }
 0x416   : > { %v3821_v39 = vmax.f32 %v3785_v51, 0.0 }
 0x418   : > { %v3910_v22 = vmul.f32 %v8551_v17, %v3821_v39 }
 0x41a   : > { %v3930_v43 = vsel %vm3855_vm1, %v3910_v22, 0.0  ;;  %v3861_v22 = vpop.xlane.xlu0 %3860 }
 0x41b   : > { %v3786_v20 = vpop.f32.mrf.mxu1  ;;  %3931 = vadd.xlane.f32.xlu0 %v3930_v43 }
 0x41c   : > { %v3787_v6 = vadd.f32 %v8545_v55, %v3786_v20  ;;  %v8587_v26 = vpop.xlane.xlu2 %3869 }
 0x41e   : > { %v3822_v8 = vmax.f32 %v3787_v6, 0.0 }
 0x420   : > { %v3911_v25 = vmul.f32 %v8551_v17, %v3822_v8  ;;  %v3853_v8 = vmul.f32 %v8413_v50, %v8534_v37  ;;  %v3854_v37 = vmul.f32 %v8413_v50, %v8540_v27 }
 0x422   : > { %v3933_v56 = vsel %vm3855_vm1, %v3911_v25, 0.0 }
 0x423   : > { %v3789_v53 = vpop.f32.mrf.mxu1  ;;  %3934 = vadd.xlane.f32.xlu1 %v3933_v56 }
 0x424   : > { %v3790_v28 = vadd.f32 %v8545_v55, %v3789_v53  ;;  %v8595_v54 = vpop.xlane.xlu2 %3872  ;;  %v3898_v53 = vsel %vm3855_vm1, %v3853_v8, 0.0 }
 0x426   : > { %v3823_v32 = vmax.f32 %v3790_v28, 0.0 }
 0x428   : > { %v3912_v60 = vmul.f32 %v8551_v17, %v3823_v32 }
 0x42a   : > { %v3936_v35 = vsel %vm3855_vm1, %v3912_v60, 0.0 }
 0x42b   : > { %v3791_v58 = vpop.f32.mrf.mxu1  ;;  %3937 = vadd.xlane.f32.xlu2 %v3936_v35 }
 0x42c   : > { %v3792_v61 = vadd.f32 %v8545_v55, %v3791_v58  ;;  %v8610_v60 = vpop.xlane.xlu0 %3875 }
 0x42e   : > { %v3824_v49 = vmax.f32 %v3792_v61, 0.0 }
 0x430   : > { %v3913_v12 = vmul.f32 %v8551_v17, %v3824_v49 }
 0x432   : > { %v3939_v11 = vsel %vm3855_vm1, %v3913_v12, 0.0  ;;  %v3901_v12 = vsel %vm3855_vm1, %v3854_v37, 0.0 }
 0x433   : > { %v3794_v14 = vpop.f32.mrf.mxu1  ;;  %3940 = vadd.xlane.f32.xlu0 %v3939_v11 }
 0x434   : > { %v3795_v62 = vadd.f32 %v8545_v55, %v3794_v14  ;;  %v8600_v43 = vpop.xlane.xlu2 %3878 }
 0x436   : > { %v3825_v63 = vmax.f32 %v3795_v62, 0.0 }
 0x438   : > { %v3914_v45 = vmul.f32 %v8551_v17, %v3825_v63 }
 0x43a   : > { %v3942_v36 = vsel %vm3855_vm1, %v3914_v45, 0.0  ;;  %v8624_v45 = vld [vmem:[#allocation2] ss:$0 sm:$0xff] }
 0x43b   : > { %v3796_v52 = vpop.f32.mrf.mxu1  ;;  %3943 = vadd.xlane.f32.xlu1 %v3942_v36 }
 0x43c   : > { %v3797_v42 = vadd.f32 %v8545_v55, %v3796_v52  ;;  %v8602_v20 = vpop.xlane.xlu1 %3881 }
 0x43e   : > { %v3826_v16 = vmax.f32 %v3797_v42, 0.0 }
 0x440   : > { %v3915_v0 = vmul.f32 %v8551_v17, %v3826_v16 }
 0x442   : > { %v3945_v47 = vsel %vm3855_vm1, %v3915_v0, 0.0 }
 0x443   : > { %v3799_v1 = vpop.f32.mrf.mxu1  ;;  %3946 = vadd.xlane.f32.xlu0 %v3945_v47 }
 0x444   : > { %v3800_v3 = vadd.f32 %v8545_v55, %v3799_v1  ;;  %v8622_v63 = vpop.xlane.xlu0 %3884 }
 0x446   : > { %v3827_v24 = vmax.f32 %v3800_v3, 0.0 }
 0x448   : > { %v3916_v9 = vmul.f32 %v8551_v17, %v3827_v24 }
 0x44a   : > { %v3948_v18 = vsel %vm3855_vm1, %v3916_v9, 0.0 }
 0x44b   : > { %v3801_v4 = vpop.f32.mrf.mxu1  ;;  %3949 = vadd.xlane.f32.xlu2 %v3948_v18 }
 0x44c   : > { %v3802_v15 = vadd.f32 %v8545_v55, %v3801_v4  ;;  %v8612_v35 = vpop.xlane.xlu2 %3887 }
 0x44e   : > { %v3828_v46 = vmax.f32 %v3802_v15, 0.0 }
 0x450   : > { %v3917_v34 = vmul.f32 %v8551_v17, %v3828_v46 }
 0x452   : > { %v3951_v33 = vsel %vm3855_vm1, %v3917_v34, 0.0 }
 0x453   : > { %v3804_v7 = vpop.f32.mrf.mxu1  ;;  %3952 = vadd.xlane.f32.xlu1 %v3951_v33 }
 0x454   : > { %v3805_v57 = vadd.f32 %v8545_v55, %v3804_v7  ;;  %v8614_v58 = vpop.xlane.xlu1 %3890 }
 0x456   : > { %v3829_v44 = vmax.f32 %v3805_v57, 0.0 }
 0x458   : > { %v3918_v13 = vmul.f32 %v8551_v17, %v3829_v44 }
 0x45a   : > { %v3954_v2 = vsel %vm3855_vm1, %v3918_v13, 0.0 }
 0x45b   : > { %v3806_v41 = vpop.f32.mrf.mxu1  ;;  %3955 = vadd.xlane.f32.xlu0 %v3954_v2 }
 0x45c   : > { %v3807_v48 = vadd.f32 %v8545_v55, %v3806_v41  ;;  %v8631_v1 = vpop.xlane.xlu0 %3893 }
 0x45e   : > { %v3830_v38 = vmax.f32 %v3807_v48, 0.0 }
 0x460   : > { %v3919_v30 = vmul.f32 %v8551_v17, %v3830_v38 }
 0x462   : > { %v3957_v59 = vsel %vm3855_vm1, %v3919_v30, 0.0 }
 0x463   : > { %v3809_v40 = vpop.f32.mrf.mxu1  ;;  %3958 = vadd.xlane.f32.xlu2 %v3957_v59 }
 0x464   : > { %v3810_v23 = vadd.f32 %v8545_v55, %v3809_v40  ;;  %v8626_v36 = vpop.xlane.xlu2 %3896 }
 0x466   : > { %v3831_v31 = vmax.f32 %v3810_v23, 0.0 }
 0x468   : > { %v3920_v29 = vmul.f32 %v8551_v17, %v3831_v31 }
 0x46a   : > { %v3960_v19 = vsel %vm3855_vm1, %v3920_v29, 0.0 }
 0x46b   : > { %v3811_v51 = vpop.f32.mrf.mxu1  ;;  %3961 = vadd.xlane.f32.xlu1 %v3960_v19 }
 0x46c   : > { %v3812_v39 = vadd.f32 %v8545_v55, %v3811_v51 }
 0x46e   : > { %v3832_v6 = vmax.f32 %v3812_v39, 0.0 }
 0x470   : > { %v3921_v25 = vmul.f32 %v8551_v17, %v3832_v6 }
 0x472   : > { %v3963_v56 = vsel %vm3855_vm1, %v3921_v25, 0.0 }
 0x473   : > { %v3814_v28 = vpop.f32.mrf.mxu1  ;;  %3964 = vadd.xlane.f32.xlu0 %v3963_v56  ;;  %3899 = vadd.xlane.f32.xlu1 %v3898_v53 }
 0x474   : > { %v3815_v32 = vadd.f32 %v8545_v55, %v3814_v28 }
 0x476   : > { %v3833_v61 = vmax.f32 %v3815_v32, 0.0 }
 0x478   : > { %v3922_v49 = vmul.f32 %v8551_v17, %v3833_v61 }
 0x47a   : > { %v3966_v11 = vsel %vm3855_vm1, %v3922_v49, 0.0 }
 0x47b   : > { %v3816_v14 = vpop.f32.mrf.mxu1  ;;  %3902 = vadd.xlane.f32.xlu0 %v3901_v12  ;;  %3967 = vadd.xlane.f32.xlu2 %v3966_v11 }
 0x47c   : > { %v3817_v62 = vadd.f32 %v8545_v55, %v3816_v14 }
 0x47e   : > { %v3834_v52 = vmax.f32 %v3817_v62, 0.0  ;;  %v3926_v42 = vpop.xlane.xlu1 %3925 }
 0x47f   : > { %v3972_v50 = vadd.f32 %v3926_v42, %v3858_v21 }
 0x480   : > { %v3923_v27 = vmul.f32 %v8551_v17, %v3834_v52 }
 0x481   : > { %v3992_v16 = vadd.f32 %v8624_v45, %v3972_v50 }
 0x482   : > { %v3969_v0 = vsel %vm3855_vm1, %v3923_v27, 0.0 }
 0x483   : > { %v5641_v47 = vmul.f32 -1.442695, %v3992_v16  ;;  %3970 = vadd.xlane.f32.xlu1 %v3969_v0 }
 0x485   : > { %6023 = vpow2.f32 %v5641_v47 }
 0x486   : > { %v3929_v55 = vpop.xlane.xlu2 %3928 }
 0x487   : > { %v3973_v3 = vadd.f32 %v3929_v55, %v3861_v22 }
 0x489   : > { %v3993_v24 = vadd.f32 %v8624_v45, %v3973_v3 }
 0x48b   : > { %v6024_v9 = vpop.eup %6023  ;;  %v5642_v18 = vmul.f32 -1.442695, %v3993_v24 }
 0x48c   : > { %v4056_v4 = vadd.f32 1.0, %v6024_v9 }
 0x48d   : > { %6025 = vpow2.f32 %v5642_v18 }
 0x48e   : > { %6027 = vrcp.f32 %v4056_v4  ;;  %v3932_v15 = vpop.xlane.xlu0 %3931  ;;  %v4083_v23 = vand.u32 2147483648, %v4056_v4  ;;  %vm4077_vm3 = vweird.f32 %v4056_v4  ;;  %v4081_v19 = vand.u32 2147483647, %v4056_v4 }
 0x48f   : > { %v3974_v17 = vadd.f32 %v3932_v15, %v8585_v5 }
 0x490   : > { %v4084_v6 = vor.u32 1.1754944e-38, %v4083_v23  ;;  %vm4082_vm5 = vcmp.eq.f32.partialorder %v4081_v19, 8.507059e+37 }
 0x491   : > { %v3994_v46 = vadd.f32 %v8624_v45, %v3974_v17 }
 0x493   : > { %v6026_v34 = vpop.eup %6025  ;;  %v5643_v33 = vmul.f32 -1.442695, %v3994_v46 }
 0x494   : > { %v6028_v7 = vpop.eup %6027  ;;  %v4057_v57 = vadd.f32 1.0, %v6026_v34 }
 0x495   : > { %6029 = vpow2.f32 %v5643_v33  ;;  %v4073_v44 = vmul.f32 %v6028_v7, %v4056_v4  ;;  %vm4078_vm2 = vweird.f32 %v6028_v7 }
 0x496   : > { %6031 = vrcp.f32 %v4057_v57  ;;  %v3935_v13 = vpop.xlane.xlu1 %3934  ;;  %vm4079_vm4 = vmor %vm4077_vm3, %vm4078_vm2  ;;  %v4098_v37 = vand.u32 2147483648, %v4057_v57  ;;  %vm4092_vm7 = vweird.f32 %v4057_v57  ;;  %v4096_v12 = vand.u32 2147483647, %v4057_v57 }
 0x497   : > { %v3975_v2 = vadd.f32 %v3935_v13, %v8593_v10  ;;  %v4074_v41 = vsub.f32 1.0, %v4073_v44 }
 0x498   : > { %v4099_v42 = vor.u32 1.1754944e-38, %v4098_v37  ;;  %vm4097_vm9 = vcmp.eq.f32.partialorder %v4096_v12, 8.507059e+37 }
 0x499   : > { %v3995_v48 = vadd.f32 %v8624_v45, %v3975_v2  ;;  %v4075_v38 = vmul.f32 %v6028_v7, %v4074_v41 }
 0x49b   : > { %v6030_v30 = vpop.eup %6029  ;;  %v5644_v59 = vmul.f32 -1.442695, %v3995_v48  ;;  %v4076_v40 = vadd.f32 %v6028_v7, %v4075_v38 }
 0x49c   : > { %v6032_v21 = vpop.eup %6031  ;;  %v8638_v5 = vadd.f32 1.0, %v6030_v30 }
 0x49d   : > { %6033 = vpow2.f32 %v5644_v59  ;;  %v4088_v31 = vmul.f32 %v6032_v21, %v4057_v57  ;;  %v4080_v39 = vsel %vm4079_vm4, %v6028_v7, %v4076_v40  ;;  %vm4093_vm6 = vweird.f32 %v6032_v21 }
 0x49e   : > { %6035 = vrcp.f32 %v8638_v5  ;;  %v3938_v29 = vpop.xlane.xlu2 %3937  ;;  %v4085_v53 = vsel %vm4082_vm5, %v4084_v6, %v4080_v39  ;;  %vm4094_vm8 = vmor %vm4092_vm7, %vm4093_vm6  ;;  %vm4107_vm11 = vweird.f32 %v8638_v5  ;;  %v4111_v18 = vand.u32 2147483647, %v8638_v5 }
 0x49f   : > { %v3976_v10 = vadd.f32 %v3938_v29, %v8587_v26  ;;  %v4089_v51 = vsub.f32 1.0, %v4088_v31 }
 0x4a0   : > { %vm4112_vm13 = vcmp.eq.f32.partialorder %v4111_v18, 8.507059e+37 }
 0x4a1   : > { %v3996_v22 = vadd.f32 %v8624_v45, %v3976_v10  ;;  %v4090_v8 = vmul.f32 %v6032_v21, %v4089_v51 }
 0x4a3   : > { %v6034_v25 = vpop.eup %6033  ;;  %v5645_v56 = vmul.f32 -1.442695, %v3996_v22  ;;  %v4091_v61 = vadd.f32 %v6032_v21, %v4090_v8 }
 0x4a4   : > { %v6036_v28 = vpop.eup %6035  ;;  %v8643_v32 = vadd.f32 1.0, %v6034_v25  ;;  %4312 = vxpose.xlu2.b32.start [1/16] (narrow) %v4085_v53, 8 }
 0x4a5   : > { %6037 = vpow2.f32 %v5645_v56  ;;  %v4103_v26 = vmul.f32 %v6036_v28, %v8638_v5  ;;  %v4095_v62 = vsel %vm4094_vm8, %v6032_v21, %v4091_v61  ;;  %vm4108_vm10 = vweird.f32 %v6036_v28 }
 0x4a6   : > { %6039 = vrcp.f32 %v8643_v32  ;;  %v3941_v49 = vpop.xlane.xlu0 %3940  ;;  %v4100_v0 = vsel %vm4097_vm9, %v4099_v42, %v4095_v62  ;;  %vm4109_vm12 = vmor %vm4107_vm11, %vm4108_vm10  ;;  %vm4122_vm15 = vweird.f32 %v8643_v32  ;;  %v4126_v30 = vand.u32 2147483647, %v8643_v32 }
 0x4a7   : > { %v3977_v11 = vadd.f32 %v3941_v49, %v8595_v54  ;;  %v4104_v14 = vsub.f32 1.0, %v4103_v26  ;;  %v4113_v54 = vand.u32 2147483648, %v8638_v5 }
 0x4a8   : > { %vm4127_vm1 = vcmp.eq.f32.partialorder %v4126_v30, 8.507059e+37 }
 0x4a9   : > { %v3997_v52 = vadd.f32 %v8624_v45, %v3977_v11  ;;  %v4105_v50 = vmul.f32 %v6036_v28, %v4104_v14  ;;  %v4114_v34 = vor.u32 1.1754944e-38, %v4113_v54 }
 0x4ab   : > { %v6038_v27 = vpop.eup %6037  ;;  %v5646_v16 = vmul.f32 -1.442695, %v3997_v52  ;;  %v4106_v3 = vadd.f32 %v6036_v28, %v4105_v50 }
 0x4ac   : > { %v6040_v47 = vpop.eup %6039  ;;  %v8649_v55 = vadd.f32 1.0, %v6038_v27  ;;  %4313 = vxpose.xlu2.b32.cont [2/16] (narrow) %v4100_v0, 8 }
 0x4ad   : > { %6041 = vpow2.f32 %v5646_v16  ;;  %v4118_v24 = vmul.f32 %v6040_v47, %v8643_v32  ;;  %v4110_v17 = vsel %vm4109_vm12, %v6036_v28, %v4106_v3  ;;  %vm4123_vm14 = vweird.f32 %v6040_v47 }
 0x4ae   : > { %6043 = vrcp.f32 %v8649_v55  ;;  %v3944_v9 = vpop.xlane.xlu1 %3943  ;;  %v4115_v44 = vsel %vm4112_vm13, %v4114_v34, %v4110_v17  ;;  %vm4124_vm0 = vmor %vm4122_vm15, %vm4123_vm14  ;;  %vm4137_vm3 = vweird.f32 %v8649_v55  ;;  %v4141_v25 = vand.u32 2147483647, %v8649_v55 }
 0x4af   : > { %v3978_v4 = vadd.f32 %v3944_v9, %v8610_v60  ;;  %v4119_v15 = vsub.f32 1.0, %v4118_v24  ;;  %v4128_v60 = vand.u32 2147483648, %v8643_v32 }
 0x4b0   : > { %vm4142_vm5 = vcmp.eq.f32.partialorder %v4141_v25, 8.507059e+37 }
 0x4b1   : > { %v3998_v46 = vadd.f32 %v8624_v45, %v3978_v4  ;;  %v4120_v33 = vmul.f32 %v6040_v47, %v4119_v15  ;;  %v4129_v23 = vor.u32 1.1754944e-38, %v4128_v60 }
 0x4b3   : > { %v6042_v7 = vpop.eup %6041  ;;  %v5647_v57 = vmul.f32 -1.442695, %v3998_v46  ;;  %v4121_v41 = vadd.f32 %v6040_v47, %v4120_v33 }
 0x4b4   : > { %v6044_v13 = vpop.eup %6043  ;;  %v8658_v2 = vadd.f32 1.0, %v6042_v7  ;;  %4314 = vxpose.xlu2.b32.cont [3/16] (narrow) %v4115_v44, 8 }
 0x4b5   : > { %6045 = vpow2.f32 %v5647_v57  ;;  %v4133_v48 = vmul.f32 %v6044_v13, %v8649_v55  ;;  %v4125_v5 = vsel %vm4124_vm0, %v6040_v47, %v4121_v41  ;;  %vm4138_vm2 = vweird.f32 %v6044_v13 }
 0x4b6   : > { %6047 = vrcp.f32 %v8658_v2  ;;  %v3947_v38 = vpop.xlane.xlu0 %3946  ;;  %v4130_v10 = vsel %vm4127_vm1, %v4129_v23, %v4125_v5  ;;  %vm4139_vm4 = vmor %vm4137_vm3, %vm4138_vm2  ;;  %vm4152_vm7 = vweird.f32 %v8658_v2  ;;  %v4156_v50 = vand.u32 2147483647, %v8658_v2 }
 0x4b7   : > { %v3979_v59 = vadd.f32 %v3947_v38, %v8600_v43  ;;  %v4134_v21 = vsub.f32 1.0, %v4133_v48  ;;  %v4143_v43 = vand.u32 2147483648, %v8649_v55 }
 0x4b8   : > { %vm4157_vm9 = vcmp.eq.f32.partialorder %v4156_v50, 8.507059e+37 }
 0x4b9   : > { %v3999_v40 = vadd.f32 %v8624_v45, %v3979_v59  ;;  %v4135_v31 = vmul.f32 %v6044_v13, %v4134_v21  ;;  %v4144_v61 = vor.u32 1.1754944e-38, %v4143_v43 }
 0x4bb   : > { %v6046_v29 = vpop.eup %6045  ;;  %v5648_v19 = vmul.f32 -1.442695, %v3999_v40  ;;  %v4136_v22 = vadd.f32 %v6044_v13, %v4135_v31 }
 0x4bc   : > { %v6048_v51 = vpop.eup %6047  ;;  %v8667_v39 = vadd.f32 1.0, %v6046_v29  ;;  %4315 = vxpose.xlu2.b32.cont [4/16] (narrow) %v4130_v10, 8 }
 0x4bd   : > { %6049 = vpow2.f32 %v5648_v19  ;;  %v4148_v6 = vmul.f32 %v6048_v51, %v8658_v2  ;;  %v4140_v28 = vsel %vm4139_vm4, %v6044_v13, %v4136_v22  ;;  %vm4153_vm6 = vweird.f32 %v6048_v51 }
 0x4be   : > { %6051 = vrcp.f32 %v8667_v39  ;;  %v3950_v8 = vpop.xlane.xlu2 %3949  ;;  %v4145_v12 = vsel %vm4142_vm5, %v4144_v61, %v4140_v28  ;;  %vm4154_vm8 = vmor %vm4152_vm7, %vm4153_vm6  ;;  %vm4167_vm11 = vweird.f32 %v8667_v39  ;;  %v4171_v34 = vand.u32 2147483647, %v8667_v39 }
 0x4bf   : > { %v3980_v56 = vadd.f32 %v3950_v8, %v8602_v20  ;;  %v4149_v53 = vsub.f32 1.0, %v4148_v6  ;;  %v4158_v20 = vand.u32 2147483648, %v8658_v2 }
 0x4c0   : > { %vm4172_vm13 = vcmp.eq.f32.partialorder %v4171_v34, 8.507059e+37 }
 0x4c1   : > { %v4000_v32 = vadd.f32 %v8624_v45, %v3980_v56  ;;  %v4150_v37 = vmul.f32 %v6048_v51, %v4149_v53  ;;  %v4159_v55 = vor.u32 1.1754944e-38, %v4158_v20 }
 0x4c3   : > { %v6050_v26 = vpop.eup %6049  ;;  %v5649_v49 = vmul.f32 -1.442695, %v4000_v32  ;;  %v4151_v62 = vadd.f32 %v6048_v51, %v4150_v37 }
 0x4c4   : > { %v6052_v11 = vpop.eup %6051  ;;  %v8676_v14 = vadd.f32 1.0, %v6050_v26  ;;  %4316 = vxpose.xlu2.b32.cont [5/16] (narrow) %v4145_v12, 8 }
 0x4c5   : > { %6053 = vpow2.f32 %v5649_v49  ;;  %v4163_v52 = vmul.f32 %v6052_v11, %v8667_v39  ;;  %v4155_v0 = vsel %vm4154_vm8, %v6048_v51, %v4151_v62  ;;  %vm4168_vm10 = vweird.f32 %v6052_v11 }
 0x4c6   : > { %6055 = vrcp.f32 %v8676_v14  ;;  %v3953_v42 = vpop.xlane.xlu1 %3952  ;;  %v4160_v9 = vsel %vm4157_vm9, %v4159_v55, %v4155_v0  ;;  %vm4169_vm12 = vmor %vm4167_vm11, %vm4168_vm10  ;;  %vm4182_vm15 = vweird.f32 %v8676_v14  ;;  %v4186_v40 = vand.u32 2147483647, %v8676_v14 }
 0x4c7   : > { %v3981_v27 = vadd.f32 %v3953_v42, %v8622_v63  ;;  %v4164_v16 = vsub.f32 1.0, %v4163_v52  ;;  %v4173_v63 = vand.u32 2147483648, %v8667_v39 }
 0x4c8   : > { %vm4187_vm1 = vcmp.eq.f32.partialorder %v4186_v40, 8.507059e+37 }
 0x4c9   : > { %v4001_v47 = vadd.f32 %v8624_v45, %v3981_v27  ;;  %v4165_v3 = vmul.f32 %v6052_v11, %v4164_v16  ;;  %v4174_v13 = vor.u32 1.1754944e-38, %v4173_v63 }
 0x4cb   : > { %v6054_v54 = vpop.eup %6053  ;;  %v5650_v24 = vmul.f32 -1.442695, %v4001_v47  ;;  %v4166_v15 = vadd.f32 %v6052_v11, %v4165_v3 }
 0x4cc   : > { %v6056_v18 = vpop.eup %6055  ;;  %v8685_v4 = vadd.f32 1.0, %v6054_v54  ;;  %4317 = vxpose.xlu2.b32.cont [6/16] (narrow) %v4160_v9, 8 }
 0x4cd   : > { %6057 = vpow2.f32 %v5650_v24  ;;  %v4178_v17 = vmul.f32 %v6056_v18, %v8676_v14  ;;  %v4170_v57 = vsel %vm4169_vm12, %v6052_v11, %v4166_v15  ;;  %vm4183_vm14 = vweird.f32 %v6056_v18 }
 0x4ce   : > { %6059 = vrcp.f32 %v8685_v4  ;;  %v3956_v46 = vpop.xlane.xlu0 %3955  ;;  %v4175_v48 = vsel %vm4172_vm13, %v4174_v13, %v4170_v57  ;;  %vm4184_vm0 = vmor %vm4182_vm15, %vm4183_vm14  ;;  %vm4197_vm3 = vweird.f32 %v8685_v4  ;;  %v4201_v28 = vand.u32 2147483647, %v8685_v4 }
 0x4cf   : > { %v3982_v33 = vadd.f32 %v3956_v46, %v8612_v35  ;;  %v4179_v7 = vsub.f32 1.0, %v4178_v17  ;;  %v4188_v35 = vand.u32 2147483648, %v8676_v14 }
 0x4d0   : > { %vm4202_vm5 = vcmp.eq.f32.partialorder %v4201_v28, 8.507059e+37 }
 0x4d1   : > { %v4002_v44 = vadd.f32 %v8624_v45, %v3982_v33  ;;  %v4180_v2 = vmul.f32 %v6056_v18, %v4179_v7  ;;  %v4189_v10 = vor.u32 1.1754944e-38, %v4188_v35 }
 0x4d3   : > { %v6058_v41 = vpop.eup %6057  ;;  %v5651_v60 = vmul.f32 -1.442695, %v4002_v44  ;;  %v4181_v59 = vadd.f32 %v6056_v18, %v4180_v2 }
 0x4d4   : > { %v6060_v38 = vpop.eup %6059  ;;  %v8694_v30 = vadd.f32 1.0, %v6058_v41  ;;  %4318 = vxpose.xlu2.b32.cont [7/16] (narrow) %v4175_v48, 8 }
 0x4d5   : > { %6061 = vpow2.f32 %v5651_v60  ;;  %v4193_v21 = vmul.f32 %v6060_v38, %v8685_v4  ;;  %v4185_v29 = vsel %vm4184_vm0, %v6056_v18, %v4181_v59  ;;  %vm4198_vm2 = vweird.f32 %v6060_v38 }
 0x4d6   : > { %6063 = vrcp.f32 %v8694_v30  ;;  %v3959_v5 = vpop.xlane.xlu2 %3958  ;;  %v4190_v43 = vsel %vm4187_vm1, %v4189_v10, %v4185_v29  ;;  %vm4199_vm4 = vmor %vm4197_vm3, %vm4198_vm2  ;;  %vm4212_vm7 = vweird.f32 %v8694_v30  ;;  %v4216_v16 = vand.u32 2147483647, %v8694_v30 }
 0x4d7   : > { %v3983_v23 = vadd.f32 %v3959_v5, %v8614_v58  ;;  %v4194_v31 = vsub.f32 1.0, %v4193_v21  ;;  %v4203_v58 = vand.u32 2147483648, %v8685_v4 }
 0x4d8   : > { %vm4217_vm9 = vcmp.eq.f32.partialorder %v4216_v16, 8.507059e+37 }
 0x4d9   : > { %v4003_v19 = vadd.f32 %v8624_v45, %v3983_v23  ;;  %v4195_v51 = vmul.f32 %v6060_v38, %v4194_v31  ;;  %v4204_v49 = vor.u32 1.1754944e-38, %v4203_v58 }
 0x4db   : > { %v6062_v39 = vpop.eup %6061  ;;  %v5652_v22 = vmul.f32 -1.442695, %v4003_v19  ;;  %v4196_v25 = vadd.f32 %v6060_v38, %v4195_v51 }
 0x4dc   : > { %v6064_v6 = vpop.eup %6063  ;;  %v8703_v8 = vadd.f32 1.0, %v6062_v39  ;;  %4319 = vxpose.xlu2.b32.cont [8/16] (narrow) %v4190_v43, 8 }
 0x4dd   : > { %6065 = vpow2.f32 %v5652_v22  ;;  %v4208_v56 = vmul.f32 %v6064_v6, %v8694_v30  ;;  %v4200_v37 = vsel %vm4199_vm4, %v6060_v38, %v4196_v25  ;;  %vm4213_vm6 = vweird.f32 %v6064_v6 }
 0x4de   : > { %6067 = vrcp.f32 %v8703_v8  ;;  %v3962_v53 = vpop.xlane.xlu1 %3961  ;;  %v4205_v62 = vsel %vm4202_vm5, %v4204_v49, %v4200_v37  ;;  %vm4214_vm8 = vmor %vm4212_vm7, %vm4213_vm6  ;;  %vm4227_vm11 = vweird.f32 %v8703_v8  ;;  %v4231_v7 = vand.u32 2147483647, %v8703_v8 }
 0x4df   : > { %v3984_v32 = vadd.f32 %v3962_v53, %v8631_v1  ;;  %v4209_v61 = vsub.f32 1.0, %v4208_v56  ;;  %v4218_v1 = vand.u32 2147483648, %v8694_v30 }
 0x4e0   : > { %vm4232_vm13 = vcmp.eq.f32.partialorder %v4231_v7, 8.507059e+37 }
 0x4e1   : > { %v4004_v26 = vadd.f32 %v8624_v45, %v3984_v32  ;;  %v4210_v12 = vmul.f32 %v6064_v6, %v4209_v61  ;;  %v4219_v54 = vor.u32 1.1754944e-38, %v4218_v1 }
 0x4e3   : > { %v6066_v11 = vpop.eup %6065  ;;  %v5653_v14 = vmul.f32 -1.442695, %v4004_v26  ;;  %v4211_v42 = vadd.f32 %v6064_v6, %v4210_v12 }
 0x4e4   : > { %v6068_v20 = vpop.eup %6067  ;;  %v8712_v52 = vadd.f32 1.0, %v6066_v11  ;;  %4320 = vxpose.xlu2.b32.cont [9/16] (narrow) %v4205_v62, 8 }
 0x4e5   : > { %6069 = vpow2.f32 %v5653_v14  ;;  %v4223_v50 = vmul.f32 %v6068_v20, %v8703_v8  ;;  %v4215_v55 = vsel %vm4214_vm8, %v6064_v6, %v4211_v42  ;;  %vm4228_vm10 = vweird.f32 %v6068_v20 }
 0x4e6   : > { %6071 = vrcp.f32 %v8712_v52  ;;  %v3965_v27 = vpop.xlane.xlu0 %3964  ;;  %v4220_v4 = vsel %vm4217_vm9, %v4219_v54, %v4215_v55  ;;  %v3900_v34 = vpop.xlane.xlu1 %3899  ;;  %vm4229_vm12 = vmor %vm4227_vm11, %vm4228_vm10  ;;  %v4248_v5 = vand.u32 2147483648, %v8712_v52  ;;  %vm4242_vm15 = vweird.f32 %v8712_v52 }
 0x4e7   : > { %v3985_v0 = vadd.f32 %v3965_v27, %v8626_v36  ;;  %v4224_v47 = vsub.f32 1.0, %v4223_v50  ;;  %v4233_v36 = vand.u32 2147483648, %v8703_v8  ;;  %v4246_v29 = vand.u32 2147483647, %v8712_v52 }
 0x4e8   : > { %v4249_v22 = vor.u32 1.1754944e-38, %v4248_v5 }
 0x4e9   : > { %v4005_v3 = vadd.f32 %v8624_v45, %v3985_v0  ;;  %v4225_v24 = vmul.f32 %v6068_v20, %v4224_v47  ;;  %v4234_v41 = vor.u32 1.1754944e-38, %v4233_v36  ;;  %vm4247_vm1 = vcmp.eq.f32.partialorder %v4246_v29, 8.507059e+37 }
 0x4eb   : > { %v6070_v9 = vpop.eup %6069  ;;  %v5654_v18 = vmul.f32 -1.442695, %v4005_v3  ;;  %v4226_v17 = vadd.f32 %v6068_v20, %v4225_v24 }
 0x4ec   : > { %v6072_v15 = vpop.eup %6071  ;;  %v8721_v63 = vadd.f32 1.0, %v6070_v9  ;;  %4321 = vxpose.xlu2.b32.cont [10/16] (narrow) %v4220_v4, 8 }
 0x4ed   : > { %6073 = vpow2.f32 %v5654_v18  ;;  %v4238_v46 = vmul.f32 %v6072_v15, %v8712_v52  ;;  %v4230_v13 = vsel %vm4229_vm12, %v6068_v20, %v4226_v17  ;;  %vm4243_vm14 = vweird.f32 %v6072_v15 }
 0x4ee   : > { %6075 = vrcp.f32 %v8721_v63  ;;  %v3968_v33 = vpop.xlane.xlu2 %3967  ;;  %v4235_v30 = vsel %vm4232_vm13, %v4234_v41, %v4230_v13  ;;  %v3903_v23 = vpop.xlane.xlu0 %3902  ;;  %vm4244_vm0 = vmor %vm4242_vm15, %vm4243_vm14  ;;  %v4263_v28 = vand.u32 2147483648, %v8721_v63  ;;  %vm4257_vm3 = vweird.f32 %v8721_v63 }
 0x4ef   : > { %v3986_v57 = vadd.f32 %v3968_v33, %v3900_v34  ;;  %v4239_v44 = vsub.f32 1.0, %v4238_v46 }
 0x4f0   : > { %v4264_v26 = vor.u32 1.1754944e-38, %v4263_v28 }
 0x4f1   : > { %v4006_v2 = vadd.f32 %v8624_v45, %v3986_v57  ;;  %v4240_v60 = vmul.f32 %v6072_v15, %v4239_v44 }
 0x4f3   : > { %v6074_v48 = vpop.eup %6073  ;;  %v5655_v38 = vmul.f32 -1.442695, %v4006_v2  ;;  %v4241_v21 = vadd.f32 %v6072_v15, %v4240_v60 }
 0x4f4   : > { %v6076_v59 = vpop.eup %6075  ;;  %v4069_v35 = vadd.f32 1.0, %v6074_v48  ;;  %4322 = vxpose.xlu2.b32.cont [11/16] (narrow) %v4235_v30, 8 }
 0x4f5   : > { %6077 = vpow2.f32 %v5655_v38  ;;  %v4253_v40 = vmul.f32 %v6076_v59, %v8721_v63  ;;  %v4245_v51 = vsel %vm4244_vm0, %v6072_v15, %v4241_v21  ;;  %vm4258_vm2 = vweird.f32 %v6076_v59 }
 0x4f6   : > { %6079 = vrcp.f32 %v4069_v35  ;;  %v3971_v31 = vpop.xlane.xlu1 %3970  ;;  %v4250_v25 = vsel %vm4247_vm1, %v4249_v22, %v4245_v51  ;;  %vm4259_vm4 = vmor %vm4257_vm3, %vm4258_vm2  ;;  %v4278_v52 = vand.u32 2147483648, %v4069_v35  ;;  %vm4272_vm7 = vweird.f32 %v4069_v35 }
 0x4f7   : > { %v3987_v19 = vadd.f32 %v3971_v31, %v3903_v23  ;;  %v4254_v10 = vsub.f32 1.0, %v4253_v40  ;;  %v4276_v1 = vand.u32 2147483647, %v4069_v35 }
 0x4f8   : > { %v4279_v16 = vor.u32 1.1754944e-38, %v4278_v52 }
 0x4f9   : > { %v4007_v39 = vadd.f32 %v8624_v45, %v3987_v19  ;;  %v4255_v43 = vmul.f32 %v6076_v59, %v4254_v10  ;;  %v4261_v45 = vand.u32 2147483647, %v8721_v63  ;;  %vm4277_vm9 = vcmp.eq.f32.partialorder %v4276_v1, 8.507059e+37 }
 0x4fb   : > { %v6078_v6 = vpop.eup %6077  ;;  %v5656_v8 = vmul.f32 -1.442695, %v4007_v39  ;;  %v4256_v53 = vadd.f32 %v6076_v59, %v4255_v43  ;;  %vm4262_vm5 = vcmp.eq.f32.partialorder %v4261_v45, 8.507059e+37 }
 0x4fc   : > { %v6080_v58 = vpop.eup %6079  ;;  %v4070_v56 = vadd.f32 1.0, %v6078_v6  ;;  %4323 = vxpose.xlu2.b32.cont [12/16] (narrow) %v4250_v25, 8 }
 0x4fd   : > { %6081 = vpow2.f32 %v5656_v8  ;;  %v4268_v32 = vmul.f32 %v6080_v58, %v4069_v35  ;;  %v4260_v37 = vsel %vm4259_vm4, %v6076_v59, %v4256_v53  ;;  %vm4273_vm6 = vweird.f32 %v6080_v58 }
 0x4fe   : > { %6083 = vrcp.f32 %v4070_v56  ;;  %v4265_v11 = vsel %vm4262_vm5, %v4264_v26, %v4260_v37  ;;  %vm4274_vm8 = vmor %vm4272_vm7, %vm4273_vm6  ;;  %v4293_v54 = vand.u32 2147483648, %v4070_v56  ;;  %vm4287_vm11 = vweird.f32 %v4070_v56 }
 0x4ff   : > { %v4269_v61 = vsub.f32 1.0, %v4268_v32  ;;  %v4291_v9 = vand.u32 2147483647, %v4070_v56 }
 0x500   : > { %v4294_v15 = vor.u32 1.1754944e-38, %v4293_v54 }
 0x501   : > { %v4270_v49 = vmul.f32 %v6080_v58, %v4269_v61  ;;  %vm4292_vm13 = vcmp.eq.f32.partialorder %v4291_v9, 8.507059e+37 }
 0x503   : > { %v6082_v12 = vpop.eup %6081  ;;  %v4271_v20 = vadd.f32 %v6080_v58, %v4270_v49 }
 0x504   : > { %v6084_v14 = vpop.eup %6083  ;;  %v4071_v62 = vadd.f32 1.0, %v6082_v12  ;;  %4324 = vxpose.xlu2.b32.cont [13/16] (narrow) %v4265_v11, 8 }
 0x505   : > { %v4283_v42 = vmul.f32 %v6084_v14, %v4070_v56  ;;  %v4275_v27 = vsel %vm4274_vm8, %v6080_v58, %v4271_v20  ;;  %vm4288_vm10 = vweird.f32 %v6084_v14 }
 0x506   : > { %6085 = vrcp.f32 %v4071_v62  ;;  %v4280_v47 = vsel %vm4277_vm9, %v4279_v16, %v4275_v27  ;;  %vm4289_vm12 = vmor %vm4287_vm11, %vm4288_vm10  ;;  %v4308_v46 = vand.u32 2147483648, %v4071_v62  ;;  %vm4302_vm15 = vweird.f32 %v4071_v62 }
 0x507   : > { %v4284_v50 = vsub.f32 1.0, %v4283_v42  ;;  %v4306_v34 = vand.u32 2147483647, %v4071_v62 }
 0x508   : > { %v4309_v7 = vor.u32 1.1754944e-38, %v4308_v46 }
 0x509   : > { %v4285_v0 = vmul.f32 %v6084_v14, %v4284_v50  ;;  %vm4307_vm1 = vcmp.eq.f32.partialorder %v4306_v34, 8.507059e+37 }
 0x50b   : > { %v4286_v3 = vadd.f32 %v6084_v14, %v4285_v0 }
 0x50c   : > { %v6086_v55 = vpop.eup %6085  ;;  %4325 = vxpose.xlu2.b32.cont [14/16] (narrow) %v4280_v47, 8 }
 0x50d   : > { %v4298_v24 = vmul.f32 %v6086_v55, %v4071_v62  ;;  %v4290_v4 = vsel %vm4289_vm12, %v6084_v14, %v4286_v3  ;;  %vm4303_vm14 = vweird.f32 %v6086_v55 }
 0x50e   : > { %v4295_v17 = vsel %vm4292_vm13, %v4294_v15, %v4290_v4  ;;  %vm4304_vm0 = vmor %vm4302_vm15, %vm4303_vm14 }
 0x50f   : > { %v4299_v18 = vsub.f32 1.0, %v4298_v24 }
 0x511   : > { %v4300_v63 = vmul.f32 %v6086_v55, %v4299_v18 }
 0x513   : > { %v4301_v36 = vadd.f32 %v6086_v55, %v4300_v63 }
 0x514   : > { %4326 = vxpose.xlu2.b32.cont [15/16] (narrow) %v4295_v17, 8 }
 0x515   : > { %v4305_v33 = vsel %vm4304_vm0, %v6086_v55, %v4301_v36 }
 0x516   : > { %v4310_v57 = vsel %vm4307_vm1, %v4309_v7, %v4305_v33 }
 0x51c   : > { %4327 = vxpose.xlu2.b32.end [16/16] (narrow) %v4310_v57, 8 }
 0x53d   : > { %v4328_v44 = vpop.trf.xlu2 }
 0x53e   : > { %4344 = vst [vmem:[%s512_s27] sm:$0x1] %v4328_v44 }
 0x53f   : > { %6114 = shalt.err (!%p6111_p3)
}
 0x540   : > { %5976 = dma.vmem_to_hbm [thread:$0]  (%p6267_p5), %s4357_s26, 16, %s4359_s25, %s4346_s22  }
 0x541 PF: > { %s8963_s20 = sld [smem:[#allocation6_spill]]  ;;  %p5982_p4 = scmp.ge.s32.totalorder %s6149_s18, 2 }
 0x543   : > { %p5979_p7 = pnand %p5982_p4, %p6271_p6 }
 0x545   : > { %p5980_p8 = pneg %p5979_p7 }
 0x547   : > { %s4370_s15 = sand.u32 1, %s8963_s20  }
 0x548   : > { %s4371_s27 = scalar_lea.sflag [#allocation4], %s4370_s15 }
 0x549   : > { %6132 = dma.done.wait (%p5980_p8), %s4371_s27, 16  }
 0x54a   : > { %6134 = vsyncadd (%p5980_p8), %s4371_s27, 4294967280  ;;  %s8965_s18 = sld [smem:[#allocation8_spill]]  ;;  %s8968_s15 = smov %s6141_s16 }
 0x54b   : > { %s8966_s28 = sld [smem:[#allocation7_spill]] }
 0x54c   : > { %s8967_s17 = sld [smem:[#allocation9_spill]] }
 0x550   : > { %p26_p9 = scmp.ge.s32.totalorder %s8965_s18, 5  }
 0x551   : > { %s8969_s16 = smov %s8966_s28 }
 0x552   :  { %28 = sbr.rel (!%p26_p9) target bundleno = 6 (0x6), region = 114 }
 0x557   :  { %4376 = vsyncpa [#allocation4], 1 }
 0x558   :  { %4378 = vsyncpa [#allocation4 + $0x1], 1 }

</bundles_post_ra>
